<compile_context>
chip_gen: v7x
topology: tpu7x:2x2x1
jax: 0.10.0
libtpu: 0.0.40
codegen_flags: <defaults>
</compile_context>

<pallas_src>
import functools

import numpy as np

import jax
import jax.numpy as jnp
from jax.experimental import pallas as pl
from jax.experimental.pallas import tpu as pltpu


# ------------------------------ Pallas kernel -------------------------------

def _encoder_kernel(x_ref, w_ref, b_ref, s_ref, *rest, heights):
    """Whole encoder chain for one image.

    x_ref : (1, H0, K) bf16      -- input in (H, W*C) lane-packed layout
    w_ref : (n_mats, K, K) bf16  -- block-banded conv matrices, 3 per conv
    b_ref : (n_bias, K) f32      -- lane-tiled bias rows
    s_ref : (nb, H0//2, H0) bf16 -- 0/1 even-row selection matrices (stride 2)
    rest  : nb+1 activation out refs (1, H_i, K) bf16, then pad scratch
    pad   : (H0+2, K) bf16 VMEM scratch, reused by every conv
    """
    num_blocks = len(heights) - 1
    act_refs = rest[:num_blocks + 1]
    pad_ref = rest[num_blocks + 1]
    K = x_ref.shape[-1]

    def conv3(xin, H, w_slot, b_slot):
        """3x3 pad-1 conv as 3 row-shifted (H,K)@(K,K) MXU matmuls.

        Only the two halo rows are zeroed (no full-buffer clear); the
        W-boundary padding lives inside the banded weight matrices.
        Returns (H, K) f32 with bias added.
        """
        pad_ref[0:1, :] = jnp.zeros((1, K), pad_ref.dtype)
        pad_ref[H + 1:H + 2, :] = jnp.zeros((1, K), pad_ref.dtype)
        pad_ref[1:H + 1, :] = xin.astype(pad_ref.dtype)
        acc = jnp.dot(pad_ref[0:H, :], w_ref[w_slot],
                      preferred_element_type=jnp.float32)
        acc = acc + jnp.dot(pad_ref[1:H + 1, :], w_ref[w_slot + 1],
                            preferred_element_type=jnp.float32)
        acc = acc + jnp.dot(pad_ref[2:H + 2, :], w_ref[w_slot + 2],
                            preferred_element_type=jnp.float32)
        return acc + b_ref[b_slot:b_slot + 1, :]

    x = x_ref[0, :, :]                      # (H0, K) bf16
    ws, bs = 0, 0
    for i in range(num_blocks):
        H = heights[i]
        xf = x.astype(jnp.float32)
        # ResBlock: relu(conv2(relu(conv1(x))) + x)
        h1 = jnp.maximum(conv3(x, H, ws + 0, bs + 0), 0.0)
        y = jnp.maximum(conv3(h1, H, ws + 3, bs + 1) + xf, 0.0)
        yb = y.astype(jnp.bfloat16)
        act_refs[i][0, :, :] = yb
        # Stride-2 projection: banded conv at every row, then pick even rows.
        t = conv3(yb, H, ws + 6, bs + 2)    # (H, K) f32, bias included
        Ho = H // 2
        sel = s_ref[i, 0:Ho, 0:H]           # (Ho, H) 0/1 bf16
        x = jnp.dot(sel, t.astype(jnp.bfloat16),
                    preferred_element_type=jnp.float32).astype(jnp.bfloat16)
        ws += 9
        bs += 3

    # Bottleneck ResBlock (no projection afterwards).
    H = heights[num_blocks]
    xf = x.astype(jnp.float32)
    h1 = jnp.maximum(conv3(x, H, ws + 0, bs + 0), 0.0)
    y = jnp.maximum(conv3(h1, H, ws + 3, bs + 1) + xf, 0.0)
    act_refs[num_blocks][0, :, :] = y.astype(jnp.bfloat16)


# --------------------------- weight repacking (once) ------------------------

def _banded(w, W, stride):
    """(3,3,Cin,Cout) conv weights -> 3 block-banded (W*Cin, Wout*Cout) mats.

    mats[kh][wi*Cin+ci, wo*Cout+co] = w[kh, wi - stride*wo + 1, ci, co]
    (zero where the kw index falls outside [0,3): that is exactly the W-edge
    zero padding, so no boundary masks are needed in the kernel).
    """
    _, _, cin, cout = w.shape
    wout = W // stride
    mats = np.zeros((3, W * cin, wout * cout), np.float32)
    for kh in range(3):
        for wo in range(wout):
            for kw in range(3):
                wi = stride * wo + kw - 1
                if 0 <= wi < W:
                    mats[kh, wi * cin:(wi + 1) * cin,
                         wo * cout:(wo + 1) * cout] = w[kh, kw]
    return mats


def pack_params(params, num_filters, num_blocks, H0, W0):
    """One-time weight repack into the lane-packed banded layout (numpy)."""
    assert H0 % (2 ** num_blocks) == 0 and W0 % (2 ** num_blocks) == 0
    K = W0 * num_filters
    mats, biases, heights = [], [], []
    W, H = W0, H0
    for i in range(num_blocks):
        rp = params[f'resblock_{i + 1}']
        pp = params[f'conv2d_proj_{i + 1}']
        mats.append(_banded(np.asarray(rp['w1'], np.float32), W, 1))
        mats.append(_banded(np.asarray(rp['w2'], np.float32), W, 1))
        mats.append(_banded(np.asarray(pp['w'], np.float32), W, 2))
        biases.append(np.tile(np.asarray(rp['b1'], np.float32), W))
        biases.append(np.tile(np.asarray(rp['b2'], np.float32), W))
        biases.append(np.tile(np.asarray(pp['b'], np.float32), W // 2))
        heights.append(H)
        W //= 2
        H //= 2
    bp = params['bottleneck']
    mats.append(_banded(np.asarray(bp['w1'], np.float32), W, 1))
    mats.append(_banded(np.asarray(bp['w2'], np.float32), W, 1))
    biases.append(np.tile(np.asarray(bp['b1'], np.float32), W))
    biases.append(np.tile(np.asarray(bp['b2'], np.float32), W))
    heights.append(H)

    for m in mats:                           # W*C is invariant across stages
        assert m.shape[1] == K and m.shape[2] == K, m.shape
    w_stack = jnp.asarray(np.concatenate(mats, axis=0), dtype=jnp.bfloat16)
    b_stack = jnp.asarray(np.stack(biases, axis=0), dtype=jnp.float32)

    sel = np.zeros((num_blocks, H0 // 2, H0), np.float32)
    Ht = H0
    for i in range(num_blocks):
        for ho in range(Ht // 2):
            sel[i, ho, 2 * ho] = 1.0
        Ht //= 2
    s_stack = jnp.asarray(sel, dtype=jnp.bfloat16)
    return w_stack, b_stack, s_stack, tuple(heights)


# --------------------------- module forward (Pallas) ------------------------

def encoder_resblock_forward(x_nchw, w_pack, b_pack, s_pack, *,
                             heights, num_filters):
    """Mirrors EncoderResBlock.forward; returns the activation list in NCHW."""
    num_blocks = len(heights) - 1
    n, c0, h0, w0 = x_nchw.shape
    K = w_pack.shape[-1]
    assert c0 == num_filters and h0 == heights[0] and w0 * c0 == K

    # NCHW -> (N, H, W*C) lane-packed layout, once at the module boundary.
    x = jnp.transpose(x_nchw, (0, 2, 3, 1)).reshape(n, h0, K)
    x = x.astype(jnp.bfloat16)

    flops = 0
    for idx, h in enumerate(heights):
        n_convs = 3 if idx < num_blocks else 2
        flops += n_convs * 3 * h * K * K * 2
        if idx < num_blocks:
            flops += (h // 2) * h * K * 2
    flops *= n
    bytes_accessed = int(2 * x.size + 2 * w_pack.size + 4 * b_pack.size +
                         2 * s_pack.size + sum(2 * n * h * K for h in heights))

    outs = pl.pallas_call(
        functools.partial(_encoder_kernel, heights=heights),
        out_shape=tuple(jax.ShapeDtypeStruct((n, h, K), jnp.bfloat16)
                        for h in heights),
        grid=(n,),
        in_specs=[
            pl.BlockSpec((1, h0, K), lambda i: (i, 0, 0)),        # image block
            pl.BlockSpec(w_pack.shape, lambda i: (0, 0, 0)),      # resident
            pl.BlockSpec(b_pack.shape, lambda i: (0, 0)),         # resident
            pl.BlockSpec(s_pack.shape, lambda i: (0, 0, 0)),      # resident
        ],
        out_specs=tuple(pl.BlockSpec((1, h, K), lambda i: (i, 0, 0))
                        for h in heights),
        scratch_shapes=[pltpu.VMEM((h0 + 2, K), jnp.bfloat16)],
        compiler_params=pltpu.CompilerParams(
            dimension_semantics=("parallel",)),   # 2 images -> 2 TCs on v7x
        cost_estimate=pl.CostEstimate(flops=int(flops), transcendentals=0,
                                      bytes_accessed=bytes_accessed),
    )(x, w_pack, b_pack, s_pack)

    # Unpack (N, H, W*C) -> NCHW f32 at the module boundary only.
    acts = []
    wd, ch = w0, c0
    for i, h in enumerate(heights):
        a = outs[i].reshape(n, h, wd, ch)
        acts.append(jnp.transpose(a, (0, 3, 1, 2)).astype(jnp.float32))
        wd //= 2
        ch *= 2
    return acts


# ------------------------------- parameters ---------------------------------

def init_params(key, num_filters, num_blocks):
    def conv_init(k, cin, cout):
        kw, kb = jax.random.split(k)
        scale = (2.0 / (9 * cin)) ** 0.5
        w = jax.random.normal(kw, (3, 3, cin, cout), jnp.float32) * scale
        b = jax.random.normal(kb, (cout,), jnp.float32) * 0.01
        return w, b

    keys = jax.random.split(key, 3 * num_blocks + 2)
    params, ki = {}, 0
    for i in range(num_blocks):
        c = num_filters * 2 ** i
        w1, b1 = conv_init(keys[ki], c, c); ki += 1
        w2, b2 = conv_init(keys[ki], c, c); ki += 1
        params[f'resblock_{i + 1}'] = dict(w1=w1, b1=b1, w2=w2, b2=b2)
        wp, bp = conv_init(keys[ki], c, 2 * c); ki += 1
        params[f'conv2d_proj_{i + 1}'] = dict(w=wp, b=bp)
    c = num_filters * 2 ** num_blocks
    w1, b1 = conv_init(keys[ki], c, c); ki += 1
    w2, b2 = conv_init(keys[ki], c, c); ki += 1
    params['bottleneck'] = dict(w1=w1, b1=b1, w2=w2, b2=b2)
    return params


# ----------------------------- plain-JAX reference --------------------------

def _conv_ref(x_nhwc, w, b, stride):
    y = jax.lax.conv_general_dilated(
        x_nhwc, w, (stride, stride), ((1, 1), (1, 1)),
        dimension_numbers=('NHWC', 'HWIO', 'NHWC'),
        precision=jax.lax.Precision.HIGHEST)
    return y + b


def _resblock_ref(x, p):
    h = jnp.maximum(_conv_ref(x, p['w1'], p['b1'], 1), 0.0)
    return jnp.maximum(_conv_ref(h, p['w2'], p['b2'], 1) + x, 0.0)


def encoder_ref(x_nchw, params, num_blocks):
    x = jnp.transpose(x_nchw, (0, 2, 3, 1))
    acts = []
    for i in range(num_blocks):
        x = _resblock_ref(x, params[f'resblock_{i + 1}'])
        acts.append(jnp.transpose(x, (0, 3, 1, 2)))
        pp = params[f'conv2d_proj_{i + 1}']
        x = _conv_ref(x, pp['w'], pp['b'], 2)
    x = _resblock_ref(x, params['bottleneck'])
    acts.append(jnp.transpose(x, (0, 3, 1, 2)))
    return acts


# ----------------------------------- main ------------------------------------

if __name__ == "__main__":
    NUM_FILTERS, NUM_BLOCKS = 4, 4
    H0 = W0 = 16
    key = jax.random.PRNGKey(0)
    kx, kp = jax.random.split(key)
    x = jax.random.normal(kx, (2, NUM_FILTERS, H0, W0), jnp.float32)  # NCHW
    params = init_params(kp, NUM_FILTERS, NUM_BLOCKS)

    # One-time weight repack into the banded / lane-packed layout.
    w_pack, b_pack, s_pack, heights = pack_params(
        params, NUM_FILTERS, NUM_BLOCKS, H0, W0)

    fwd = jax.jit(functools.partial(encoder_resblock_forward,
                                    heights=heights, num_filters=NUM_FILTERS))
    acts = fwd(x, w_pack, b_pack, s_pack)
    acts = [jax.block_until_ready(a) for a in acts]

    # Per-activation check against a plain-JAX f32 reference.  The Pallas path
    # uses bf16 operands with f32 accumulation up to ~14 convs deep, so use a
    # per-block norm-relative bound of 3e-2 (tightened from the previous 0.1).
    ref_acts = encoder_ref(x, params, NUM_BLOCKS)
    assert len(acts) == NUM_BLOCKS + 1
    for idx, (a, r) in enumerate(zip(acts, ref_acts)):
        assert a.shape == r.shape, (a.shape, r.shape)
        rel = jnp.linalg.norm((a - r).astype(jnp.float32)) / (
            jnp.linalg.norm(r) + 1e-6)
        assert float(rel) < 3e-2, f"act {idx}: rel={float(rel)}"

    print("KERNEL_OK")
</pallas_src>

<mosaic_0001>
module attributes {stable_mosaic.version = 11 : i64} {
  func.func @_encoder_kernel(%arg0: i32, %arg1: memref<1x16x64xbf16, #tpu.memory_space<vmem>>, %arg2: memref<42x64x64xbf16, #tpu.memory_space<vmem>>, %arg3: memref<14x64xf32, #tpu.memory_space<vmem>>, %arg4: memref<4x8x16xbf16, #tpu.memory_space<vmem>>, %arg5: memref<1x16x64xbf16, #tpu.memory_space<vmem>>, %arg6: memref<1x8x64xbf16, #tpu.memory_space<vmem>>, %arg7: memref<1x4x64xbf16, #tpu.memory_space<vmem>>, %arg8: memref<1x2x64xbf16, #tpu.memory_space<vmem>>, %arg9: memref<1x1x64xbf16, #tpu.memory_space<vmem>>, %arg10: memref<18x64xbf16, #tpu.memory_space<vmem>>) attributes {dimension_semantics = [#tpu.dimension_semantics<parallel>], iteration_bounds = array<i64: 2>, scalar_prefetch = 0 : i64, scratch_operands = 1 : i64, tpu.core_type = #tpu.core_type<tc>, window_params = [{transform_indices = @transform_0, window_bounds = array<i64: 1, 16, 64>}, {pipeline_mode = #tpu.pipeline_mode<synchronous>, transform_indices = @transform_1, window_bounds = array<i64: 42, 64, 64>}, {pipeline_mode = #tpu.pipeline_mode<synchronous>, transform_indices = @transform_2, window_bounds = array<i64: 14, 64>}, {pipeline_mode = #tpu.pipeline_mode<synchronous>, transform_indices = @transform_3, window_bounds = array<i64: 4, 8, 16>}, {transform_indices = @transform_4, window_bounds = array<i64: 1, 16, 64>}, {transform_indices = @transform_5, window_bounds = array<i64: 1, 8, 64>}, {transform_indices = @transform_6, window_bounds = array<i64: 1, 4, 64>}, {transform_indices = @transform_7, window_bounds = array<i64: 1, 2, 64>}, {transform_indices = @transform_8, window_bounds = array<i64: 1, 1, 64>}]} {
    %c0 = arith.constant 0 : index
    %c0_0 = arith.constant 0 : index
    %c0_1 = arith.constant 0 : index
    %0 = vector.load %arg1[%c0, %c0_0, %c0_1] : memref<1x16x64xbf16, #tpu.memory_space<vmem>>, vector<1x16x64xbf16>
    %1 = vector.shape_cast %0 : vector<1x16x64xbf16> to vector<16x64xbf16>
    %2 = arith.extf %1 : vector<16x64xbf16> to vector<16x64xf32>
    %cst = arith.constant 0.000000e+00 : bf16
    %3 = vector.broadcast %cst : bf16 to vector<1x64xbf16>
    %c0_2 = arith.constant 0 : index
    %c0_3 = arith.constant 0 : index
    %4 = vector.load %arg10[%c0_2, %c0_3] : memref<18x64xbf16, #tpu.memory_space<vmem>>, vector<1x64xbf16>
    tpu.vector_store %arg10[%c0_2, %c0_3], %3 {strides = array<i32>} : memref<18x64xbf16, #tpu.memory_space<vmem>>, vector<1x64xbf16>,
    %cst_4 = arith.constant 0.000000e+00 : bf16
    %5 = vector.broadcast %cst_4 : bf16 to vector<1x64xbf16>
    %c17 = arith.constant 17 : index
    %c0_5 = arith.constant 0 : index
    %6 = vector.load %arg10[%c17, %c0_5] : memref<18x64xbf16, #tpu.memory_space<vmem>>, vector<1x64xbf16>
    tpu.vector_store %arg10[%c17, %c0_5], %5 {strides = array<i32>} : memref<18x64xbf16, #tpu.memory_space<vmem>>, vector<1x64xbf16>,
    %c1 = arith.constant 1 : index
    %c0_6 = arith.constant 0 : index
    %7 = vector.load %arg10[%c1, %c0_6] : memref<18x64xbf16, #tpu.memory_space<vmem>>, vector<16x64xbf16>
    tpu.vector_store %arg10[%c1, %c0_6], %1 {strides = array<i32>} : memref<18x64xbf16, #tpu.memory_space<vmem>>, vector<16x64xbf16>,
    %c0_7 = arith.constant 0 : index
    %c0_8 = arith.constant 0 : index
    %8 = vector.load %arg10[%c0_7, %c0_8] : memref<18x64xbf16, #tpu.memory_space<vmem>>, vector<16x64xbf16>
    %c0_9 = arith.constant 0 : index
    %c0_10 = arith.constant 0 : index
    %c0_11 = arith.constant 0 : index
    %9 = vector.load %arg2[%c0_9, %c0_10, %c0_11] : memref<42x64x64xbf16, #tpu.memory_space<vmem>>, vector<1x64x64xbf16>
    %10 = vector.shape_cast %9 : vector<1x64x64xbf16> to vector<64x64xbf16>
    %cst_12 = arith.constant dense<0.000000e+00> : vector<16x64xf32>
    %11 = tpu.matmul %8, %10, %cst_12 {dimension_numbers = #tpu.dot_dimension_numbers<[1], [0], [0], [1], [0, 0, 1, 1], [], []>} : vector<16x64xbf16>, vector<64x64xbf16>, vector<16x64xf32> -> vector<16x64xf32>
    %c1_13 = arith.constant 1 : index
    %c0_14 = arith.constant 0 : index
    %12 = vector.load %arg10[%c1_13, %c0_14] : memref<18x64xbf16, #tpu.memory_space<vmem>>, vector<16x64xbf16>
    %c1_15 = arith.constant 1 : index
    %c0_16 = arith.constant 0 : index
    %c0_17 = arith.constant 0 : index
    %13 = vector.load %arg2[%c1_15, %c0_16, %c0_17] : memref<42x64x64xbf16, #tpu.memory_space<vmem>>, vector<1x64x64xbf16>
    %14 = vector.shape_cast %13 : vector<1x64x64xbf16> to vector<64x64xbf16>
    %cst_18 = arith.constant dense<0.000000e+00> : vector<16x64xf32>
    %15 = tpu.matmul %12, %14, %cst_18 {dimension_numbers = #tpu.dot_dimension_numbers<[1], [0], [0], [1], [0, 0, 1, 1], [], []>} : vector<16x64xbf16>, vector<64x64xbf16>, vector<16x64xf32> -> vector<16x64xf32>
    %16 = arith.addf %11, %15 : vector<16x64xf32>
    %c2 = arith.constant 2 : index
    %c0_19 = arith.constant 0 : index
    %17 = vector.load %arg10[%c2, %c0_19] : memref<18x64xbf16, #tpu.memory_space<vmem>>, vector<16x64xbf16>
    %c2_20 = arith.constant 2 : index
    %c0_21 = arith.constant 0 : index
    %c0_22 = arith.constant 0 : index
    %18 = vector.load %arg2[%c2_20, %c0_21, %c0_22] : memref<42x64x64xbf16, #tpu.memory_space<vmem>>, vector<1x64x64xbf16>
    %19 = vector.shape_cast %18 : vector<1x64x64xbf16> to vector<64x64xbf16>
    %cst_23 = arith.constant dense<0.000000e+00> : vector<16x64xf32>
    %20 = tpu.matmul %17, %19, %cst_23 {dimension_numbers = #tpu.dot_dimension_numbers<[1], [0], [0], [1], [0, 0, 1, 1], [], []>} : vector<16x64xbf16>, vector<64x64xbf16>, vector<16x64xf32> -> vector<16x64xf32>
    %21 = arith.addf %16, %20 : vector<16x64xf32>
    %c0_24 = arith.constant 0 : index
    %c0_25 = arith.constant 0 : index
    %22 = vector.load %arg3[%c0_24, %c0_25] : memref<14x64xf32, #tpu.memory_space<vmem>>, vector<1x64xf32>
    %23 = vector.broadcast %22 : vector<1x64xf32> to vector<16x64xf32>
    %24 = arith.addf %21, %23 : vector<16x64xf32>
    %cst_26 = arith.constant 0.000000e+00 : f32
    %25 = vector.broadcast %cst_26 : f32 to vector<16x64xf32>
    %26 = arith.maximumf %24, %25 : vector<16x64xf32>
    %cst_27 = arith.constant 0.000000e+00 : bf16
    %27 = vector.broadcast %cst_27 : bf16 to vector<1x64xbf16>
    %c0_28 = arith.constant 0 : index
    %c0_29 = arith.constant 0 : index
    %28 = vector.load %arg10[%c0_28, %c0_29] : memref<18x64xbf16, #tpu.memory_space<vmem>>, vector<1x64xbf16>
    tpu.vector_store %arg10[%c0_28, %c0_29], %27 {strides = array<i32>} : memref<18x64xbf16, #tpu.memory_space<vmem>>, vector<1x64xbf16>,
    %cst_30 = arith.constant 0.000000e+00 : bf16
    %29 = vector.broadcast %cst_30 : bf16 to vector<1x64xbf16>
    %c17_31 = arith.constant 17 : index
    %c0_32 = arith.constant 0 : index
    %30 = vector.load %arg10[%c17_31, %c0_32] : memref<18x64xbf16, #tpu.memory_space<vmem>>, vector<1x64xbf16>
    tpu.vector_store %arg10[%c17_31, %c0_32], %29 {strides = array<i32>} : memref<18x64xbf16, #tpu.memory_space<vmem>>, vector<1x64xbf16>,
    %31 = arith.truncf %26 : vector<16x64xf32> to vector<16x64xbf16>
    %c1_33 = arith.constant 1 : index
    %c0_34 = arith.constant 0 : index
    %32 = vector.load %arg10[%c1_33, %c0_34] : memref<18x64xbf16, #tpu.memory_space<vmem>>, vector<16x64xbf16>
    tpu.vector_store %arg10[%c1_33, %c0_34], %31 {strides = array<i32>} : memref<18x64xbf16, #tpu.memory_space<vmem>>, vector<16x64xbf16>,
    %c0_35 = arith.constant 0 : index
    %c0_36 = arith.constant 0 : index
    %33 = vector.load %arg10[%c0_35, %c0_36] : memref<18x64xbf16, #tpu.memory_space<vmem>>, vector<16x64xbf16>
    %c3 = arith.constant 3 : index
    %c0_37 = arith.constant 0 : index
    %c0_38 = arith.constant 0 : index
    %34 = vector.load %arg2[%c3, %c0_37, %c0_38] : memref<42x64x64xbf16, #tpu.memory_space<vmem>>, vector<1x64x64xbf16>
    %35 = vector.shape_cast %34 : vector<1x64x64xbf16> to vector<64x64xbf16>
    %cst_39 = arith.constant dense<0.000000e+00> : vector<16x64xf32>
    %36 = tpu.matmul %33, %35, %cst_39 {dimension_numbers = #tpu.dot_dimension_numbers<[1], [0], [0], [1], [0, 0, 1, 1], [], []>} : vector<16x64xbf16>, vector<64x64xbf16>, vector<16x64xf32> -> vector<16x64xf32>
    %c1_40 = arith.constant 1 : index
    %c0_41 = arith.constant 0 : index
    %37 = vector.load %arg10[%c1_40, %c0_41] : memref<18x64xbf16, #tpu.memory_space<vmem>>, vector<16x64xbf16>
    %c4 = arith.constant 4 : index
    %c0_42 = arith.constant 0 : index
    %c0_43 = arith.constant 0 : index
    %38 = vector.load %arg2[%c4, %c0_42, %c0_43] : memref<42x64x64xbf16, #tpu.memory_space<vmem>>, vector<1x64x64xbf16>
    %39 = vector.shape_cast %38 : vector<1x64x64xbf16> to vector<64x64xbf16>
    %cst_44 = arith.constant dense<0.000000e+00> : vector<16x64xf32>
    %40 = tpu.matmul %37, %39, %cst_44 {dimension_numbers = #tpu.dot_dimension_numbers<[1], [0], [0], [1], [0, 0, 1, 1], [], []>} : vector<16x64xbf16>, vector<64x64xbf16>, vector<16x64xf32> -> vector<16x64xf32>
    %41 = arith.addf %36, %40 : vector<16x64xf32>
    %c2_45 = arith.constant 2 : index
    %c0_46 = arith.constant 0 : index
    %42 = vector.load %arg10[%c2_45, %c0_46] : memref<18x64xbf16, #tpu.memory_space<vmem>>, vector<16x64xbf16>
    %c5 = arith.constant 5 : index
    %c0_47 = arith.constant 0 : index
    %c0_48 = arith.constant 0 : index
    %43 = vector.load %arg2[%c5, %c0_47, %c0_48] : memref<42x64x64xbf16, #tpu.memory_space<vmem>>, vector<1x64x64xbf16>
    %44 = vector.shape_cast %43 : vector<1x64x64xbf16> to vector<64x64xbf16>
    %cst_49 = arith.constant dense<0.000000e+00> : vector<16x64xf32>
    %45 = tpu.matmul %42, %44, %cst_49 {dimension_numbers = #tpu.dot_dimension_numbers<[1], [0], [0], [1], [0, 0, 1, 1], [], []>} : vector<16x64xbf16>, vector<64x64xbf16>, vector<16x64xf32> -> vector<16x64xf32>
    %46 = arith.addf %41, %45 : vector<16x64xf32>
    %c1_50 = arith.constant 1 : index
    %c0_51 = arith.constant 0 : index
    %47 = vector.load %arg3[%c1_50, %c0_51] : memref<14x64xf32, #tpu.memory_space<vmem>>, vector<1x64xf32>
    %48 = vector.broadcast %47 : vector<1x64xf32> to vector<16x64xf32>
    %49 = arith.addf %46, %48 : vector<16x64xf32>
    %50 = arith.addf %49, %2 : vector<16x64xf32>
    %cst_52 = arith.constant 0.000000e+00 : f32
    %51 = vector.broadcast %cst_52 : f32 to vector<16x64xf32>
    %52 = arith.maximumf %50, %51 : vector<16x64xf32>
    %53 = arith.truncf %52 : vector<16x64xf32> to vector<16x64xbf16>
    %c0_53 = arith.constant 0 : index
    %c0_54 = arith.constant 0 : index
    %c0_55 = arith.constant 0 : index
    %54 = vector.load %arg5[%c0_53, %c0_54, %c0_55] : memref<1x16x64xbf16, #tpu.memory_space<vmem>>, vector<1x16x64xbf16>
    %55 = vector.shape_cast %54 : vector<1x16x64xbf16> to vector<16x64xbf16>
    %56 = vector.shape_cast %53 : vector<16x64xbf16> to vector<1x16x64xbf16>
    tpu.vector_store %arg5[%c0_53, %c0_54, %c0_55], %56 {strides = array<i32>} : memref<1x16x64xbf16, #tpu.memory_space<vmem>>, vector<1x16x64xbf16>,
    %cst_56 = arith.constant 0.000000e+00 : bf16
    %57 = vector.broadcast %cst_56 : bf16 to vector<1x64xbf16>
    %c0_57 = arith.constant 0 : index
    %c0_58 = arith.constant 0 : index
    %58 = vector.load %arg10[%c0_57, %c0_58] : memref<18x64xbf16, #tpu.memory_space<vmem>>, vector<1x64xbf16>
    tpu.vector_store %arg10[%c0_57, %c0_58], %57 {strides = array<i32>} : memref<18x64xbf16, #tpu.memory_space<vmem>>, vector<1x64xbf16>,
    %cst_59 = arith.constant 0.000000e+00 : bf16
    %59 = vector.broadcast %cst_59 : bf16 to vector<1x64xbf16>
    %c17_60 = arith.constant 17 : index
    %c0_61 = arith.constant 0 : index
    %60 = vector.load %arg10[%c17_60, %c0_61] : memref<18x64xbf16, #tpu.memory_space<vmem>>, vector<1x64xbf16>
    tpu.vector_store %arg10[%c17_60, %c0_61], %59 {strides = array<i32>} : memref<18x64xbf16, #tpu.memory_space<vmem>>, vector<1x64xbf16>,
    %c1_62 = arith.constant 1 : index
    %c0_63 = arith.constant 0 : index
    %61 = vector.load %arg10[%c1_62, %c0_63] : memref<18x64xbf16, #tpu.memory_space<vmem>>, vector<16x64xbf16>
    tpu.vector_store %arg10[%c1_62, %c0_63], %53 {strides = array<i32>} : memref<18x64xbf16, #tpu.memory_space<vmem>>, vector<16x64xbf16>,
    %c0_64 = arith.constant 0 : index
    %c0_65 = arith.constant 0 : index
    %62 = vector.load %arg10[%c0_64, %c0_65] : memref<18x64xbf16, #tpu.memory_space<vmem>>, vector<16x64xbf16>
    %c6 = arith.constant 6 : index
    %c0_66 = arith.constant 0 : index
    %c0_67 = arith.constant 0 : index
    %63 = vector.load %arg2[%c6, %c0_66, %c0_67] : memref<42x64x64xbf16, #tpu.memory_space<vmem>>, vector<1x64x64xbf16>
    %64 = vector.shape_cast %63 : vector<1x64x64xbf16> to vector<64x64xbf16>
    %cst_68 = arith.constant dense<0.000000e+00> : vector<16x64xf32>
    %65 = tpu.matmul %62, %64, %cst_68 {dimension_numbers = #tpu.dot_dimension_numbers<[1], [0], [0], [1], [0, 0, 1, 1], [], []>} : vector<16x64xbf16>, vector<64x64xbf16>, vector<16x64xf32> -> vector<16x64xf32>
    %c1_69 = arith.constant 1 : index
    %c0_70 = arith.constant 0 : index
    %66 = vector.load %arg10[%c1_69, %c0_70] : memref<18x64xbf16, #tpu.memory_space<vmem>>, vector<16x64xbf16>
    %c7 = arith.constant 7 : index
    %c0_71 = arith.constant 0 : index
    %c0_72 = arith.constant 0 : index
    %67 = vector.load %arg2[%c7, %c0_71, %c0_72] : memref<42x64x64xbf16, #tpu.memory_space<vmem>>, vector<1x64x64xbf16>
    %68 = vector.shape_cast %67 : vector<1x64x64xbf16> to vector<64x64xbf16>
    %cst_73 = arith.constant dense<0.000000e+00> : vector<16x64xf32>
    %69 = tpu.matmul %66, %68, %cst_73 {dimension_numbers = #tpu.dot_dimension_numbers<[1], [0], [0], [1], [0, 0, 1, 1], [], []>} : vector<16x64xbf16>, vector<64x64xbf16>, vector<16x64xf32> -> vector<16x64xf32>
    %70 = arith.addf %65, %69 : vector<16x64xf32>
    %c2_74 = arith.constant 2 : index
    %c0_75 = arith.constant 0 : index
    %71 = vector.load %arg10[%c2_74, %c0_75] : memref<18x64xbf16, #tpu.memory_space<vmem>>, vector<16x64xbf16>
    %c8 = arith.constant 8 : index
    %c0_76 = arith.constant 0 : index
    %c0_77 = arith.constant 0 : index
    %72 = vector.load %arg2[%c8, %c0_76, %c0_77] : memref<42x64x64xbf16, #tpu.memory_space<vmem>>, vector<1x64x64xbf16>
    %73 = vector.shape_cast %72 : vector<1x64x64xbf16> to vector<64x64xbf16>
    %cst_78 = arith.constant dense<0.000000e+00> : vector<16x64xf32>
    %74 = tpu.matmul %71, %73, %cst_78 {dimension_numbers = #tpu.dot_dimension_numbers<[1], [0], [0], [1], [0, 0, 1, 1], [], []>} : vector<16x64xbf16>, vector<64x64xbf16>, vector<16x64xf32> -> vector<16x64xf32>
    %75 = arith.addf %70, %74 : vector<16x64xf32>
    %c2_79 = arith.constant 2 : index
    %c0_80 = arith.constant 0 : index
    %76 = vector.load %arg3[%c2_79, %c0_80] : memref<14x64xf32, #tpu.memory_space<vmem>>, vector<1x64xf32>
    %77 = vector.broadcast %76 : vector<1x64xf32> to vector<16x64xf32>
    %78 = arith.addf %75, %77 : vector<16x64xf32>
    %c0_81 = arith.constant 0 : index
    %c0_82 = arith.constant 0 : index
    %c0_83 = arith.constant 0 : index
    %79 = vector.load %arg4[%c0_81, %c0_82, %c0_83] : memref<4x8x16xbf16, #tpu.memory_space<vmem>>, vector<1x8x16xbf16>
    %80 = vector.shape_cast %79 : vector<1x8x16xbf16> to vector<8x16xbf16>
    %81 = arith.truncf %78 : vector<16x64xf32> to vector<16x64xbf16>
    %cst_84 = arith.constant dense<0.000000e+00> : vector<8x64xf32>
    %82 = tpu.matmul %80, %81, %cst_84 {dimension_numbers = #tpu.dot_dimension_numbers<[1], [0], [0], [1], [0, 0, 1, 1], [], []>} : vector<8x16xbf16>, vector<16x64xbf16>, vector<8x64xf32> -> vector<8x64xf32>
    %83 = arith.truncf %82 : vector<8x64xf32> to vector<8x64xbf16>
    %84 = arith.extf %83 : vector<8x64xbf16> to vector<8x64xf32>
    %cst_85 = arith.constant 0.000000e+00 : bf16
    %85 = vector.broadcast %cst_85 : bf16 to vector<1x64xbf16>
    %c0_86 = arith.constant 0 : index
    %c0_87 = arith.constant 0 : index
    %86 = vector.load %arg10[%c0_86, %c0_87] : memref<18x64xbf16, #tpu.memory_space<vmem>>, vector<1x64xbf16>
    tpu.vector_store %arg10[%c0_86, %c0_87], %85 {strides = array<i32>} : memref<18x64xbf16, #tpu.memory_space<vmem>>, vector<1x64xbf16>,
    %cst_88 = arith.constant 0.000000e+00 : bf16
    %87 = vector.broadcast %cst_88 : bf16 to vector<1x64xbf16>
    %c9 = arith.constant 9 : index
    %c0_89 = arith.constant 0 : index
    %88 = vector.load %arg10[%c9, %c0_89] : memref<18x64xbf16, #tpu.memory_space<vmem>>, vector<1x64xbf16>
    tpu.vector_store %arg10[%c9, %c0_89], %87 {strides = array<i32>} : memref<18x64xbf16, #tpu.memory_space<vmem>>, vector<1x64xbf16>,
    %c1_90 = arith.constant 1 : index
    %c0_91 = arith.constant 0 : index
    %89 = vector.load %arg10[%c1_90, %c0_91] : memref<18x64xbf16, #tpu.memory_space<vmem>>, vector<8x64xbf16>
    tpu.vector_store %arg10[%c1_90, %c0_91], %83 {strides = array<i32>} : memref<18x64xbf16, #tpu.memory_space<vmem>>, vector<8x64xbf16>,
    %c0_92 = arith.constant 0 : index
    %c0_93 = arith.constant 0 : index
    %90 = vector.load %arg10[%c0_92, %c0_93] : memref<18x64xbf16, #tpu.memory_space<vmem>>, vector<8x64xbf16>
    %c9_94 = arith.constant 9 : index
    %c0_95 = arith.constant 0 : index
    %c0_96 = arith.constant 0 : index
    %91 = vector.load %arg2[%c9_94, %c0_95, %c0_96] : memref<42x64x64xbf16, #tpu.memory_space<vmem>>, vector<1x64x64xbf16>
    %92 = vector.shape_cast %91 : vector<1x64x64xbf16> to vector<64x64xbf16>
    %cst_97 = arith.constant dense<0.000000e+00> : vector<8x64xf32>
    %93 = tpu.matmul %90, %92, %cst_97 {dimension_numbers = #tpu.dot_dimension_numbers<[1], [0], [0], [1], [0, 0, 1, 1], [], []>} : vector<8x64xbf16>, vector<64x64xbf16>, vector<8x64xf32> -> vector<8x64xf32>
    %c1_98 = arith.constant 1 : index
    %c0_99 = arith.constant 0 : index
    %94 = vector.load %arg10[%c1_98, %c0_99] : memref<18x64xbf16, #tpu.memory_space<vmem>>, vector<8x64xbf16>
    %c10 = arith.constant 10 : index
    %c0_100 = arith.constant 0 : index
    %c0_101 = arith.constant 0 : index
    %95 = vector.load %arg2[%c10, %c0_100, %c0_101] : memref<42x64x64xbf16, #tpu.memory_space<vmem>>, vector<1x64x64xbf16>
    %96 = vector.shape_cast %95 : vector<1x64x64xbf16> to vector<64x64xbf16>
    %cst_102 = arith.constant dense<0.000000e+00> : vector<8x64xf32>
    %97 = tpu.matmul %94, %96, %cst_102 {dimension_numbers = #tpu.dot_dimension_numbers<[1], [0], [0], [1], [0, 0, 1, 1], [], []>} : vector<8x64xbf16>, vector<64x64xbf16>, vector<8x64xf32> -> vector<8x64xf32>
    %98 = arith.addf %93, %97 : vector<8x64xf32>
    %c2_103 = arith.constant 2 : index
    %c0_104 = arith.constant 0 : index
    %99 = vector.load %arg10[%c2_103, %c0_104] : memref<18x64xbf16, #tpu.memory_space<vmem>>, vector<8x64xbf16>
    %c11 = arith.constant 11 : index
    %c0_105 = arith.constant 0 : index
    %c0_106 = arith.constant 0 : index
    %100 = vector.load %arg2[%c11, %c0_105, %c0_106] : memref<42x64x64xbf16, #tpu.memory_space<vmem>>, vector<1x64x64xbf16>
    %101 = vector.shape_cast %100 : vector<1x64x64xbf16> to vector<64x64xbf16>
    %cst_107 = arith.constant dense<0.000000e+00> : vector<8x64xf32>
    %102 = tpu.matmul %99, %101, %cst_107 {dimension_numbers = #tpu.dot_dimension_numbers<[1], [0], [0], [1], [0, 0, 1, 1], [], []>} : vector<8x64xbf16>, vector<64x64xbf16>, vector<8x64xf32> -> vector<8x64xf32>
    %103 = arith.addf %98, %102 : vector<8x64xf32>
    %c3_108 = arith.constant 3 : index
    %c0_109 = arith.constant 0 : index
    %104 = vector.load %arg3[%c3_108, %c0_109] : memref<14x64xf32, #tpu.memory_space<vmem>>, vector<1x64xf32>
    %105 = vector.broadcast %104 : vector<1x64xf32> to vector<8x64xf32>
    %106 = arith.addf %103, %105 : vector<8x64xf32>
    %cst_110 = arith.constant 0.000000e+00 : f32
    %107 = vector.broadcast %cst_110 : f32 to vector<8x64xf32>
    %108 = arith.maximumf %106, %107 : vector<8x64xf32>
    %cst_111 = arith.constant 0.000000e+00 : bf16
    %109 = vector.broadcast %cst_111 : bf16 to vector<1x64xbf16>
    %c0_112 = arith.constant 0 : index
    %c0_113 = arith.constant 0 : index
    %110 = vector.load %arg10[%c0_112, %c0_113] : memref<18x64xbf16, #tpu.memory_space<vmem>>, vector<1x64xbf16>
    tpu.vector_store %arg10[%c0_112, %c0_113], %109 {strides = array<i32>} : memref<18x64xbf16, #tpu.memory_space<vmem>>, vector<1x64xbf16>,
    %cst_114 = arith.constant 0.000000e+00 : bf16
    %111 = vector.broadcast %cst_114 : bf16 to vector<1x64xbf16>
    %c9_115 = arith.constant 9 : index
    %c0_116 = arith.constant 0 : index
    %112 = vector.load %arg10[%c9_115, %c0_116] : memref<18x64xbf16, #tpu.memory_space<vmem>>, vector<1x64xbf16>
    tpu.vector_store %arg10[%c9_115, %c0_116], %111 {strides = array<i32>} : memref<18x64xbf16, #tpu.memory_space<vmem>>, vector<1x64xbf16>,
    %113 = arith.truncf %108 : vector<8x64xf32> to vector<8x64xbf16>
    %c1_117 = arith.constant 1 : index
    %c0_118 = arith.constant 0 : index
    %114 = vector.load %arg10[%c1_117, %c0_118] : memref<18x64xbf16, #tpu.memory_space<vmem>>, vector<8x64xbf16>
    tpu.vector_store %arg10[%c1_117, %c0_118], %113 {strides = array<i32>} : memref<18x64xbf16, #tpu.memory_space<vmem>>, vector<8x64xbf16>,
    %c0_119 = arith.constant 0 : index
    %c0_120 = arith.constant 0 : index
    %115 = vector.load %arg10[%c0_119, %c0_120] : memref<18x64xbf16, #tpu.memory_space<vmem>>, vector<8x64xbf16>
    %c12 = arith.constant 12 : index
    %c0_121 = arith.constant 0 : index
    %c0_122 = arith.constant 0 : index
    %116 = vector.load %arg2[%c12, %c0_121, %c0_122] : memref<42x64x64xbf16, #tpu.memory_space<vmem>>, vector<1x64x64xbf16>
    %117 = vector.shape_cast %116 : vector<1x64x64xbf16> to vector<64x64xbf16>
    %cst_123 = arith.constant dense<0.000000e+00> : vector<8x64xf32>
    %118 = tpu.matmul %115, %117, %cst_123 {dimension_numbers = #tpu.dot_dimension_numbers<[1], [0], [0], [1], [0, 0, 1, 1], [], []>} : vector<8x64xbf16>, vector<64x64xbf16>, vector<8x64xf32> -> vector<8x64xf32>
    %c1_124 = arith.constant 1 : index
    %c0_125 = arith.constant 0 : index
    %119 = vector.load %arg10[%c1_124, %c0_125] : memref<18x64xbf16, #tpu.memory_space<vmem>>, vector<8x64xbf16>
    %c13 = arith.constant 13 : index
    %c0_126 = arith.constant 0 : index
    %c0_127 = arith.constant 0 : index
    %120 = vector.load %arg2[%c13, %c0_126, %c0_127] : memref<42x64x64xbf16, #tpu.memory_space<vmem>>, vector<1x64x64xbf16>
    %121 = vector.shape_cast %120 : vector<1x64x64xbf16> to vector<64x64xbf16>
    %cst_128 = arith.constant dense<0.000000e+00> : vector<8x64xf32>
    %122 = tpu.matmul %119, %121, %cst_128 {dimension_numbers = #tpu.dot_dimension_numbers<[1], [0], [0], [1], [0, 0, 1, 1], [], []>} : vector<8x64xbf16>, vector<64x64xbf16>, vector<8x64xf32> -> vector<8x64xf32>
    %123 = arith.addf %118, %122 : vector<8x64xf32>
    %c2_129 = arith.constant 2 : index
    %c0_130 = arith.constant 0 : index
    %124 = vector.load %arg10[%c2_129, %c0_130] : memref<18x64xbf16, #tpu.memory_space<vmem>>, vector<8x64xbf16>
    %c14 = arith.constant 14 : index
    %c0_131 = arith.constant 0 : index
    %c0_132 = arith.constant 0 : index
    %125 = vector.load %arg2[%c14, %c0_131, %c0_132] : memref<42x64x64xbf16, #tpu.memory_space<vmem>>, vector<1x64x64xbf16>
    %126 = vector.shape_cast %125 : vector<1x64x64xbf16> to vector<64x64xbf16>
    %cst_133 = arith.constant dense<0.000000e+00> : vector<8x64xf32>
    %127 = tpu.matmul %124, %126, %cst_133 {dimension_numbers = #tpu.dot_dimension_numbers<[1], [0], [0], [1], [0, 0, 1, 1], [], []>} : vector<8x64xbf16>, vector<64x64xbf16>, vector<8x64xf32> -> vector<8x64xf32>
    %128 = arith.addf %123, %127 : vector<8x64xf32>
    %c4_134 = arith.constant 4 : index
    %c0_135 = arith.constant 0 : index
    %129 = vector.load %arg3[%c4_134, %c0_135] : memref<14x64xf32, #tpu.memory_space<vmem>>, vector<1x64xf32>
    %130 = vector.broadcast %129 : vector<1x64xf32> to vector<8x64xf32>
    %131 = arith.addf %128, %130 : vector<8x64xf32>
    %132 = arith.addf %131, %84 : vector<8x64xf32>
    %cst_136 = arith.constant 0.000000e+00 : f32
    %133 = vector.broadcast %cst_136 : f32 to vector<8x64xf32>
    %134 = arith.maximumf %132, %133 : vector<8x64xf32>
    %135 = arith.truncf %134 : vector<8x64xf32> to vector<8x64xbf16>
    %c0_137 = arith.constant 0 : index
    %c0_138 = arith.constant 0 : index
    %c0_139 = arith.constant 0 : index
    %136 = vector.load %arg6[%c0_137, %c0_138, %c0_139] : memref<1x8x64xbf16, #tpu.memory_space<vmem>>, vector<1x8x64xbf16>
    %137 = vector.shape_cast %136 : vector<1x8x64xbf16> to vector<8x64xbf16>
    %138 = vector.shape_cast %135 : vector<8x64xbf16> to vector<1x8x64xbf16>
    tpu.vector_store %arg6[%c0_137, %c0_138, %c0_139], %138 {strides = array<i32>} : memref<1x8x64xbf16, #tpu.memory_space<vmem>>, vector<1x8x64xbf16>,
    %cst_140 = arith.constant 0.000000e+00 : bf16
    %139 = vector.broadcast %cst_140 : bf16 to vector<1x64xbf16>
    %c0_141 = arith.constant 0 : index
    %c0_142 = arith.constant 0 : index
    %140 = vector.load %arg10[%c0_141, %c0_142] : memref<18x64xbf16, #tpu.memory_space<vmem>>, vector<1x64xbf16>
    tpu.vector_store %arg10[%c0_141, %c0_142], %139 {strides = array<i32>} : memref<18x64xbf16, #tpu.memory_space<vmem>>, vector<1x64xbf16>,
    %cst_143 = arith.constant 0.000000e+00 : bf16
    %141 = vector.broadcast %cst_143 : bf16 to vector<1x64xbf16>
    %c9_144 = arith.constant 9 : index
    %c0_145 = arith.constant 0 : index
    %142 = vector.load %arg10[%c9_144, %c0_145] : memref<18x64xbf16, #tpu.memory_space<vmem>>, vector<1x64xbf16>
    tpu.vector_store %arg10[%c9_144, %c0_145], %141 {strides = array<i32>} : memref<18x64xbf16, #tpu.memory_space<vmem>>, vector<1x64xbf16>,
    %c1_146 = arith.constant 1 : index
    %c0_147 = arith.constant 0 : index
    %143 = vector.load %arg10[%c1_146, %c0_147] : memref<18x64xbf16, #tpu.memory_space<vmem>>, vector<8x64xbf16>
    tpu.vector_store %arg10[%c1_146, %c0_147], %135 {strides = array<i32>} : memref<18x64xbf16, #tpu.memory_space<vmem>>, vector<8x64xbf16>,
    %c0_148 = arith.constant 0 : index
    %c0_149 = arith.constant 0 : index
    %144 = vector.load %arg10[%c0_148, %c0_149] : memref<18x64xbf16, #tpu.memory_space<vmem>>, vector<8x64xbf16>
    %c15 = arith.constant 15 : index
    %c0_150 = arith.constant 0 : index
    %c0_151 = arith.constant 0 : index
    %145 = vector.load %arg2[%c15, %c0_150, %c0_151] : memref<42x64x64xbf16, #tpu.memory_space<vmem>>, vector<1x64x64xbf16>
    %146 = vector.shape_cast %145 : vector<1x64x64xbf16> to vector<64x64xbf16>
    %cst_152 = arith.constant dense<0.000000e+00> : vector<8x64xf32>
    %147 = tpu.matmul %144, %146, %cst_152 {dimension_numbers = #tpu.dot_dimension_numbers<[1], [0], [0], [1], [0, 0, 1, 1], [], []>} : vector<8x64xbf16>, vector<64x64xbf16>, vector<8x64xf32> -> vector<8x64xf32>
    %c1_153 = arith.constant 1 : index
    %c0_154 = arith.constant 0 : index
    %148 = vector.load %arg10[%c1_153, %c0_154] : memref<18x64xbf16, #tpu.memory_space<vmem>>, vector<8x64xbf16>
    %c16 = arith.constant 16 : index
    %c0_155 = arith.constant 0 : index
    %c0_156 = arith.constant 0 : index
    %149 = vector.load %arg2[%c16, %c0_155, %c0_156] : memref<42x64x64xbf16, #tpu.memory_space<vmem>>, vector<1x64x64xbf16>
    %150 = vector.shape_cast %149 : vector<1x64x64xbf16> to vector<64x64xbf16>
    %cst_157 = arith.constant dense<0.000000e+00> : vector<8x64xf32>
    %151 = tpu.matmul %148, %150, %cst_157 {dimension_numbers = #tpu.dot_dimension_numbers<[1], [0], [0], [1], [0, 0, 1, 1], [], []>} : vector<8x64xbf16>, vector<64x64xbf16>, vector<8x64xf32> -> vector<8x64xf32>
    %152 = arith.addf %147, %151 : vector<8x64xf32>
    %c2_158 = arith.constant 2 : index
    %c0_159 = arith.constant 0 : index
    %153 = vector.load %arg10[%c2_158, %c0_159] : memref<18x64xbf16, #tpu.memory_space<vmem>>, vector<8x64xbf16>
    %c17_160 = arith.constant 17 : index
    %c0_161 = arith.constant 0 : index
    %c0_162 = arith.constant 0 : index
    %154 = vector.load %arg2[%c17_160, %c0_161, %c0_162] : memref<42x64x64xbf16, #tpu.memory_space<vmem>>, vector<1x64x64xbf16>
    %155 = vector.shape_cast %154 : vector<1x64x64xbf16> to vector<64x64xbf16>
    %cst_163 = arith.constant dense<0.000000e+00> : vector<8x64xf32>
    %156 = tpu.matmul %153, %155, %cst_163 {dimension_numbers = #tpu.dot_dimension_numbers<[1], [0], [0], [1], [0, 0, 1, 1], [], []>} : vector<8x64xbf16>, vector<64x64xbf16>, vector<8x64xf32> -> vector<8x64xf32>
    %157 = arith.addf %152, %156 : vector<8x64xf32>
    %c5_164 = arith.constant 5 : index
    %c0_165 = arith.constant 0 : index
    %158 = vector.load %arg3[%c5_164, %c0_165] : memref<14x64xf32, #tpu.memory_space<vmem>>, vector<1x64xf32>
    %159 = vector.broadcast %158 : vector<1x64xf32> to vector<8x64xf32>
    %160 = arith.addf %157, %159 : vector<8x64xf32>
    %c1_166 = arith.constant 1 : index
    %c0_167 = arith.constant 0 : index
    %c0_168 = arith.constant 0 : index
    %161 = vector.load %arg4[%c1_166, %c0_167, %c0_168] : memref<4x8x16xbf16, #tpu.memory_space<vmem>>, vector<1x4x8xbf16>
    %162 = vector.shape_cast %161 : vector<1x4x8xbf16> to vector<4x8xbf16>
    %163 = arith.truncf %160 : vector<8x64xf32> to vector<8x64xbf16>
    %cst_169 = arith.constant dense<0.000000e+00> : vector<4x64xf32>
    %164 = tpu.matmul %162, %163, %cst_169 {dimension_numbers = #tpu.dot_dimension_numbers<[1], [0], [0], [1], [0, 0, 1, 1], [], []>} : vector<4x8xbf16>, vector<8x64xbf16>, vector<4x64xf32> -> vector<4x64xf32>
    %165 = arith.truncf %164 : vector<4x64xf32> to vector<4x64xbf16>
    %166 = arith.extf %165 : vector<4x64xbf16> to vector<4x64xf32>
    %cst_170 = arith.constant 0.000000e+00 : bf16
    %167 = vector.broadcast %cst_170 : bf16 to vector<1x64xbf16>
    %c0_171 = arith.constant 0 : index
    %c0_172 = arith.constant 0 : index
    %168 = vector.load %arg10[%c0_171, %c0_172] : memref<18x64xbf16, #tpu.memory_space<vmem>>, vector<1x64xbf16>
    tpu.vector_store %arg10[%c0_171, %c0_172], %167 {strides = array<i32>} : memref<18x64xbf16, #tpu.memory_space<vmem>>, vector<1x64xbf16>,
    %cst_173 = arith.constant 0.000000e+00 : bf16
    %169 = vector.broadcast %cst_173 : bf16 to vector<1x64xbf16>
    %c5_174 = arith.constant 5 : index
    %c0_175 = arith.constant 0 : index
    %170 = vector.load %arg10[%c5_174, %c0_175] : memref<18x64xbf16, #tpu.memory_space<vmem>>, vector<1x64xbf16>
    tpu.vector_store %arg10[%c5_174, %c0_175], %169 {strides = array<i32>} : memref<18x64xbf16, #tpu.memory_space<vmem>>, vector<1x64xbf16>,
    %c1_176 = arith.constant 1 : index
    %c0_177 = arith.constant 0 : index
    %171 = vector.load %arg10[%c1_176, %c0_177] : memref<18x64xbf16, #tpu.memory_space<vmem>>, vector<4x64xbf16>
    tpu.vector_store %arg10[%c1_176, %c0_177], %165 {strides = array<i32>} : memref<18x64xbf16, #tpu.memory_space<vmem>>, vector<4x64xbf16>,
    %c0_178 = arith.constant 0 : index
    %c0_179 = arith.constant 0 : index
    %172 = vector.load %arg10[%c0_178, %c0_179] : memref<18x64xbf16, #tpu.memory_space<vmem>>, vector<4x64xbf16>
    %c18 = arith.constant 18 : index
    %c0_180 = arith.constant 0 : index
    %c0_181 = arith.constant 0 : index
    %173 = vector.load %arg2[%c18, %c0_180, %c0_181] : memref<42x64x64xbf16, #tpu.memory_space<vmem>>, vector<1x64x64xbf16>
    %174 = vector.shape_cast %173 : vector<1x64x64xbf16> to vector<64x64xbf16>
    %cst_182 = arith.constant dense<0.000000e+00> : vector<4x64xf32>
    %175 = tpu.matmul %172, %174, %cst_182 {dimension_numbers = #tpu.dot_dimension_numbers<[1], [0], [0], [1], [0, 0, 1, 1], [], []>} : vector<4x64xbf16>, vector<64x64xbf16>, vector<4x64xf32> -> vector<4x64xf32>
    %c1_183 = arith.constant 1 : index
    %c0_184 = arith.constant 0 : index
    %176 = vector.load %arg10[%c1_183, %c0_184] : memref<18x64xbf16, #tpu.memory_space<vmem>>, vector<4x64xbf16>
    %c19 = arith.constant 19 : index
    %c0_185 = arith.constant 0 : index
    %c0_186 = arith.constant 0 : index
    %177 = vector.load %arg2[%c19, %c0_185, %c0_186] : memref<42x64x64xbf16, #tpu.memory_space<vmem>>, vector<1x64x64xbf16>
    %178 = vector.shape_cast %177 : vector<1x64x64xbf16> to vector<64x64xbf16>
    %cst_187 = arith.constant dense<0.000000e+00> : vector<4x64xf32>
    %179 = tpu.matmul %176, %178, %cst_187 {dimension_numbers = #tpu.dot_dimension_numbers<[1], [0], [0], [1], [0, 0, 1, 1], [], []>} : vector<4x64xbf16>, vector<64x64xbf16>, vector<4x64xf32> -> vector<4x64xf32>
    %180 = arith.addf %175, %179 : vector<4x64xf32>
    %c2_188 = arith.constant 2 : index
    %c0_189 = arith.constant 0 : index
    %181 = vector.load %arg10[%c2_188, %c0_189] : memref<18x64xbf16, #tpu.memory_space<vmem>>, vector<4x64xbf16>
    %c20 = arith.constant 20 : index
    %c0_190 = arith.constant 0 : index
    %c0_191 = arith.constant 0 : index
    %182 = vector.load %arg2[%c20, %c0_190, %c0_191] : memref<42x64x64xbf16, #tpu.memory_space<vmem>>, vector<1x64x64xbf16>
    %183 = vector.shape_cast %182 : vector<1x64x64xbf16> to vector<64x64xbf16>
    %cst_192 = arith.constant dense<0.000000e+00> : vector<4x64xf32>
    %184 = tpu.matmul %181, %183, %cst_192 {dimension_numbers = #tpu.dot_dimension_numbers<[1], [0], [0], [1], [0, 0, 1, 1], [], []>} : vector<4x64xbf16>, vector<64x64xbf16>, vector<4x64xf32> -> vector<4x64xf32>
    %185 = arith.addf %180, %184 : vector<4x64xf32>
    %c6_193 = arith.constant 6 : index
    %c0_194 = arith.constant 0 : index
    %186 = vector.load %arg3[%c6_193, %c0_194] : memref<14x64xf32, #tpu.memory_space<vmem>>, vector<1x64xf32>
    %187 = vector.broadcast %186 : vector<1x64xf32> to vector<4x64xf32>
    %188 = arith.addf %185, %187 : vector<4x64xf32>
    %cst_195 = arith.constant 0.000000e+00 : f32
    %189 = vector.broadcast %cst_195 : f32 to vector<4x64xf32>
    %190 = arith.maximumf %188, %189 : vector<4x64xf32>
    %cst_196 = arith.constant 0.000000e+00 : bf16
    %191 = vector.broadcast %cst_196 : bf16 to vector<1x64xbf16>
    %c0_197 = arith.constant 0 : index
    %c0_198 = arith.constant 0 : index
    %192 = vector.load %arg10[%c0_197, %c0_198] : memref<18x64xbf16, #tpu.memory_space<vmem>>, vector<1x64xbf16>
    tpu.vector_store %arg10[%c0_197, %c0_198], %191 {strides = array<i32>} : memref<18x64xbf16, #tpu.memory_space<vmem>>, vector<1x64xbf16>,
    %cst_199 = arith.constant 0.000000e+00 : bf16
    %193 = vector.broadcast %cst_199 : bf16 to vector<1x64xbf16>
    %c5_200 = arith.constant 5 : index
    %c0_201 = arith.constant 0 : index
    %194 = vector.load %arg10[%c5_200, %c0_201] : memref<18x64xbf16, #tpu.memory_space<vmem>>, vector<1x64xbf16>
    tpu.vector_store %arg10[%c5_200, %c0_201], %193 {strides = array<i32>} : memref<18x64xbf16, #tpu.memory_space<vmem>>, vector<1x64xbf16>,
    %195 = arith.truncf %190 : vector<4x64xf32> to vector<4x64xbf16>
    %c1_202 = arith.constant 1 : index
    %c0_203 = arith.constant 0 : index
    %196 = vector.load %arg10[%c1_202, %c0_203] : memref<18x64xbf16, #tpu.memory_space<vmem>>, vector<4x64xbf16>
    tpu.vector_store %arg10[%c1_202, %c0_203], %195 {strides = array<i32>} : memref<18x64xbf16, #tpu.memory_space<vmem>>, vector<4x64xbf16>,
    %c0_204 = arith.constant 0 : index
    %c0_205 = arith.constant 0 : index
    %197 = vector.load %arg10[%c0_204, %c0_205] : memref<18x64xbf16, #tpu.memory_space<vmem>>, vector<4x64xbf16>
    %c21 = arith.constant 21 : index
    %c0_206 = arith.constant 0 : index
    %c0_207 = arith.constant 0 : index
    %198 = vector.load %arg2[%c21, %c0_206, %c0_207] : memref<42x64x64xbf16, #tpu.memory_space<vmem>>, vector<1x64x64xbf16>
    %199 = vector.shape_cast %198 : vector<1x64x64xbf16> to vector<64x64xbf16>
    %cst_208 = arith.constant dense<0.000000e+00> : vector<4x64xf32>
    %200 = tpu.matmul %197, %199, %cst_208 {dimension_numbers = #tpu.dot_dimension_numbers<[1], [0], [0], [1], [0, 0, 1, 1], [], []>} : vector<4x64xbf16>, vector<64x64xbf16>, vector<4x64xf32> -> vector<4x64xf32>
    %c1_209 = arith.constant 1 : index
    %c0_210 = arith.constant 0 : index
    %201 = vector.load %arg10[%c1_209, %c0_210] : memref<18x64xbf16, #tpu.memory_space<vmem>>, vector<4x64xbf16>
    %c22 = arith.constant 22 : index
    %c0_211 = arith.constant 0 : index
    %c0_212 = arith.constant 0 : index
    %202 = vector.load %arg2[%c22, %c0_211, %c0_212] : memref<42x64x64xbf16, #tpu.memory_space<vmem>>, vector<1x64x64xbf16>
    %203 = vector.shape_cast %202 : vector<1x64x64xbf16> to vector<64x64xbf16>
    %cst_213 = arith.constant dense<0.000000e+00> : vector<4x64xf32>
    %204 = tpu.matmul %201, %203, %cst_213 {dimension_numbers = #tpu.dot_dimension_numbers<[1], [0], [0], [1], [0, 0, 1, 1], [], []>} : vector<4x64xbf16>, vector<64x64xbf16>, vector<4x64xf32> -> vector<4x64xf32>
    %205 = arith.addf %200, %204 : vector<4x64xf32>
    %c2_214 = arith.constant 2 : index
    %c0_215 = arith.constant 0 : index
    %206 = vector.load %arg10[%c2_214, %c0_215] : memref<18x64xbf16, #tpu.memory_space<vmem>>, vector<4x64xbf16>
    %c23 = arith.constant 23 : index
    %c0_216 = arith.constant 0 : index
    %c0_217 = arith.constant 0 : index
    %207 = vector.load %arg2[%c23, %c0_216, %c0_217] : memref<42x64x64xbf16, #tpu.memory_space<vmem>>, vector<1x64x64xbf16>
    %208 = vector.shape_cast %207 : vector<1x64x64xbf16> to vector<64x64xbf16>
    %cst_218 = arith.constant dense<0.000000e+00> : vector<4x64xf32>
    %209 = tpu.matmul %206, %208, %cst_218 {dimension_numbers = #tpu.dot_dimension_numbers<[1], [0], [0], [1], [0, 0, 1, 1], [], []>} : vector<4x64xbf16>, vector<64x64xbf16>, vector<4x64xf32> -> vector<4x64xf32>
    %210 = arith.addf %205, %209 : vector<4x64xf32>
    %c7_219 = arith.constant 7 : index
    %c0_220 = arith.constant 0 : index
    %211 = vector.load %arg3[%c7_219, %c0_220] : memref<14x64xf32, #tpu.memory_space<vmem>>, vector<1x64xf32>
    %212 = vector.broadcast %211 : vector<1x64xf32> to vector<4x64xf32>
    %213 = arith.addf %210, %212 : vector<4x64xf32>
    %214 = arith.addf %213, %166 : vector<4x64xf32>
    %cst_221 = arith.constant 0.000000e+00 : f32
    %215 = vector.broadcast %cst_221 : f32 to vector<4x64xf32>
    %216 = arith.maximumf %214, %215 : vector<4x64xf32>
    %217 = arith.truncf %216 : vector<4x64xf32> to vector<4x64xbf16>
    %c0_222 = arith.constant 0 : index
    %c0_223 = arith.constant 0 : index
    %c0_224 = arith.constant 0 : index
    %218 = vector.load %arg7[%c0_222, %c0_223, %c0_224] : memref<1x4x64xbf16, #tpu.memory_space<vmem>>, vector<1x4x64xbf16>
    %219 = vector.shape_cast %218 : vector<1x4x64xbf16> to vector<4x64xbf16>
    %220 = vector.shape_cast %217 : vector<4x64xbf16> to vector<1x4x64xbf16>
    tpu.vector_store %arg7[%c0_222, %c0_223, %c0_224], %220 {strides = array<i32>} : memref<1x4x64xbf16, #tpu.memory_space<vmem>>, vector<1x4x64xbf16>,
    %cst_225 = arith.constant 0.000000e+00 : bf16
    %221 = vector.broadcast %cst_225 : bf16 to vector<1x64xbf16>
    %c0_226 = arith.constant 0 : index
    %c0_227 = arith.constant 0 : index
    %222 = vector.load %arg10[%c0_226, %c0_227] : memref<18x64xbf16, #tpu.memory_space<vmem>>, vector<1x64xbf16>
    tpu.vector_store %arg10[%c0_226, %c0_227], %221 {strides = array<i32>} : memref<18x64xbf16, #tpu.memory_space<vmem>>, vector<1x64xbf16>,
    %cst_228 = arith.constant 0.000000e+00 : bf16
    %223 = vector.broadcast %cst_228 : bf16 to vector<1x64xbf16>
    %c5_229 = arith.constant 5 : index
    %c0_230 = arith.constant 0 : index
    %224 = vector.load %arg10[%c5_229, %c0_230] : memref<18x64xbf16, #tpu.memory_space<vmem>>, vector<1x64xbf16>
    tpu.vector_store %arg10[%c5_229, %c0_230], %223 {strides = array<i32>} : memref<18x64xbf16, #tpu.memory_space<vmem>>, vector<1x64xbf16>,
    %c1_231 = arith.constant 1 : index
    %c0_232 = arith.constant 0 : index
    %225 = vector.load %arg10[%c1_231, %c0_232] : memref<18x64xbf16, #tpu.memory_space<vmem>>, vector<4x64xbf16>
    tpu.vector_store %arg10[%c1_231, %c0_232], %217 {strides = array<i32>} : memref<18x64xbf16, #tpu.memory_space<vmem>>, vector<4x64xbf16>,
    %c0_233 = arith.constant 0 : index
    %c0_234 = arith.constant 0 : index
    %226 = vector.load %arg10[%c0_233, %c0_234] : memref<18x64xbf16, #tpu.memory_space<vmem>>, vector<4x64xbf16>
    %c24 = arith.constant 24 : index
    %c0_235 = arith.constant 0 : index
    %c0_236 = arith.constant 0 : index
    %227 = vector.load %arg2[%c24, %c0_235, %c0_236] : memref<42x64x64xbf16, #tpu.memory_space<vmem>>, vector<1x64x64xbf16>
    %228 = vector.shape_cast %227 : vector<1x64x64xbf16> to vector<64x64xbf16>
    %cst_237 = arith.constant dense<0.000000e+00> : vector<4x64xf32>
    %229 = tpu.matmul %226, %228, %cst_237 {dimension_numbers = #tpu.dot_dimension_numbers<[1], [0], [0], [1], [0, 0, 1, 1], [], []>} : vector<4x64xbf16>, vector<64x64xbf16>, vector<4x64xf32> -> vector<4x64xf32>
    %c1_238 = arith.constant 1 : index
    %c0_239 = arith.constant 0 : index
    %230 = vector.load %arg10[%c1_238, %c0_239] : memref<18x64xbf16, #tpu.memory_space<vmem>>, vector<4x64xbf16>
    %c25 = arith.constant 25 : index
    %c0_240 = arith.constant 0 : index
    %c0_241 = arith.constant 0 : index
    %231 = vector.load %arg2[%c25, %c0_240, %c0_241] : memref<42x64x64xbf16, #tpu.memory_space<vmem>>, vector<1x64x64xbf16>
    %232 = vector.shape_cast %231 : vector<1x64x64xbf16> to vector<64x64xbf16>
    %cst_242 = arith.constant dense<0.000000e+00> : vector<4x64xf32>
    %233 = tpu.matmul %230, %232, %cst_242 {dimension_numbers = #tpu.dot_dimension_numbers<[1], [0], [0], [1], [0, 0, 1, 1], [], []>} : vector<4x64xbf16>, vector<64x64xbf16>, vector<4x64xf32> -> vector<4x64xf32>
    %234 = arith.addf %229, %233 : vector<4x64xf32>
    %c2_243 = arith.constant 2 : index
    %c0_244 = arith.constant 0 : index
    %235 = vector.load %arg10[%c2_243, %c0_244] : memref<18x64xbf16, #tpu.memory_space<vmem>>, vector<4x64xbf16>
    %c26 = arith.constant 26 : index
    %c0_245 = arith.constant 0 : index
    %c0_246 = arith.constant 0 : index
    %236 = vector.load %arg2[%c26, %c0_245, %c0_246] : memref<42x64x64xbf16, #tpu.memory_space<vmem>>, vector<1x64x64xbf16>
    %237 = vector.shape_cast %236 : vector<1x64x64xbf16> to vector<64x64xbf16>
    %cst_247 = arith.constant dense<0.000000e+00> : vector<4x64xf32>
    %238 = tpu.matmul %235, %237, %cst_247 {dimension_numbers = #tpu.dot_dimension_numbers<[1], [0], [0], [1], [0, 0, 1, 1], [], []>} : vector<4x64xbf16>, vector<64x64xbf16>, vector<4x64xf32> -> vector<4x64xf32>
    %239 = arith.addf %234, %238 : vector<4x64xf32>
    %c8_248 = arith.constant 8 : index
    %c0_249 = arith.constant 0 : index
    %240 = vector.load %arg3[%c8_248, %c0_249] : memref<14x64xf32, #tpu.memory_space<vmem>>, vector<1x64xf32>
    %241 = vector.broadcast %240 : vector<1x64xf32> to vector<4x64xf32>
    %242 = arith.addf %239, %241 : vector<4x64xf32>
    %c2_250 = arith.constant 2 : index
    %c0_251 = arith.constant 0 : index
    %c0_252 = arith.constant 0 : index
    %243 = vector.load %arg4[%c2_250, %c0_251, %c0_252] : memref<4x8x16xbf16, #tpu.memory_space<vmem>>, vector<1x2x4xbf16>
    %244 = vector.shape_cast %243 : vector<1x2x4xbf16> to vector<2x4xbf16>
    %245 = arith.truncf %242 : vector<4x64xf32> to vector<4x64xbf16>
    %cst_253 = arith.constant dense<0.000000e+00> : vector<2x64xf32>
    %246 = tpu.matmul %244, %245, %cst_253 {dimension_numbers = #tpu.dot_dimension_numbers<[1], [0], [0], [1], [0, 0, 1, 1], [], []>} : vector<2x4xbf16>, vector<4x64xbf16>, vector<2x64xf32> -> vector<2x64xf32>
    %247 = arith.truncf %246 : vector<2x64xf32> to vector<2x64xbf16>
    %248 = arith.extf %247 : vector<2x64xbf16> to vector<2x64xf32>
    %cst_254 = arith.constant 0.000000e+00 : bf16
    %249 = vector.broadcast %cst_254 : bf16 to vector<1x64xbf16>
    %c0_255 = arith.constant 0 : index
    %c0_256 = arith.constant 0 : index
    %250 = vector.load %arg10[%c0_255, %c0_256] : memref<18x64xbf16, #tpu.memory_space<vmem>>, vector<1x64xbf16>
    tpu.vector_store %arg10[%c0_255, %c0_256], %249 {strides = array<i32>} : memref<18x64xbf16, #tpu.memory_space<vmem>>, vector<1x64xbf16>,
    %cst_257 = arith.constant 0.000000e+00 : bf16
    %251 = vector.broadcast %cst_257 : bf16 to vector<1x64xbf16>
    %c3_258 = arith.constant 3 : index
    %c0_259 = arith.constant 0 : index
    %252 = vector.load %arg10[%c3_258, %c0_259] : memref<18x64xbf16, #tpu.memory_space<vmem>>, vector<1x64xbf16>
    tpu.vector_store %arg10[%c3_258, %c0_259], %251 {strides = array<i32>} : memref<18x64xbf16, #tpu.memory_space<vmem>>, vector<1x64xbf16>,
    %c1_260 = arith.constant 1 : index
    %c0_261 = arith.constant 0 : index
    %253 = vector.load %arg10[%c1_260, %c0_261] : memref<18x64xbf16, #tpu.memory_space<vmem>>, vector<2x64xbf16>
    tpu.vector_store %arg10[%c1_260, %c0_261], %247 {strides = array<i32>} : memref<18x64xbf16, #tpu.memory_space<vmem>>, vector<2x64xbf16>,
    %c0_262 = arith.constant 0 : index
    %c0_263 = arith.constant 0 : index
    %254 = vector.load %arg10[%c0_262, %c0_263] : memref<18x64xbf16, #tpu.memory_space<vmem>>, vector<2x64xbf16>
    %c27 = arith.constant 27 : index
    %c0_264 = arith.constant 0 : index
    %c0_265 = arith.constant 0 : index
    %255 = vector.load %arg2[%c27, %c0_264, %c0_265] : memref<42x64x64xbf16, #tpu.memory_space<vmem>>, vector<1x64x64xbf16>
    %256 = vector.shape_cast %255 : vector<1x64x64xbf16> to vector<64x64xbf16>
    %cst_266 = arith.constant dense<0.000000e+00> : vector<2x64xf32>
    %257 = tpu.matmul %254, %256, %cst_266 {dimension_numbers = #tpu.dot_dimension_numbers<[1], [0], [0], [1], [0, 0, 1, 1], [], []>} : vector<2x64xbf16>, vector<64x64xbf16>, vector<2x64xf32> -> vector<2x64xf32>
    %c1_267 = arith.constant 1 : index
    %c0_268 = arith.constant 0 : index
    %258 = vector.load %arg10[%c1_267, %c0_268] : memref<18x64xbf16, #tpu.memory_space<vmem>>, vector<2x64xbf16>
    %c28 = arith.constant 28 : index
    %c0_269 = arith.constant 0 : index
    %c0_270 = arith.constant 0 : index
    %259 = vector.load %arg2[%c28, %c0_269, %c0_270] : memref<42x64x64xbf16, #tpu.memory_space<vmem>>, vector<1x64x64xbf16>
    %260 = vector.shape_cast %259 : vector<1x64x64xbf16> to vector<64x64xbf16>
    %cst_271 = arith.constant dense<0.000000e+00> : vector<2x64xf32>
    %261 = tpu.matmul %258, %260, %cst_271 {dimension_numbers = #tpu.dot_dimension_numbers<[1], [0], [0], [1], [0, 0, 1, 1], [], []>} : vector<2x64xbf16>, vector<64x64xbf16>, vector<2x64xf32> -> vector<2x64xf32>
    %262 = arith.addf %257, %261 : vector<2x64xf32>
    %c2_272 = arith.constant 2 : index
    %c0_273 = arith.constant 0 : index
    %263 = vector.load %arg10[%c2_272, %c0_273] : memref<18x64xbf16, #tpu.memory_space<vmem>>, vector<2x64xbf16>
    %c29 = arith.constant 29 : index
    %c0_274 = arith.constant 0 : index
    %c0_275 = arith.constant 0 : index
    %264 = vector.load %arg2[%c29, %c0_274, %c0_275] : memref<42x64x64xbf16, #tpu.memory_space<vmem>>, vector<1x64x64xbf16>
    %265 = vector.shape_cast %264 : vector<1x64x64xbf16> to vector<64x64xbf16>
    %cst_276 = arith.constant dense<0.000000e+00> : vector<2x64xf32>
    %266 = tpu.matmul %263, %265, %cst_276 {dimension_numbers = #tpu.dot_dimension_numbers<[1], [0], [0], [1], [0, 0, 1, 1], [], []>} : vector<2x64xbf16>, vector<64x64xbf16>, vector<2x64xf32> -> vector<2x64xf32>
    %267 = arith.addf %262, %266 : vector<2x64xf32>
    %c9_277 = arith.constant 9 : index
    %c0_278 = arith.constant 0 : index
    %268 = vector.load %arg3[%c9_277, %c0_278] : memref<14x64xf32, #tpu.memory_space<vmem>>, vector<1x64xf32>
    %269 = vector.broadcast %268 : vector<1x64xf32> to vector<2x64xf32>
    %270 = arith.addf %267, %269 : vector<2x64xf32>
    %cst_279 = arith.constant 0.000000e+00 : f32
    %271 = vector.broadcast %cst_279 : f32 to vector<2x64xf32>
    %272 = arith.maximumf %270, %271 : vector<2x64xf32>
    %cst_280 = arith.constant 0.000000e+00 : bf16
    %273 = vector.broadcast %cst_280 : bf16 to vector<1x64xbf16>
    %c0_281 = arith.constant 0 : index
    %c0_282 = arith.constant 0 : index
    %274 = vector.load %arg10[%c0_281, %c0_282] : memref<18x64xbf16, #tpu.memory_space<vmem>>, vector<1x64xbf16>
    tpu.vector_store %arg10[%c0_281, %c0_282], %273 {strides = array<i32>} : memref<18x64xbf16, #tpu.memory_space<vmem>>, vector<1x64xbf16>,
    %cst_283 = arith.constant 0.000000e+00 : bf16
    %275 = vector.broadcast %cst_283 : bf16 to vector<1x64xbf16>
    %c3_284 = arith.constant 3 : index
    %c0_285 = arith.constant 0 : index
    %276 = vector.load %arg10[%c3_284, %c0_285] : memref<18x64xbf16, #tpu.memory_space<vmem>>, vector<1x64xbf16>
    tpu.vector_store %arg10[%c3_284, %c0_285], %275 {strides = array<i32>} : memref<18x64xbf16, #tpu.memory_space<vmem>>, vector<1x64xbf16>,
    %277 = arith.truncf %272 : vector<2x64xf32> to vector<2x64xbf16>
    %c1_286 = arith.constant 1 : index
    %c0_287 = arith.constant 0 : index
    %278 = vector.load %arg10[%c1_286, %c0_287] : memref<18x64xbf16, #tpu.memory_space<vmem>>, vector<2x64xbf16>
    tpu.vector_store %arg10[%c1_286, %c0_287], %277 {strides = array<i32>} : memref<18x64xbf16, #tpu.memory_space<vmem>>, vector<2x64xbf16>,
    %c0_288 = arith.constant 0 : index
    %c0_289 = arith.constant 0 : index
    %279 = vector.load %arg10[%c0_288, %c0_289] : memref<18x64xbf16, #tpu.memory_space<vmem>>, vector<2x64xbf16>
    %c30 = arith.constant 30 : index
    %c0_290 = arith.constant 0 : index
    %c0_291 = arith.constant 0 : index
    %280 = vector.load %arg2[%c30, %c0_290, %c0_291] : memref<42x64x64xbf16, #tpu.memory_space<vmem>>, vector<1x64x64xbf16>
    %281 = vector.shape_cast %280 : vector<1x64x64xbf16> to vector<64x64xbf16>
    %cst_292 = arith.constant dense<0.000000e+00> : vector<2x64xf32>
    %282 = tpu.matmul %279, %281, %cst_292 {dimension_numbers = #tpu.dot_dimension_numbers<[1], [0], [0], [1], [0, 0, 1, 1], [], []>} : vector<2x64xbf16>, vector<64x64xbf16>, vector<2x64xf32> -> vector<2x64xf32>
    %c1_293 = arith.constant 1 : index
    %c0_294 = arith.constant 0 : index
    %283 = vector.load %arg10[%c1_293, %c0_294] : memref<18x64xbf16, #tpu.memory_space<vmem>>, vector<2x64xbf16>
    %c31 = arith.constant 31 : index
    %c0_295 = arith.constant 0 : index
    %c0_296 = arith.constant 0 : index
    %284 = vector.load %arg2[%c31, %c0_295, %c0_296] : memref<42x64x64xbf16, #tpu.memory_space<vmem>>, vector<1x64x64xbf16>
    %285 = vector.shape_cast %284 : vector<1x64x64xbf16> to vector<64x64xbf16>
    %cst_297 = arith.constant dense<0.000000e+00> : vector<2x64xf32>
    %286 = tpu.matmul %283, %285, %cst_297 {dimension_numbers = #tpu.dot_dimension_numbers<[1], [0], [0], [1], [0, 0, 1, 1], [], []>} : vector<2x64xbf16>, vector<64x64xbf16>, vector<2x64xf32> -> vector<2x64xf32>
    %287 = arith.addf %282, %286 : vector<2x64xf32>
    %c2_298 = arith.constant 2 : index
    %c0_299 = arith.constant 0 : index
    %288 = vector.load %arg10[%c2_298, %c0_299] : memref<18x64xbf16, #tpu.memory_space<vmem>>, vector<2x64xbf16>
    %c32 = arith.constant 32 : index
    %c0_300 = arith.constant 0 : index
    %c0_301 = arith.constant 0 : index
    %289 = vector.load %arg2[%c32, %c0_300, %c0_301] : memref<42x64x64xbf16, #tpu.memory_space<vmem>>, vector<1x64x64xbf16>
    %290 = vector.shape_cast %289 : vector<1x64x64xbf16> to vector<64x64xbf16>
    %cst_302 = arith.constant dense<0.000000e+00> : vector<2x64xf32>
    %291 = tpu.matmul %288, %290, %cst_302 {dimension_numbers = #tpu.dot_dimension_numbers<[1], [0], [0], [1], [0, 0, 1, 1], [], []>} : vector<2x64xbf16>, vector<64x64xbf16>, vector<2x64xf32> -> vector<2x64xf32>
    %292 = arith.addf %287, %291 : vector<2x64xf32>
    %c10_303 = arith.constant 10 : index
    %c0_304 = arith.constant 0 : index
    %293 = vector.load %arg3[%c10_303, %c0_304] : memref<14x64xf32, #tpu.memory_space<vmem>>, vector<1x64xf32>
    %294 = vector.broadcast %293 : vector<1x64xf32> to vector<2x64xf32>
    %295 = arith.addf %292, %294 : vector<2x64xf32>
    %296 = arith.addf %295, %248 : vector<2x64xf32>
    %cst_305 = arith.constant 0.000000e+00 : f32
    %297 = vector.broadcast %cst_305 : f32 to vector<2x64xf32>
    %298 = arith.maximumf %296, %297 : vector<2x64xf32>
    %299 = arith.truncf %298 : vector<2x64xf32> to vector<2x64xbf16>
    %c0_306 = arith.constant 0 : index
    %c0_307 = arith.constant 0 : index
    %c0_308 = arith.constant 0 : index
    %300 = vector.load %arg8[%c0_306, %c0_307, %c0_308] : memref<1x2x64xbf16, #tpu.memory_space<vmem>>, vector<1x2x64xbf16>
    %301 = vector.shape_cast %300 : vector<1x2x64xbf16> to vector<2x64xbf16>
    %302 = vector.shape_cast %299 : vector<2x64xbf16> to vector<1x2x64xbf16>
    tpu.vector_store %arg8[%c0_306, %c0_307, %c0_308], %302 {strides = array<i32>} : memref<1x2x64xbf16, #tpu.memory_space<vmem>>, vector<1x2x64xbf16>,
    %cst_309 = arith.constant 0.000000e+00 : bf16
    %303 = vector.broadcast %cst_309 : bf16 to vector<1x64xbf16>
    %c0_310 = arith.constant 0 : index
    %c0_311 = arith.constant 0 : index
    %304 = vector.load %arg10[%c0_310, %c0_311] : memref<18x64xbf16, #tpu.memory_space<vmem>>, vector<1x64xbf16>
    tpu.vector_store %arg10[%c0_310, %c0_311], %303 {strides = array<i32>} : memref<18x64xbf16, #tpu.memory_space<vmem>>, vector<1x64xbf16>,
    %cst_312 = arith.constant 0.000000e+00 : bf16
    %305 = vector.broadcast %cst_312 : bf16 to vector<1x64xbf16>
    %c3_313 = arith.constant 3 : index
    %c0_314 = arith.constant 0 : index
    %306 = vector.load %arg10[%c3_313, %c0_314] : memref<18x64xbf16, #tpu.memory_space<vmem>>, vector<1x64xbf16>
    tpu.vector_store %arg10[%c3_313, %c0_314], %305 {strides = array<i32>} : memref<18x64xbf16, #tpu.memory_space<vmem>>, vector<1x64xbf16>,
    %c1_315 = arith.constant 1 : index
    %c0_316 = arith.constant 0 : index
    %307 = vector.load %arg10[%c1_315, %c0_316] : memref<18x64xbf16, #tpu.memory_space<vmem>>, vector<2x64xbf16>
    tpu.vector_store %arg10[%c1_315, %c0_316], %299 {strides = array<i32>} : memref<18x64xbf16, #tpu.memory_space<vmem>>, vector<2x64xbf16>,
    %c0_317 = arith.constant 0 : index
    %c0_318 = arith.constant 0 : index
    %308 = vector.load %arg10[%c0_317, %c0_318] : memref<18x64xbf16, #tpu.memory_space<vmem>>, vector<2x64xbf16>
    %c33 = arith.constant 33 : index
    %c0_319 = arith.constant 0 : index
    %c0_320 = arith.constant 0 : index
    %309 = vector.load %arg2[%c33, %c0_319, %c0_320] : memref<42x64x64xbf16, #tpu.memory_space<vmem>>, vector<1x64x64xbf16>
    %310 = vector.shape_cast %309 : vector<1x64x64xbf16> to vector<64x64xbf16>
    %cst_321 = arith.constant dense<0.000000e+00> : vector<2x64xf32>
    %311 = tpu.matmul %308, %310, %cst_321 {dimension_numbers = #tpu.dot_dimension_numbers<[1], [0], [0], [1], [0, 0, 1, 1], [], []>} : vector<2x64xbf16>, vector<64x64xbf16>, vector<2x64xf32> -> vector<2x64xf32>
    %c1_322 = arith.constant 1 : index
    %c0_323 = arith.constant 0 : index
    %312 = vector.load %arg10[%c1_322, %c0_323] : memref<18x64xbf16, #tpu.memory_space<vmem>>, vector<2x64xbf16>
    %c34 = arith.constant 34 : index
    %c0_324 = arith.constant 0 : index
    %c0_325 = arith.constant 0 : index
    %313 = vector.load %arg2[%c34, %c0_324, %c0_325] : memref<42x64x64xbf16, #tpu.memory_space<vmem>>, vector<1x64x64xbf16>
    %314 = vector.shape_cast %313 : vector<1x64x64xbf16> to vector<64x64xbf16>
    %cst_326 = arith.constant dense<0.000000e+00> : vector<2x64xf32>
    %315 = tpu.matmul %312, %314, %cst_326 {dimension_numbers = #tpu.dot_dimension_numbers<[1], [0], [0], [1], [0, 0, 1, 1], [], []>} : vector<2x64xbf16>, vector<64x64xbf16>, vector<2x64xf32> -> vector<2x64xf32>
    %316 = arith.addf %311, %315 : vector<2x64xf32>
    %c2_327 = arith.constant 2 : index
    %c0_328 = arith.constant 0 : index
    %317 = vector.load %arg10[%c2_327, %c0_328] : memref<18x64xbf16, #tpu.memory_space<vmem>>, vector<2x64xbf16>
    %c35 = arith.constant 35 : index
    %c0_329 = arith.constant 0 : index
    %c0_330 = arith.constant 0 : index
    %318 = vector.load %arg2[%c35, %c0_329, %c0_330] : memref<42x64x64xbf16, #tpu.memory_space<vmem>>, vector<1x64x64xbf16>
    %319 = vector.shape_cast %318 : vector<1x64x64xbf16> to vector<64x64xbf16>
    %cst_331 = arith.constant dense<0.000000e+00> : vector<2x64xf32>
    %320 = tpu.matmul %317, %319, %cst_331 {dimension_numbers = #tpu.dot_dimension_numbers<[1], [0], [0], [1], [0, 0, 1, 1], [], []>} : vector<2x64xbf16>, vector<64x64xbf16>, vector<2x64xf32> -> vector<2x64xf32>
    %321 = arith.addf %316, %320 : vector<2x64xf32>
    %c11_332 = arith.constant 11 : index
    %c0_333 = arith.constant 0 : index
    %322 = vector.load %arg3[%c11_332, %c0_333] : memref<14x64xf32, #tpu.memory_space<vmem>>, vector<1x64xf32>
    %323 = vector.broadcast %322 : vector<1x64xf32> to vector<2x64xf32>
    %324 = arith.addf %321, %323 : vector<2x64xf32>
    %c3_334 = arith.constant 3 : index
    %c0_335 = arith.constant 0 : index
    %c0_336 = arith.constant 0 : index
    %325 = vector.load %arg4[%c3_334, %c0_335, %c0_336] : memref<4x8x16xbf16, #tpu.memory_space<vmem>>, vector<1x1x2xbf16>
    %326 = vector.shape_cast %325 : vector<1x1x2xbf16> to vector<1x2xbf16>
    %327 = arith.truncf %324 : vector<2x64xf32> to vector<2x64xbf16>
    %cst_337 = arith.constant dense<0.000000e+00> : vector<1x64xf32>
    %328 = tpu.matmul %326, %327, %cst_337 {dimension_numbers = #tpu.dot_dimension_numbers<[1], [0], [0], [1], [0, 0, 1, 1], [], []>} : vector<1x2xbf16>, vector<2x64xbf16>, vector<1x64xf32> -> vector<1x64xf32>
    %329 = arith.truncf %328 : vector<1x64xf32> to vector<1x64xbf16>
    %330 = arith.extf %329 : vector<1x64xbf16> to vector<1x64xf32>
    %cst_338 = arith.constant 0.000000e+00 : bf16
    %331 = vector.broadcast %cst_338 : bf16 to vector<1x64xbf16>
    %c0_339 = arith.constant 0 : index
    %c0_340 = arith.constant 0 : index
    %332 = vector.load %arg10[%c0_339, %c0_340] : memref<18x64xbf16, #tpu.memory_space<vmem>>, vector<1x64xbf16>
    tpu.vector_store %arg10[%c0_339, %c0_340], %331 {strides = array<i32>} : memref<18x64xbf16, #tpu.memory_space<vmem>>, vector<1x64xbf16>,
    %cst_341 = arith.constant 0.000000e+00 : bf16
    %333 = vector.broadcast %cst_341 : bf16 to vector<1x64xbf16>
    %c2_342 = arith.constant 2 : index
    %c0_343 = arith.constant 0 : index
    %334 = vector.load %arg10[%c2_342, %c0_343] : memref<18x64xbf16, #tpu.memory_space<vmem>>, vector<1x64xbf16>
    tpu.vector_store %arg10[%c2_342, %c0_343], %333 {strides = array<i32>} : memref<18x64xbf16, #tpu.memory_space<vmem>>, vector<1x64xbf16>,
    %c1_344 = arith.constant 1 : index
    %c0_345 = arith.constant 0 : index
    %335 = vector.load %arg10[%c1_344, %c0_345] : memref<18x64xbf16, #tpu.memory_space<vmem>>, vector<1x64xbf16>
    tpu.vector_store %arg10[%c1_344, %c0_345], %329 {strides = array<i32>} : memref<18x64xbf16, #tpu.memory_space<vmem>>, vector<1x64xbf16>,
    %c0_346 = arith.constant 0 : index
    %c0_347 = arith.constant 0 : index
    %336 = vector.load %arg10[%c0_346, %c0_347] : memref<18x64xbf16, #tpu.memory_space<vmem>>, vector<1x64xbf16>
    %c36 = arith.constant 36 : index
    %c0_348 = arith.constant 0 : index
    %c0_349 = arith.constant 0 : index
    %337 = vector.load %arg2[%c36, %c0_348, %c0_349] : memref<42x64x64xbf16, #tpu.memory_space<vmem>>, vector<1x64x64xbf16>
    %338 = vector.shape_cast %337 : vector<1x64x64xbf16> to vector<64x64xbf16>
    %cst_350 = arith.constant dense<0.000000e+00> : vector<1x64xf32>
    %339 = tpu.matmul %336, %338, %cst_350 {dimension_numbers = #tpu.dot_dimension_numbers<[1], [0], [0], [1], [0, 0, 1, 1], [], []>} : vector<1x64xbf16>, vector<64x64xbf16>, vector<1x64xf32> -> vector<1x64xf32>
    %c1_351 = arith.constant 1 : index
    %c0_352 = arith.constant 0 : index
    %340 = vector.load %arg10[%c1_351, %c0_352] : memref<18x64xbf16, #tpu.memory_space<vmem>>, vector<1x64xbf16>
    %c37 = arith.constant 37 : index
    %c0_353 = arith.constant 0 : index
    %c0_354 = arith.constant 0 : index
    %341 = vector.load %arg2[%c37, %c0_353, %c0_354] : memref<42x64x64xbf16, #tpu.memory_space<vmem>>, vector<1x64x64xbf16>
    %342 = vector.shape_cast %341 : vector<1x64x64xbf16> to vector<64x64xbf16>
    %cst_355 = arith.constant dense<0.000000e+00> : vector<1x64xf32>
    %343 = tpu.matmul %340, %342, %cst_355 {dimension_numbers = #tpu.dot_dimension_numbers<[1], [0], [0], [1], [0, 0, 1, 1], [], []>} : vector<1x64xbf16>, vector<64x64xbf16>, vector<1x64xf32> -> vector<1x64xf32>
    %344 = arith.addf %339, %343 : vector<1x64xf32>
    %c2_356 = arith.constant 2 : index
    %c0_357 = arith.constant 0 : index
    %345 = vector.load %arg10[%c2_356, %c0_357] : memref<18x64xbf16, #tpu.memory_space<vmem>>, vector<1x64xbf16>
    %c38 = arith.constant 38 : index
    %c0_358 = arith.constant 0 : index
    %c0_359 = arith.constant 0 : index
    %346 = vector.load %arg2[%c38, %c0_358, %c0_359] : memref<42x64x64xbf16, #tpu.memory_space<vmem>>, vector<1x64x64xbf16>
    %347 = vector.shape_cast %346 : vector<1x64x64xbf16> to vector<64x64xbf16>
    %cst_360 = arith.constant dense<0.000000e+00> : vector<1x64xf32>
    %348 = tpu.matmul %345, %347, %cst_360 {dimension_numbers = #tpu.dot_dimension_numbers<[1], [0], [0], [1], [0, 0, 1, 1], [], []>} : vector<1x64xbf16>, vector<64x64xbf16>, vector<1x64xf32> -> vector<1x64xf32>
    %349 = arith.addf %344, %348 : vector<1x64xf32>
    %c12_361 = arith.constant 12 : index
    %c0_362 = arith.constant 0 : index
    %350 = vector.load %arg3[%c12_361, %c0_362] : memref<14x64xf32, #tpu.memory_space<vmem>>, vector<1x64xf32>
    %351 = arith.addf %349, %350 : vector<1x64xf32>
    %cst_363 = arith.constant 0.000000e+00 : f32
    %352 = vector.broadcast %cst_363 : f32 to vector<1x64xf32>
    %353 = arith.maximumf %351, %352 : vector<1x64xf32>
    %cst_364 = arith.constant 0.000000e+00 : bf16
    %354 = vector.broadcast %cst_364 : bf16 to vector<1x64xbf16>
    %c0_365 = arith.constant 0 : index
    %c0_366 = arith.constant 0 : index
    %355 = vector.load %arg10[%c0_365, %c0_366] : memref<18x64xbf16, #tpu.memory_space<vmem>>, vector<1x64xbf16>
    tpu.vector_store %arg10[%c0_365, %c0_366], %354 {strides = array<i32>} : memref<18x64xbf16, #tpu.memory_space<vmem>>, vector<1x64xbf16>,
    %cst_367 = arith.constant 0.000000e+00 : bf16
    %356 = vector.broadcast %cst_367 : bf16 to vector<1x64xbf16>
    %c2_368 = arith.constant 2 : index
    %c0_369 = arith.constant 0 : index
    %357 = vector.load %arg10[%c2_368, %c0_369] : memref<18x64xbf16, #tpu.memory_space<vmem>>, vector<1x64xbf16>
    tpu.vector_store %arg10[%c2_368, %c0_369], %356 {strides = array<i32>} : memref<18x64xbf16, #tpu.memory_space<vmem>>, vector<1x64xbf16>,
    %358 = arith.truncf %353 : vector<1x64xf32> to vector<1x64xbf16>
    %c1_370 = arith.constant 1 : index
    %c0_371 = arith.constant 0 : index
    %359 = vector.load %arg10[%c1_370, %c0_371] : memref<18x64xbf16, #tpu.memory_space<vmem>>, vector<1x64xbf16>
    tpu.vector_store %arg10[%c1_370, %c0_371], %358 {strides = array<i32>} : memref<18x64xbf16, #tpu.memory_space<vmem>>, vector<1x64xbf16>,
    %c0_372 = arith.constant 0 : index
    %c0_373 = arith.constant 0 : index
    %360 = vector.load %arg10[%c0_372, %c0_373] : memref<18x64xbf16, #tpu.memory_space<vmem>>, vector<1x64xbf16>
    %c39 = arith.constant 39 : index
    %c0_374 = arith.constant 0 : index
    %c0_375 = arith.constant 0 : index
    %361 = vector.load %arg2[%c39, %c0_374, %c0_375] : memref<42x64x64xbf16, #tpu.memory_space<vmem>>, vector<1x64x64xbf16>
    %362 = vector.shape_cast %361 : vector<1x64x64xbf16> to vector<64x64xbf16>
    %cst_376 = arith.constant dense<0.000000e+00> : vector<1x64xf32>
    %363 = tpu.matmul %360, %362, %cst_376 {dimension_numbers = #tpu.dot_dimension_numbers<[1], [0], [0], [1], [0, 0, 1, 1], [], []>} : vector<1x64xbf16>, vector<64x64xbf16>, vector<1x64xf32> -> vector<1x64xf32>
    %c1_377 = arith.constant 1 : index
    %c0_378 = arith.constant 0 : index
    %364 = vector.load %arg10[%c1_377, %c0_378] : memref<18x64xbf16, #tpu.memory_space<vmem>>, vector<1x64xbf16>
    %c40 = arith.constant 40 : index
    %c0_379 = arith.constant 0 : index
    %c0_380 = arith.constant 0 : index
    %365 = vector.load %arg2[%c40, %c0_379, %c0_380] : memref<42x64x64xbf16, #tpu.memory_space<vmem>>, vector<1x64x64xbf16>
    %366 = vector.shape_cast %365 : vector<1x64x64xbf16> to vector<64x64xbf16>
    %cst_381 = arith.constant dense<0.000000e+00> : vector<1x64xf32>
    %367 = tpu.matmul %364, %366, %cst_381 {dimension_numbers = #tpu.dot_dimension_numbers<[1], [0], [0], [1], [0, 0, 1, 1], [], []>} : vector<1x64xbf16>, vector<64x64xbf16>, vector<1x64xf32> -> vector<1x64xf32>
    %368 = arith.addf %363, %367 : vector<1x64xf32>
    %c2_382 = arith.constant 2 : index
    %c0_383 = arith.constant 0 : index
    %369 = vector.load %arg10[%c2_382, %c0_383] : memref<18x64xbf16, #tpu.memory_space<vmem>>, vector<1x64xbf16>
    %c41 = arith.constant 41 : index
    %c0_384 = arith.constant 0 : index
    %c0_385 = arith.constant 0 : index
    %370 = vector.load %arg2[%c41, %c0_384, %c0_385] : memref<42x64x64xbf16, #tpu.memory_space<vmem>>, vector<1x64x64xbf16>
    %371 = vector.shape_cast %370 : vector<1x64x64xbf16> to vector<64x64xbf16>
    %cst_386 = arith.constant dense<0.000000e+00> : vector<1x64xf32>
    %372 = tpu.matmul %369, %371, %cst_386 {dimension_numbers = #tpu.dot_dimension_numbers<[1], [0], [0], [1], [0, 0, 1, 1], [], []>} : vector<1x64xbf16>, vector<64x64xbf16>, vector<1x64xf32> -> vector<1x64xf32>
    %373 = arith.addf %368, %372 : vector<1x64xf32>
    %c13_387 = arith.constant 13 : index
    %c0_388 = arith.constant 0 : index
    %374 = vector.load %arg3[%c13_387, %c0_388] : memref<14x64xf32, #tpu.memory_space<vmem>>, vector<1x64xf32>
    %375 = arith.addf %373, %374 : vector<1x64xf32>
    %376 = arith.addf %375, %330 : vector<1x64xf32>
    %cst_389 = arith.constant 0.000000e+00 : f32
    %377 = vector.broadcast %cst_389 : f32 to vector<1x64xf32>
    %378 = arith.maximumf %376, %377 : vector<1x64xf32>
    %379 = arith.truncf %378 : vector<1x64xf32> to vector<1x64xbf16>
    %c0_390 = arith.constant 0 : index
    %c0_391 = arith.constant 0 : index
    %c0_392 = arith.constant 0 : index
    %380 = vector.load %arg9[%c0_390, %c0_391, %c0_392] : memref<1x1x64xbf16, #tpu.memory_space<vmem>>, vector<1x1x64xbf16>
    %381 = vector.shape_cast %380 : vector<1x1x64xbf16> to vector<1x64xbf16>
    %382 = vector.shape_cast %379 : vector<1x64xbf16> to vector<1x1x64xbf16>
    tpu.vector_store %arg9[%c0_390, %c0_391, %c0_392], %382 {strides = array<i32>} : memref<1x1x64xbf16, #tpu.memory_space<vmem>>, vector<1x1x64xbf16>,
    return
  }
  func.func @transform_0(%arg0: i32) -> (i32, i32, i32) {
    %c0_i32 = arith.constant 0 : i32
    %c0_i32_0 = arith.constant 0 : i32
    %c0_i32_1 = arith.constant 0 : i32
    return %arg0, %c0_i32, %c0_i32_0 : i32, i32, i32
  }
  func.func @transform_1(%arg0: i32) -> (i32, i32, i32) {
    %c0_i32 = arith.constant 0 : i32
    %c0_i32_0 = arith.constant 0 : i32
    %c0_i32_1 = arith.constant 0 : i32
    %c0_i32_2 = arith.constant 0 : i32
    return %c0_i32, %c0_i32_0, %c0_i32_1 : i32, i32, i32
  }
  func.func @transform_2(%arg0: i32) -> (i32, i32) {
    %c0_i32 = arith.constant 0 : i32
    %c0_i32_0 = arith.constant 0 : i32
    %c0_i32_1 = arith.constant 0 : i32
    return %c0_i32, %c0_i32_0 : i32, i32
  }
  func.func @transform_3(%arg0: i32) -> (i32, i32, i32) {
    %c0_i32 = arith.constant 0 : i32
    %c0_i32_0 = arith.constant 0 : i32
    %c0_i32_1 = arith.constant 0 : i32
    %c0_i32_2 = arith.constant 0 : i32
    return %c0_i32, %c0_i32_0, %c0_i32_1 : i32, i32, i32
  }
  func.func @transform_4(%arg0: i32) -> (i32, i32, i32) {
    %c0_i32 = arith.constant 0 : i32
    %c0_i32_0 = arith.constant 0 : i32
    %c0_i32_1 = arith.constant 0 : i32
    return %arg0, %c0_i32, %c0_i32_0 : i32, i32, i32
  }
  func.func @transform_5(%arg0: i32) -> (i32, i32, i32) {
    %c0_i32 = arith.constant 0 : i32
    %c0_i32_0 = arith.constant 0 : i32
    %c0_i32_1 = arith.constant 0 : i32
    return %arg0, %c0_i32, %c0_i32_0 : i32, i32, i32
  }
  func.func @transform_6(%arg0: i32) -> (i32, i32, i32) {
    %c0_i32 = arith.constant 0 : i32
    %c0_i32_0 = arith.constant 0 : i32
    %c0_i32_1 = arith.constant 0 : i32
    return %arg0, %c0_i32, %c0_i32_0 : i32, i32, i32
  }
  func.func @transform_7(%arg0: i32) -> (i32, i32, i32) {
    %c0_i32 = arith.constant 0 : i32
    %c0_i32_0 = arith.constant 0 : i32
    %c0_i32_1 = arith.constant 0 : i32
    return %arg0, %c0_i32, %c0_i32_0 : i32, i32, i32
  }
  func.func @transform_8(%arg0: i32) -> (i32, i32, i32) {
    %c0_i32 = arith.constant 0 : i32
    %c0_i32_0 = arith.constant 0 : i32
    %c0_i32_1 = arith.constant 0 : i32
    return %arg0, %c0_i32, %c0_i32_0 : i32, i32, i32
  }
}

</mosaic_0001>

<bundles_post_ra>
// kernel: encoder_resblock_forward.1
= control target key start
LH: loop header
LB: loop body
LE: loop exit
PB: predicated region body
PF: predicated region fallthrough
CT: control target
= control target key end

     0   :  { %14 = vsyncpa [#allocation4], 0  ;;  %s6074_s27 = smov 0   ;;  %s6706_s0 = inlined_call_operand.vmem [shape: bf16[2,16,64], index: 0, kind: input, shape index: {}]   ;;  %s6707_s1 = inlined_call_operand.hbm [shape: bf16[42,64,64], index: 1, kind: input, shape index: {}]   ;;  %s6708_s2 = inlined_call_operand.vmem [shape: f32[14,64], index: 2, kind: input, shape index: {}]   ;;  %s6709_s3 = inlined_call_operand.vmem [shape: bf16[4,8,16], index: 3, kind: input, shape index: {}]   ;;  %s6710_s4 = inlined_call_operand.vmem [shape: bf16[2,16,64], index: 4, kind: output, shape index: {0}]   ;;  %s6711_s5 = inlined_call_operand.vmem [shape: bf16[2,8,64], index: 5, kind: output, shape index: {1}]   ;;  %s6712_s6 = inlined_call_operand.vmem [shape: bf16[2,4,64], index: 6, kind: output, shape index: {2}]   ;;  %s6713_s7 = inlined_call_operand.vmem [shape: bf16[2,2,64], index: 7, kind: output, shape index: {3}]   ;;  %s6714_s8 = inlined_call_operand.vmem [shape: bf16[2,1,64], index: 8, kind: output, shape index: {4}]  }
   0x1 LB: > { %s6080_s28 = sadd.s32 4294967295, %s6022_s27   ;;  %p4717_p0 = scmp.ge.s32.totalorder %s6022_s27, 1  ;;  %s6022_s27 = sphi %s6074_s27, %s20_s27  }
   0x2   : > { %p244_p1 = scmp.lt.s32.totalorder %s6022_s27, 3  ;;  %s6024_s29 = smov [#allocation3]  }
   0x3   : > { %s256_s30 = sshll.u32 %s6024_s29, 4  ;;  %p6715_p3 = scmp.eq.s32.totalorder %s6080_s28, 0  ;;  %s257_s30 = int_to_ptr.vmem [resolvable:$true] %s256_s30 }
   0x4   : > { %p6084_p2 = pnand %p4717_p0, %p244_p1  ;;  %s5984_s13 = scalar_lea.hbm %s6707_s1, 21504 }
   0x5   : > { %p5985_p6 = scmp.ne.s32.totalorder %s6707_s1, %s5984_s13  ;;  %p5991_p10 = scmp.lt.u32.totalorder %s5984_s13, %s6707_s1 }
   0x6   : > { %s6717_s9 = scalar_select %p6084_p2, 1, 0 }
   0x7   : > { %p5772_p4 = pneg %p6084_p2 }
   0x9   : > { %p6093_p5 = pnand %p6715_p3, %p5772_p4 }
   0xb   : > { %p5986_p7 = pneg %p6093_p5 }
   0xd   : > { %p5987_p8 = pnand %p5986_p7, %p5985_p6 }
   0xf   : > { %p5988_p9 = pneg %p5987_p8 }
  0x11   : > { %p5993_p11 = pnand %p5991_p10, %p5988_p9 }
  0x13   : > { %5996 = shalt.err (!%p5993_p11)
}
  0x14   : > { %s5997_s18 = scalar_lea.vmem %s257_s30, 21504  ;;  %p6005_p1 = scmp.lt.s32.totalorder %s257_s30, %s257_s30 }
  0x15   : > { %p5998_p12 = scmp.ne.s32.totalorder %s257_s30, %s5997_s18  ;;  %p6006_p4 = scmp.lt.s32.totalorder %s5997_s18, %s5997_s18 }
  0x17   : > { %p6000_p13 = pnand %p5998_p12, %p5986_p7  ;;  %p6007_p3 = por %p6006_p4, %p6005_p1 }
  0x19   : > { %p6001_p0 = pneg %p6000_p13 }
  0x1b   : > { %p6008_p2 = pnand %p6007_p3, %p6001_p0 }
  0x1d   : > { %6011 = shalt.err (!%p6008_p2)
}
  0x1e   : > { %s6025_s19 = smov 64   ;;  %s6026_s20 = smov 4  }
  0x1f   : > { %5775 = dma.hbm_to_vmem [thread:$0]  (!%p6093_p5), %s6707_s1, 21504, %s257_s30, [#allocation4], %s6025_s19, %s6025_s19, %s6026_s20  }
  0x20   : > { %p6719_p6 = scmp.ne.s32.totalorder %s6717_s9, 0 }
  0x21   : > { %p6720_p8 = scmp.eq.s32.totalorder (!%p6719_p6), %s6080_s28, 0 }
  0x22   : > { %286 = sbr.rel (%p6719_p6) target bundleno = 4544 (0x11c0), region = 36 }
  0x29   : > { %6017 = dma.done.wait (%p6720_p8), [#allocation4], 21504   ;;  %p6721_p7 = pmov %p6720_p8 }
  0x2a   : > { %v6027_v0 = vmov 0.0   ;;  %p334_p2 = scmp.lt.s32.totalorder %s6080_s28, 1  ;;  %vm6028_vm0 = vmmov 0   ;;  %vm364_vm1 = vsmask.f32 256  ;;  %v5791_v1 = vld [vmem:[#allocation3 + $0x20] sm:$0xff]  }
  0x2b   : > { %6019 = vsyncadd (%p6721_p7), [#allocation4], 4294945792  ;;  %5240 = vmatprep.subr.bf16.mxu0 %v6027_v0  ;;  %5252 = vmatprep.subr.bf16.mxu1 %v6027_v0  ;;  %vm369_vm2 = vsmask.f32 7938  ;;  %v5792_v2 = vld [vmem:[#allocation3] sm:$0xff]   ;;  %vm363_vm3 = vcmask 516096  }
  0x2c   : > { %5248 = vmatprep.mubr.msk.bf16.mxu0 %vm6028_vm0, %v6027_v0  ;;  %5260 = vmatprep.mubr.msk.bf16.mxu1 %vm6028_vm0, %v6027_v0  ;;  %s6741_s28 = smov (!%p334_p2, %s6080_s28), 1  ;;  %v5793_v3 = vld [vmem:[#allocation3 + $0x28] sm:$0xff]   ;;  %vm6134_vm4 = vmand %vm363_vm3, %vm364_vm1  ;;  %vm374_vm6 = vsmask.f32 4368  ;;  %v5795_v7 = vld [vmem:[#allocation3 + $0x30] sm:$0xff]   ;;  %vm396_vm7 = vcmask 519168  }
  0x2d   : > { %5241 = vmatpush3.bf16.msra.mxu0 %v5791_v1  ;;  %s5005_s23 = sshll.u32 %s6741_s28, 3  ;;  %5253 = vmatpush3.bf16.msra.mxu1 %v5792_v2  ;;  %v5794_v4 = vld [vmem:[#allocation3 + $0x8] sm:$0xff]   ;;  %vm6147_vm5 = vmand %vm363_vm3, %vm369_vm2  ;;  %v5796_v8 = vld [vmem:[#allocation3 + $0x10] sm:$0xff]   ;;  %vm434_vm10 = vsmask.f32 7424  ;;  %vm471_vm11 = vcmask 523264   ;;  %s354_s30 = scalar_lea.vmem %s6713_s7, %s6741_s28 }
  0x2e   : > { %5242 = vmatprep.subr.bf16.mxu0 %v6027_v0  ;;  %5254 = vmatprep.subr.bf16.mxu1 %v6027_v0  ;;  %s6143_s26 = scalar_lea.vmem %s6706_s0, %s5005_s23  ;;  %v5797_v9 = vld [vmem:[#allocation3 + $0x38] sm:$0xff]   ;;  %v366_v12 = vld [vmem:[#allocation2] sm:$0x1]  ;;  %vm6162_vm8 = vmor %vm364_vm1, %vm374_vm6  ;;  %vm596_vm12 = vcmask 1046528   ;;  %s343_s13 = scalar_lea.vmem %s6710_s4, %s5005_s23  ;;  %vm1305_vm13 = vcmask 130048   ;;  %vm2250_vm14 = vcmask 518146  }
  0x2f   : > { %v359_v10 = vld [vmem:[%s6143_s26] sm:$0xf]  ;;  %v360_v11 = vld [vmem:[%s6143_s26 + $0x4] sm:$0xf]  ;;  %v367_v13 = vsel %vm6134_vm4, 0, %v366_v12  ;;  %vm6169_vm9 = vmand %vm396_vm7, %vm369_vm2  ;;  %s4726_s22 = sshll.u32 %s6741_s28, 2  ;;  %s357_s19 = scalar_lea.vmem %s6714_s8, %s6741_s28 }
  0x30   : > { %v371_v14 = vld [vmem:[#allocation2 + $0x8] sm:$0x1]  ;;  %v377_v15 = vshrl.u32 %v359_v10, 16  ;;  %v380_v16 = vshll.u32 %v359_v10, 16  ;;  %v385_v17 = vshrl.u32 %v360_v11, 16  ;;  %v388_v19 = vshll.u32 %v360_v11, 16  ;;  %s347_s25 = scalar_lea.vmem %s6711_s5, %s4726_s22 }
  0x31   : > { %5243 = vmatpush3.bf16.msra.mxu0 %v5793_v3  ;;  %5255 = vmatpush3.bf16.msra.mxu1 %v5794_v4  ;;  %368 = vst [vmem:[#allocation2] sm:$0x1] %v367_v13  ;;  %v372_v18 = vsel %vm6147_vm5, 0, %v371_v14  ;;  %v5798_v20 = vld [vmem:[#allocation3 + $0x18] sm:$0xff]   ;;  %v5801_v49 = vld [vmem:[#allocation3 + $0x40] sm:$0xff]   ;;  %v5802_v52 = vld [vmem:[#allocation3 + $0x48] sm:$0xff]  }
  0x32   : > { %5244 = vmatprep.subr.bf16.mxu0 %v6027_v0  ;;  %5256 = vmatprep.subr.bf16.mxu1 %v6027_v0  ;;  %373 = vst [vmem:[#allocation2 + $0x8] sm:$0x1] %v372_v18  ;;  %v379_v22 = vrot.slane %v377_v15, 7  ;;  %v387_v23 = vrot.slane %v385_v17, 7  ;;  %v5803_v53 = vld [vmem:[#allocation3 + $0x50] sm:$0xff]   ;;  %v5804_v54 = vld [vmem:[#allocation3 + $0x58] sm:$0xff]  }
  0x33   : > { %v5806_v58 = vld [vmem:[#allocation3 + $0x60] sm:$0xff]   ;;  %v5807_v59 = vld [vmem:[#allocation3 + $0x68] sm:$0xff]   ;;  %v5809_v61 = vld [vmem:[#allocation3 + $0x70] sm:$0xff]   ;;  %vm2251_vm15 = vsmask.f32 7946  ;;  %vm2201_vm2 = vcmask 1043456  }
  0x34   : > { %v383_v24 = vrot.slane %v379_v22, 4  ;;  %v390_v25 = vor.u32 %v388_v19, %v387_v23  ;;  %v392_v26 = vrot.slane %v387_v23, 4  ;;  %v382_v28 = vor.u32 %v380_v16, %v379_v22  ;;  %v5808_v60 = vld [vmem:[#allocation3 + $0x80] sm:$0xff]   ;;  %v5810_v62 = vld [vmem:[#allocation3 + $0x88] sm:$0xff]   ;;  %v5811_v63 = vld [vmem:[#allocation3 + $0x78] sm:$0xff]   ;;  %s4727_s14 = sshll.u32 %s6741_s28, 1 }
  0x35   : > { %5245 = vmatpush3.bf16.msra.mxu0 %v5795_v7  ;;  %5257 = vmatpush3.bf16.msra.mxu1 %v5796_v8  ;;  %v5812_v1 = vld [vmem:[#allocation3 + $0x90] sm:$0xff]   ;;  %v5813_v2 = vld [vmem:[#allocation3 + $0x98] sm:$0xff]   ;;  %vm6379_vm1 = vmand %vm2250_vm14, %vm2251_vm15  ;;  %vm2197_vm6 = vcmask 64512   ;;  %s351_s17 = scalar_lea.vmem %s6712_s6, %s4727_s14  ;;  %vm3083_vm15 = vcmask 1041408  }
  0x36   : > { %5246 = vmatprep.subr.bf16.mxu0 %v6027_v0  ;;  %5258 = vmatprep.subr.bf16.mxu1 %v6027_v0  ;;  %v391_v29 = vsel %vm6162_vm8, %v383_v24, %v390_v25  ;;  %v4746_v16 = vld [vmem:[%s6708_s2] ss:$0 sm:$0xff]  ;;  %v5980_v6 = vld [vmem:[#allocation3 + $0x538] sm:$0xff]  }
  0x37   : > { %402 = vst.msk [vmem:[#allocation2 + $0x4] sm:$0xf] %vm396_vm7, %v391_v29 }
  0x38   : > { %v398_v30 = vld [vmem:[#allocation2] sm:$0xf] }
  0x39   : > { %5247 = vmatpush3.bf16.msra.mxu0 %v5797_v9  ;;  %5259 = vmatpush3.bf16.msra.mxu1 %v5798_v20  ;;  %v399_v31 = vsel %vm6169_vm9, %v382_v28, %v398_v30  ;;  %v403_v32 = vld [vmem:[#allocation2 + $0x8] sm:$0x1] }
  0x3a   : > { %5264 = vmatprep.subr.bf16.mxu0 %v6027_v0  ;;  %5276 = vmatprep.subr.bf16.mxu1 %v6027_v0  ;;  %400 = vst [vmem:[#allocation2] sm:$0xf] %v399_v31  ;;  %v404_v33 = vsel %vm6134_vm4, %v392_v26, %v403_v32 }
  0x3b   : > { %405 = vst [vmem:[#allocation2 + $0x8] sm:$0x1] %v404_v33 }
  0x3e   : > { %v407_v34 = vld [vmem:[#allocation2 + $0x4] sm:$0xf] }
  0x41   : > { %v406_v35 = vld [vmem:[#allocation2] sm:$0xf] }
  0x42   : > { %v583_v36 = vld [vmem:[#allocation2] sm:$0xe]  ;;  %v4728_v37 = vcombine.low %v406_v35, %v407_v34  ;;  %v5800_v38 = vld [vmem:[#allocation2 + $0x8] ss:$0 sps:$4 sm:$0x11]  }
  0x43   : > { %v4740_v39 = vcombine.low %v583_v36, %v407_v34  ;;  %v682_v40 = vld [vmem:[#allocation2 + $0x8] sm:$0x1]  ;;  %v443_v43 = vshll.u32 %v5800_v38, 16  ;;  %v598_v46 = vrot.slane %v5800_v38, 1  ;;  %v679_v56 = vld [vmem:[#allocation2] sm:$0x1] }
  0x44   : > { %v436_v41 = vshrl.u32 %v4728_v37, 16  ;;  %v438_v42 = vshll.u32 %v4728_v37, 16  ;;  %v683_v44 = vsel %vm6147_vm5, 0, %v682_v40  ;;  %5261 = vmatmul.mubr.msk.bf16.vlgmr.msra.gmra.mrb[0].mxu1 %vm471_vm11, %v4728_v37  ;;  %v680_v57 = vsel %vm6134_vm4, 0, %v679_v56 }
  0x45   : > { %684 = vst [vmem:[#allocation2 + $0x8] sm:$0x1] %v683_v44  ;;  %v597_v45 = vrot.slane %v4740_v39, 1  ;;  %5284 = vmatprep.mubr.msk.bf16.mxu1 %vm6028_vm0, %v6027_v0  ;;  %v445_v48 = vrot.slane %v443_v43, 1  ;;  %681 = vst [vmem:[#allocation2] sm:$0x1] %v680_v57  ;;  %5277 = vmatpush3.bf16.msra.mxu1 %v5808_v60 }
  0x46   : > { %v440_v47 = vrot.slane %v438_v42, 1  ;;  %5278 = vmatprep.subr.bf16.mxu1 %v6027_v0 }
  0x47   : > { %v599_v55 = vsel %vm596_vm12, %v597_v45, %v598_v46 }
  0x48   : > { %v441_v50 = vor.u32 %v440_v47, %v436_v41 }
  0x49   : > { %5279 = vmatpush3.bf16.msra.mxu1 %v5810_v62  ;;  %v5817_v62 = vld [vmem:[#allocation3 + $0xb0] sm:$0xff]  }
  0x4a   : > { %v446_v51 = vsel %vm434_vm10, %v441_v50, %v445_v48  ;;  %5280 = vmatprep.subr.bf16.mxu1 %v6027_v0 }
  0x4b   : > { %5249 = vmatmul.mubr.msk.bf16.vlgmr.msra.gmra.mrb[0].mxu0 %vm471_vm11, %v446_v51 }
  0x4c   : > { %5265 = vmatpush3.bf16.msra.mxu0 %v5801_v49  ;;  %5272 = vmatprep.mubr.msk.bf16.mxu0 %vm6028_vm0, %v6027_v0  ;;  %v711_v34 = vld [vmem:[#allocation2] sm:$0xf]  ;;  %v715_v38 = vld [vmem:[#allocation2 + $0x8] sm:$0x1] }
  0x4d   : > { %5266 = vmatprep.subr.bf16.mxu0 %v6027_v0  ;;  %5281 = vmatpush3.bf16.msra.mxu1 %v5812_v1 }
  0x4e   : > { %5282 = vmatprep.subr.bf16.mxu1 %v6027_v0 }
  0x50   : > { %5267 = vmatpush3.bf16.msra.mxu0 %v5802_v52 }
  0x51   : > { %5268 = vmatprep.subr.bf16.mxu0 %v6027_v0  ;;  %5283 = vmatpush3.bf16.msra.mxu1 %v5813_v2  ;;  %v5818_v2 = vld [vmem:[#allocation3 + $0xb8] sm:$0xff]  }
  0x52   : > { %5300 = vmatprep.subr.bf16.mxu1 %v6027_v0 }
  0x54   : > { %5269 = vmatpush3.bf16.msra.mxu0 %v5803_v53 }
  0x55   : > { %5270 = vmatprep.subr.bf16.mxu0 %v6027_v0 }
  0x58   : > { %5271 = vmatpush3.bf16.msra.mxu0 %v5804_v54 }
  0x59   : > { %5288 = vmatprep.subr.bf16.mxu0 %v6027_v0 }
  0x5b   : > { %5273 = vmatmul.mubr.msk.bf16.vlgmr.msra.gmra.mrb[4].mxu0 %vm471_vm11, %v599_v55 }
  0x5c   : > { %5296 = vmatprep.mubr.msk.bf16.mxu0 %vm6028_vm0, %v6027_v0  ;;  %5289 = vmatpush3.bf16.msra.mxu0 %v5806_v58 }
  0x5d   : > { %5290 = vmatprep.subr.bf16.mxu0 %v6027_v0 }
  0x60   : > { %5291 = vmatpush3.bf16.msra.mxu0 %v5807_v59  ;;  %v5815_v59 = vld [vmem:[#allocation3 + $0xa0] sm:$0xff]  }
  0x61   : > { %5292 = vmatprep.subr.bf16.mxu0 %v6027_v0 }
  0x64   : > { %5293 = vmatpush3.bf16.msra.mxu0 %v5809_v61  ;;  %v5816_v61 = vld [vmem:[#allocation3 + $0xa8] sm:$0xff]  }
  0x65   : > { %5294 = vmatprep.subr.bf16.mxu0 %v6027_v0 }
  0x68   : > { %5295 = vmatpush3.bf16.msra.mxu0 %v5811_v63 }
  0x69   : > { %5312 = vmatprep.subr.bf16.mxu0 %v6027_v0 }
 0x117   : > { %v576_v3 = vpop.f32.mrb[0].mxu1 }
 0x118   : > { %v5262_v4 = vpop.f32.mrb[1].mxu1 }
 0x119   : > { %v579_v7 = vpop.f32.mrb[2].mxu1 }
 0x11a   : > { %v5263_v8 = vpop.f32.mrb[3].mxu1 }
 0x11b   : > { %v5819_v8 = vld [vmem:[#allocation3 + $0xc0] sm:$0xff]  }
 0x11e   : > { %v509_v9 = vpop.f32.mrb[0].mxu0 }
 0x11f   : > { %v577_v10 = vadd.f32 %v576_v3, %v509_v9  ;;  %v5250_v11 = vpop.f32.mrb[1].mxu0  ;;  %v5820_v9 = vld [vmem:[#allocation3 + $0xc8] sm:$0xff]  }
 0x120   : > { %v512_v12 = vpop.f32.mrb[2].mxu0  ;;  %v5822_v11 = vld [vmem:[#allocation3 + $0xd0] sm:$0xff]  }
 0x121   : > { %v580_v13 = vadd.f32 %v579_v7, %v512_v12  ;;  %v5251_v14 = vpop.f32.mrb[3].mxu0  ;;  %v5823_v12 = vld [vmem:[#allocation3 + $0xe8] sm:$0xff]  }
 0x122   : > { %v5825_v14 = vld [vmem:[#allocation3 + $0xf0] sm:$0xff]  }
 0x12e   : > { %v661_v15 = vpop.f32.mrb[4].mxu0 }
 0x12f   : > { %v668_v17 = vadd.f32 %v661_v15, %v577_v10  ;;  %v5274_v18 = vpop.f32.mrb[5].mxu0  ;;  %v5821_v10 = vld [vmem:[#allocation3 + $0xe0] sm:$0xff]   ;;  %v5826_v15 = vld [vmem:[#allocation3 + $0xf8] sm:$0xff]  }
 0x130   : > { %v664_v19 = vpop.f32.mrb[6].mxu0 }
 0x131   : > { %v675_v20 = vadd.f32 %v4746_v16, %v668_v17  ;;  %v669_v22 = vadd.f32 %v664_v19, %v580_v13  ;;  %v5275_v23 = vpop.f32.mrb[7].mxu0  ;;  %v5824_v13 = vld [vmem:[#allocation3 + $0xd8] sm:$0xff]  }
 0x133   : > { %v677_v24 = vmax.f32 %v675_v20, 0.0  ;;  %v676_v25 = vadd.f32 %v4746_v16, %v669_v22 }
 0x135   : > { %v5007_v26 = vpack.c.bf16 %v677_v24, %v677_v24  ;;  %v678_v28 = vmax.f32 %v676_v25, 0.0 }
 0x137   : > { %v692_v29 = vshrl.u32 %v5007_v26, 16  ;;  %v5008_v30 = vpack.c.bf16 %v678_v28, %v678_v28  ;;  %v695_v32 = vshll.u32 %v5007_v26, 16 }
 0x139   : > { %v694_v31 = vrot.slane %v692_v29, 7  ;;  %v700_v33 = vshrl.u32 %v5008_v30, 16  ;;  %v703_v37 = vshll.u32 %v5008_v30, 16  ;;  %v4767_v29 = vld [vmem:[%s6708_s2 + $0x1] ss:$0 sm:$0xff] }
 0x13a   : > { %v5982_v30 = vld [vmem:[%s6143_s26] sm:$0xf] }
 0x13b   : > { %v697_v35 = vor.u32 %v695_v32, %v694_v31  ;;  %v702_v36 = vrot.slane %v700_v33, 7  ;;  %v698_v39 = vrot.slane %v694_v31, 4  ;;  %v361_v31 = vunpack.c.l.bf16 %v5982_v30 }
 0x13d   : > { %v712_v40 = vsel %vm6169_vm9, %v697_v35, %v711_v34  ;;  %v705_v41 = vor.u32 %v703_v37, %v702_v36  ;;  %v707_v42 = vrot.slane %v702_v36, 4  ;;  %v5983_v36 = vld [vmem:[%s6143_s26 + $0x4] sm:$0xf] }
 0x13e   : > { %713 = vst [vmem:[#allocation2] sm:$0xf] %v712_v40  ;;  %v362_v37 = vunpack.c.l.bf16 %v5983_v36 }
 0x13f   : > { %v706_v43 = vsel %vm6162_vm8, %v698_v39, %v705_v41  ;;  %v716_v44 = vsel %vm6134_vm4, %v707_v42, %v715_v38 }
 0x140   : > { %714 = vst.msk [vmem:[#allocation2 + $0x4] sm:$0xf] %vm396_vm7, %v706_v43  ;;  %717 = vst [vmem:[#allocation2 + $0x8] sm:$0x1] %v716_v44 }
 0x145   : > { %v718_v45 = vld [vmem:[#allocation2] sm:$0xf] }
 0x146   : > { %v1001_v46 = vld [vmem:[#allocation2] sm:$0x1]  ;;  %v894_v63 = vld [vmem:[#allocation2] sm:$0xe] }
 0x147   : > { %v1002_v47 = vsel %vm6134_vm4, 0, %v1001_v46  ;;  %v1004_v48 = vld [vmem:[#allocation2 + $0x8] sm:$0x1]  ;;  %v719_v49 = vld [vmem:[#allocation2 + $0x4] sm:$0xf] }
 0x148   : > { %1003 = vst [vmem:[#allocation2] sm:$0x1] %v1002_v47  ;;  %v1005_v50 = vsel %vm6147_vm5, 0, %v1004_v48  ;;  %v4749_v51 = vcombine.low %v718_v45, %v719_v49  ;;  %v5814_v52 = vld [vmem:[#allocation2 + $0x8] ss:$0 sps:$4 sm:$0x11]   ;;  %v4761_v1 = vcombine.low %v894_v63, %v719_v49 }
 0x149   : > { %1006 = vst [vmem:[#allocation2 + $0x8] sm:$0x1] %v1005_v50  ;;  %v755_v54 = vshll.u32 %v5814_v52, 16  ;;  %v908_v4 = vrot.slane %v5814_v52, 1 }
 0x14a   : > { %5297 = vmatmul.mubr.msk.bf16.vlgmr.msra.gmra.mrb[8].mxu0 %vm471_vm11, %v4749_v51  ;;  %v750_v53 = vshll.u32 %v4749_v51, 16  ;;  %v748_v55 = vshrl.u32 %v4749_v51, 16  ;;  %v907_v3 = vrot.slane %v4761_v1, 1 }
 0x14b   : > { %5320 = vmatprep.mubr.msk.bf16.mxu0 %vm6028_vm0, %v6027_v0  ;;  %v757_v58 = vrot.slane %v755_v54, 1  ;;  %5313 = vmatpush3.bf16.msra.mxu0 %v5821_v10 }
 0x14c   : > { %v752_v56 = vrot.slane %v750_v53, 1  ;;  %v909_v7 = vsel %vm596_vm12, %v907_v3, %v908_v4  ;;  %5314 = vmatprep.subr.bf16.mxu0 %v6027_v0 }
 0x14e   : > { %v753_v57 = vor.u32 %v752_v56, %v748_v55 }
 0x14f   : > { %5315 = vmatpush3.bf16.msra.mxu0 %v5823_v12  ;;  %v1027_v54 = vld [vmem:[#allocation2] sm:$0xf] }
 0x150   : > { %v758_v60 = vsel %vm434_vm10, %v753_v57, %v757_v58  ;;  %5316 = vmatprep.subr.bf16.mxu0 %v6027_v0 }
 0x151   : > { %5285 = vmatmul.mubr.msk.bf16.vlgmr.msra.gmra.mrb[4].mxu1 %vm471_vm11, %v758_v60 }
 0x152   : > { %5301 = vmatpush3.bf16.msra.mxu1 %v5815_v59  ;;  %5308 = vmatprep.mubr.msk.bf16.mxu1 %vm6028_vm0, %v6027_v0  ;;  %v1031_v59 = vld [vmem:[#allocation2 + $0x8] sm:$0x1] }
 0x153   : > { %5302 = vmatprep.subr.bf16.mxu1 %v6027_v0  ;;  %5317 = vmatpush3.bf16.msra.mxu0 %v5825_v14  ;;  %v5828_v14 = vld [vmem:[#allocation3 + $0x100] sm:$0xff]  }
 0x154   : > { %5318 = vmatprep.subr.bf16.mxu0 %v6027_v0 }
 0x156   : > { %5303 = vmatpush3.bf16.msra.mxu1 %v5816_v61 }
 0x157   : > { %5304 = vmatprep.subr.bf16.mxu1 %v6027_v0  ;;  %5319 = vmatpush3.bf16.msra.mxu0 %v5826_v15 }
 0x158   : > { %5336 = vmatprep.subr.bf16.mxu0 %v6027_v0 }
 0x15a   : > { %5305 = vmatpush3.bf16.msra.mxu1 %v5817_v62 }
 0x15b   : > { %5306 = vmatprep.subr.bf16.mxu1 %v6027_v0 }
 0x15e   : > { %5307 = vmatpush3.bf16.msra.mxu1 %v5818_v2 }
 0x15f   : > { %5324 = vmatprep.subr.bf16.mxu1 %v6027_v0 }
 0x161   : > { %5309 = vmatmul.mubr.msk.bf16.vlgmr.msra.gmra.mrb[8].mxu1 %vm471_vm11, %v909_v7 }
 0x162   : > { %5332 = vmatprep.mubr.msk.bf16.mxu1 %vm6028_vm0, %v6027_v0  ;;  %5325 = vmatpush3.bf16.msra.mxu1 %v5819_v8 }
 0x163   : > { %5326 = vmatprep.subr.bf16.mxu1 %v6027_v0 }
 0x166   : > { %5327 = vmatpush3.bf16.msra.mxu1 %v5820_v9 }
 0x167   : > { %5328 = vmatprep.subr.bf16.mxu1 %v6027_v0 }
 0x16a   : > { %5329 = vmatpush3.bf16.msra.mxu1 %v5822_v11 }
 0x16b   : > { %5330 = vmatprep.subr.bf16.mxu1 %v6027_v0 }
 0x16e   : > { %5331 = vmatpush3.bf16.msra.mxu1 %v5824_v13 }
 0x16f   : > { %5348 = vmatprep.subr.bf16.mxu1 %v6027_v0 }
 0x21d   : > { %v887_v16 = vpop.f32.mrb[8].mxu0 }
 0x21e   : > { %v5298_v17 = vpop.f32.mrb[9].mxu0 }
 0x21f   : > { %v890_v18 = vpop.f32.mrb[10].mxu0  ;;  %v5830_v17 = vld [vmem:[#allocation3 + $0x110] sm:$0xff]  }
 0x220   : > { %v5299_v19 = vpop.f32.mrb[11].mxu0 }
 0x224   : > { %v820_v20 = vpop.f32.mrb[4].mxu1 }
 0x225   : > { %v888_v22 = vadd.f32 %v887_v16, %v820_v20  ;;  %v5286_v23 = vpop.f32.mrb[5].mxu1  ;;  %v5829_v16 = vld [vmem:[#allocation3 + $0x108] sm:$0xff]   ;;  %v5831_v20 = vld [vmem:[#allocation3 + $0x118] sm:$0xff]  }
 0x226   : > { %v823_v24 = vpop.f32.mrb[6].mxu1 }
 0x227   : > { %v891_v25 = vadd.f32 %v890_v18, %v823_v24  ;;  %v5287_v26 = vpop.f32.mrb[7].mxu1 }
 0x234   : > { %v971_v28 = vpop.f32.mrb[8].mxu1 }
 0x235   : > { %v978_v32 = vadd.f32 %v971_v28, %v888_v22  ;;  %v5310_v33 = vpop.f32.mrb[9].mxu1 }
 0x236   : > { %v974_v34 = vpop.f32.mrb[10].mxu1 }
 0x237   : > { %v985_v35 = vadd.f32 %v4767_v29, %v978_v32  ;;  %v979_v38 = vadd.f32 %v974_v34, %v891_v25  ;;  %v5311_v39 = vpop.f32.mrb[11].mxu1 }
 0x238   : > { %v4788_v39 = vld [vmem:[%s6708_s2 + $0x2] ss:$0 sm:$0xff] }
 0x239   : > { %v987_v40 = vadd.f32 %v985_v35, %v361_v31  ;;  %v986_v41 = vadd.f32 %v4767_v29, %v979_v38 }
 0x23b   : > { %v989_v42 = vmax.f32 %v987_v40, 0.0  ;;  %v988_v43 = vadd.f32 %v986_v41, %v362_v37 }
 0x23d   : > { %v5009_v44 = vpack.c.bf16 %v989_v42, %v989_v42  ;;  %v990_v45 = vmax.f32 %v988_v43, 0.0 }
 0x23f   : > { %999 = vst.msk [vmem:[%s343_s13] sm:$0xf] %vm396_vm7, %v5009_v44  ;;  %v1008_v46 = vshrl.u32 %v5009_v44, 16  ;;  %v5010_v47 = vpack.c.bf16 %v990_v45, %v990_v45  ;;  %v1011_v49 = vshll.u32 %v5009_v44, 16 }
 0x241   : > { %v1010_v48 = vrot.slane %v1008_v46, 7  ;;  %1000 = vst.msk [vmem:[%s343_s13 + $0x4] sm:$0xf] %vm396_vm7, %v5010_v47  ;;  %v1016_v50 = vshrl.u32 %v5010_v47, 16  ;;  %v1019_v53 = vshll.u32 %v5010_v47, 16  ;;  %v5833_v47 = vld [vmem:[#allocation3 + $0x120] sm:$0xff]  }
 0x242   : > { %v1303_v46 = vld [vmem:[%s6709_s3] sm:$0xf] }
 0x243   : > { %v1013_v51 = vor.u32 %v1011_v49, %v1010_v48  ;;  %v1018_v52 = vrot.slane %v1016_v50, 7  ;;  %v1014_v55 = vrot.slane %v1010_v48, 4  ;;  %v5834_v48 = vld [vmem:[#allocation3 + $0x128] sm:$0xff]   ;;  %v5835_v49 = vld [vmem:[#allocation3 + $0x140] sm:$0xff]   ;;  %v5836_v50 = vld [vmem:[#allocation3 + $0x130] sm:$0xff]  }
 0x245   : > { %v1028_v56 = vsel %vm6169_vm9, %v1013_v51, %v1027_v54  ;;  %v1021_v57 = vor.u32 %v1019_v53, %v1018_v52  ;;  %v1023_v58 = vrot.slane %v1018_v52, 4  ;;  %v5837_v51 = vld [vmem:[#allocation3 + $0x148] sm:$0xff]   ;;  %v5838_v52 = vld [vmem:[#allocation3 + $0x138] sm:$0xff]   ;;  %v5839_v53 = vld [vmem:[#allocation3 + $0x150] sm:$0xff]  }
 0x246   : > { %1029 = vst [vmem:[#allocation2] sm:$0xf] %v1028_v56  ;;  %v5840_v54 = vld [vmem:[#allocation3 + $0x158] sm:$0xff]  }
 0x247   : > { %v1022_v60 = vsel %vm6162_vm8, %v1014_v55, %v1021_v57  ;;  %v1032_v61 = vsel %vm6134_vm4, %v1023_v58, %v1031_v59  ;;  %vm2268_vm8 = vsmask.f32 2306 }
 0x248   : > { %1030 = vst.msk [vmem:[#allocation2 + $0x4] sm:$0xf] %vm396_vm7, %v1022_v60  ;;  %1033 = vst [vmem:[#allocation2 + $0x8] sm:$0x1] %v1032_v61 }
 0x24d   : > { %v1034_v62 = vld [vmem:[#allocation2] sm:$0xf] }
 0x24e   : > { %v1351_v63 = vld [vmem:[#allocation2] sm:$0x1]  ;;  %v1210_v18 = vld [vmem:[#allocation2] sm:$0xe] }
 0x24f   : > { %v1352_v1 = vsel %vm6134_vm4, 0, %v1351_v63  ;;  %v1035_v2 = vld [vmem:[#allocation2 + $0x4] sm:$0xf]  ;;  %v5827_v7 = vld [vmem:[#allocation2 + $0x8] ss:$0 sps:$4 sm:$0x11]  }
 0x250   : > { %1353 = vst [vmem:[#allocation2] sm:$0x1] %v1352_v1  ;;  %v1354_v3 = vld [vmem:[#allocation2 + $0x4] sm:$0x1]  ;;  %v4770_v4 = vcombine.low %v1034_v62, %v1035_v2  ;;  %v1071_v9 = vshll.u32 %v5827_v7, 16  ;;  %v4782_v19 = vcombine.low %v1210_v18, %v1035_v2  ;;  %v1224_v23 = vrot.slane %v5827_v7, 1 }
 0x251   : > { %v1355_v21 = vsel %vm6147_vm5, 0, %v1354_v3 }
 0x252   : > { %1356 = vst [vmem:[#allocation2 + $0x4] sm:$0x1] %v1355_v21  ;;  %5333 = vmatmul.mubr.msk.bf16.vlgmr.msra.gmra.mrb[12].mxu1 %vm471_vm11, %v4770_v4  ;;  %v1066_v8 = vshll.u32 %v4770_v4, 16  ;;  %v1064_v10 = vshrl.u32 %v4770_v4, 16  ;;  %v1073_v13 = vrot.slane %v1071_v9, 1  ;;  %v1223_v22 = vrot.slane %v4782_v19, 1 }
 0x253   : > { %5350 = vmatprep.mubr.msk.bf16.mxu1 %vm6028_vm0, %v6027_v0  ;;  %v5842_v19 = vld [vmem:[#allocation3 + $0x168] sm:$0xff]  }
 0x254   : > { %v1068_v11 = vrot.slane %v1066_v8, 1  ;;  %v1225_v24 = vsel %vm596_vm12, %v1223_v22, %v1224_v23  ;;  %v5844_v23 = vld [vmem:[#allocation3 + $0x178] sm:$0xff]   ;;  %vm3132_vm12 = vcmask 517121  }
 0x256   : > { %v1069_v12 = vor.u32 %v1068_v11, %v1064_v10 }
 0x257   : > { %v1370_v2 = vld [vmem:[#allocation2] sm:$0xf] }
 0x258   : > { %v1074_v15 = vsel %vm434_vm10, %v1069_v12, %v1073_v13  ;;  %vm2802_vm10 = vcmask 517120  }
 0x259   : > { %5321 = vmatmul.mubr.msk.bf16.vlgmr.msra.gmra.mrb[12].mxu0 %vm471_vm11, %v1074_v15  ;;  %v1373_v3 = vld [vmem:[#allocation2 + $0x4] sm:$0x1] }
 0x25a   : > { %5337 = vmatpush3.bf16.msra.mxu0 %v5828_v14  ;;  %5344 = vmatprep.mubr.msk.bf16.mxu0 %vm6028_vm0, %v6027_v0 }
 0x25b   : > { %5338 = vmatprep.subr.bf16.mxu0 %v6027_v0 }
 0x25e   : > { %5339 = vmatpush3.bf16.msra.mxu0 %v5829_v16 }
 0x25f   : > { %5340 = vmatprep.subr.bf16.mxu0 %v6027_v0 }
 0x262   : > { %5341 = vmatpush3.bf16.msra.mxu0 %v5830_v17  ;;  %v5841_v17 = vld [vmem:[#allocation3 + $0x160] sm:$0xff]  }
 0x263   : > { %5342 = vmatprep.subr.bf16.mxu0 %v6027_v0 }
 0x266   : > { %5343 = vmatpush3.bf16.msra.mxu0 %v5831_v20  ;;  %v5843_v20 = vld [vmem:[#allocation3 + $0x170] sm:$0xff]  }
 0x267   : > { %5366 = vmatprep.subr.bf16.mxu0 %v6027_v0 }
 0x269   : > { %5345 = vmatmul.mubr.msk.bf16.vlgmr.msra.gmra.mrb[16].mxu0 %vm471_vm11, %v1225_v24 }
 0x26a   : > { %5374 = vmatprep.mubr.msk.bf16.mxu0 %vm6028_vm0, %v6027_v0  ;;  %5367 = vmatpush3.bf16.msra.mxu0 %v5833_v47 }
 0x26b   : > { %5368 = vmatprep.subr.bf16.mxu0 %v6027_v0 }
 0x26e   : > { %5369 = vmatpush3.bf16.msra.mxu0 %v5834_v48 }
 0x26f   : > { %5370 = vmatprep.subr.bf16.mxu0 %v6027_v0 }
 0x272   : > { %5371 = vmatpush3.bf16.msra.mxu0 %v5836_v50 }
 0x273   : > { %5372 = vmatprep.subr.bf16.mxu0 %v6027_v0 }
 0x276   : > { %5373 = vmatpush3.bf16.msra.mxu0 %v5838_v52 }
 0x277   : > { %5390 = vmatprep.subr.bf16.mxu0 %v6027_v0 }
 0x325   : > { %v1203_v25 = vpop.f32.mrb[12].mxu1 }
 0x326   : > { %v5334_v26 = vpop.f32.mrb[13].mxu1 }
 0x327   : > { %v1206_v28 = vpop.f32.mrb[14].mxu1  ;;  %v5845_v26 = vld [vmem:[#allocation3 + $0x180] sm:$0xff]  }
 0x328   : > { %v5335_v29 = vpop.f32.mrb[15].mxu1 }
 0x329   : > { %v5847_v29 = vld [vmem:[#allocation3 + $0x1a0] sm:$0xff]  }
 0x32c   : > { %v1136_v30 = vpop.f32.mrb[12].mxu0 }
 0x32d   : > { %v1204_v31 = vadd.f32 %v1203_v25, %v1136_v30  ;;  %v5322_v32 = vpop.f32.mrb[13].mxu0  ;;  %v5848_v30 = vld [vmem:[#allocation3 + $0x190] sm:$0xff]  }
 0x32e   : > { %v1139_v33 = vpop.f32.mrb[14].mxu0  ;;  %v5850_v32 = vld [vmem:[#allocation3 + $0x198] sm:$0xff]  }
 0x32f   : > { %v1207_v34 = vadd.f32 %v1206_v28, %v1139_v33  ;;  %v5323_v35 = vpop.f32.mrb[15].mxu0  ;;  %v5846_v28 = vld [vmem:[#allocation3 + $0x188] sm:$0xff]   ;;  %v5851_v33 = vld [vmem:[#allocation3 + $0x1b0] sm:$0xff]  }
 0x33c   : > { %v1287_v36 = vpop.f32.mrb[16].mxu0 }
 0x33d   : > { %v1294_v37 = vadd.f32 %v1287_v36, %v1204_v31  ;;  %v5346_v38 = vpop.f32.mrb[17].mxu0  ;;  %v5849_v31 = vld [vmem:[#allocation3 + $0x1a8] sm:$0xff]  }
 0x33e   : > { %v1290_v40 = vpop.f32.mrb[18].mxu0 }
 0x33f   : > { %v1295_v41 = vadd.f32 %v1290_v40, %v1207_v34  ;;  %v5347_v42 = vpop.f32.mrb[19].mxu0  ;;  %v1301_v43 = vadd.f32 %v4788_v39, %v1294_v37  ;;  %v5852_v34 = vld [vmem:[#allocation3 + $0x1b8] sm:$0xff]  }
 0x341   : > { %v1302_v44 = vadd.f32 %v4788_v39, %v1295_v41 }
 0x343   : > { %v1304_v45 = vpack.c.bf16 %v1302_v44, %v1301_v43 }
 0x345   : > { %5349 = vmatpush3.bf16.msra.mxu1 %v1304_v45  ;;  %v4808_v45 = vld [vmem:[%s6708_s2 + $0x3] ss:$0 sm:$0xff] }
 0x346   : > { %5354 = vmatprep.subr.bf16.mxu1 %v6027_v0 }
 0x348   : > { %5351 = vmatmul.mubr.msk.bf16.vlgmr.msra.gmra.mrb[16].mxu1 %vm1305_vm13, %v1303_v46  ;;  %vm3133_vm13 = vsmask.f32 7942 }
 0x349   : > { %5362 = vmatprep.mubr.msk.bf16.mxu1 %vm6028_vm0, %v6027_v0  ;;  %5355 = vmatpush3.bf16.msra.mxu1 %v5835_v49  ;;  %vm6495_vm14 = vmand %vm3132_vm12, %vm3133_vm13 }
 0x34a   : > { %5356 = vmatprep.subr.bf16.mxu1 %v6027_v0 }
 0x34d   : > { %5357 = vmatpush3.bf16.msra.mxu1 %v5837_v51 }
 0x34e   : > { %5358 = vmatprep.subr.bf16.mxu1 %v6027_v0 }
 0x351   : > { %5359 = vmatpush3.bf16.msra.mxu1 %v5839_v53 }
 0x352   : > { %5360 = vmatprep.subr.bf16.mxu1 %v6027_v0 }
 0x355   : > { %5361 = vmatpush3.bf16.msra.mxu1 %v5840_v54 }
 0x356   : > { %5378 = vmatprep.subr.bf16.mxu1 %v6027_v0 }
 0x41b   : > { %v1343_v55 = vpop.f32.mrb[16].mxu1 }
 0x41c   : > { %v6301_v56 = vpack.c.bf16 %v1343_v55, %v1343_v55  ;;  %v5352_v57 = vpop.f32.mrb[17].mxu1 }
 0x41d   : > { %v1346_v58 = vpop.f32.mrb[18].mxu1 }
 0x41e   : > { %v1361_v59 = vshrl.u32 %v6301_v56, 16  ;;  %v5353_v60 = vpop.f32.mrb[19].mxu1  ;;  %v1364_v62 = vshll.u32 %v6301_v56, 16 }
 0x420   : > { %v1363_v61 = vrot.slane %v1361_v59, 7 }
 0x422   : > { %v1366_v63 = vor.u32 %v1364_v62, %v1363_v61  ;;  %v1367_v1 = vrot.slane %v1363_v61, 4 }
 0x424   : > { %v1371_v4 = vsel %vm6169_vm9, %v1366_v63, %v1370_v2  ;;  %v1374_v7 = vsel %vm6134_vm4, %v1367_v1, %v1373_v3 }
 0x425   : > { %1372 = vst [vmem:[#allocation2] sm:$0xf] %v1371_v4  ;;  %1375 = vst [vmem:[#allocation2 + $0x4] sm:$0x1] %v1374_v7 }
 0x42c   : > { %v1376_v21 = vld [vmem:[#allocation2] sm:$0xf]  ;;  %v1634_v9 = vld [vmem:[#allocation2 + $0x4] sm:$0x1] }
 0x42d   : > { %v1631_v8 = vld [vmem:[#allocation2] sm:$0x1]  ;;  %v1635_v11 = vsel %vm6147_vm5, 0, %v1634_v9  ;;  %5375 = vmatmul.mubr.msk.bf16.vlgmr.msra.gmra.mrb[20].mxu0 %vm471_vm11, %v1376_v21  ;;  %v1386_v12 = vld [vmem:[#allocation2 + $0x4] sm:$0x1] }
 0x42e   : > { %v1632_v10 = vsel %vm6134_vm4, 0, %v1631_v8  ;;  %v4791_v13 = vcombine.low %v1376_v21, %v1386_v12  ;;  %1636 = vst [vmem:[#allocation2 + $0x4] sm:$0x1] %v1635_v11  ;;  %5398 = vmatprep.mubr.msk.bf16.mxu0 %vm6028_vm0, %v6027_v0  ;;  %v1542_v22 = vld [vmem:[#allocation2] sm:$0xe]  ;;  %5391 = vmatpush3.bf16.msra.mxu0 %v5847_v29  ;;  %v5853_v11 = vld [vmem:[#allocation3 + $0x1c0] sm:$0xff]  }
 0x42f   : > { %1633 = vst [vmem:[#allocation2] sm:$0x1] %v1632_v10  ;;  %v4802_v24 = vcombine.low %v1542_v22, %v1386_v12  ;;  %5392 = vmatprep.subr.bf16.mxu0 %v6027_v0  ;;  %v5859_v22 = vld [vmem:[#allocation3 + $0x200] sm:$0xff]  }
 0x430   : > { %v1404_v14 = vshll.u32 %v4791_v13, 16  ;;  %v1402_v15 = vshrl.u32 %v4791_v13, 16  ;;  %v5854_v13 = vld [vmem:[#allocation3 + $0x1c8] sm:$0xff]  }
 0x431   : > { %v1555_v25 = vrot.slane %v4802_v24, 1  ;;  %v5861_v24 = vld [vmem:[#allocation3 + $0x208] sm:$0xff]  }
 0x432   : > { %v1406_v16 = vrot.slane %v1404_v14, 1  ;;  %5393 = vmatpush3.bf16.msra.mxu0 %v5849_v31  ;;  %v5855_v14 = vld [vmem:[#allocation3 + $0x1d0] sm:$0xff]  }
 0x433   : > { %5394 = vmatprep.subr.bf16.mxu0 %v6027_v0 }
 0x434   : > { %v1407_v18 = vor.u32 %v1406_v16, %v1402_v15  ;;  %v5856_v16 = vld [vmem:[#allocation3 + $0x1d8] sm:$0xff]  }
 0x435   : > { %v1654_v60 = vld [vmem:[#allocation2 + $0x4] sm:$0x1] }
 0x436   : > { %5363 = vmatmul.mubr.msk.bf16.vlgmr.msra.gmra.mrb[20].mxu1 %vm471_vm11, %v1407_v18  ;;  %5395 = vmatpush3.bf16.msra.mxu0 %v5851_v33  ;;  %v1651_v59 = vld [vmem:[#allocation2] sm:$0xf] }
 0x437   : > { %5379 = vmatpush3.bf16.msra.mxu1 %v5841_v17  ;;  %5386 = vmatprep.mubr.msk.bf16.mxu1 %vm6028_vm0, %v6027_v0 }
 0x438   : > { %5380 = vmatprep.subr.bf16.mxu1 %v6027_v0  ;;  %5396 = vmatprep.subr.bf16.mxu0 %v6027_v0 }
 0x43a   : > { %5397 = vmatpush3.bf16.msra.mxu0 %v5852_v34 }
 0x43b   : > { %5381 = vmatpush3.bf16.msra.mxu1 %v5842_v19  ;;  %5414 = vmatprep.subr.bf16.mxu0 %v6027_v0  ;;  %v5857_v19 = vld [vmem:[#allocation3 + $0x1e0] sm:$0xff]  }
 0x43c   : > { %5382 = vmatprep.subr.bf16.mxu1 %v6027_v0 }
 0x43f   : > { %5383 = vmatpush3.bf16.msra.mxu1 %v5843_v20  ;;  %v5858_v20 = vld [vmem:[#allocation3 + $0x1e8] sm:$0xff]  }
 0x440   : > { %5384 = vmatprep.subr.bf16.mxu1 %v6027_v0 }
 0x443   : > { %5385 = vmatpush3.bf16.msra.mxu1 %v5844_v23  ;;  %v5860_v23 = vld [vmem:[#allocation3 + $0x1f0] sm:$0xff]  }
 0x444   : > { %5402 = vmatprep.subr.bf16.mxu1 %v6027_v0 }
 0x446   : > { %5387 = vmatmul.mubr.msk.bf16.vlgmr.msra.gmra.mrb[24].mxu1 %vm471_vm11, %v1555_v25  ;;  %v5862_v25 = vld [vmem:[#allocation3 + $0x1f8] sm:$0xff]  }
 0x447   : > { %5410 = vmatprep.mubr.msk.bf16.mxu1 %vm6028_vm0, %v6027_v0  ;;  %5403 = vmatpush3.bf16.msra.mxu1 %v5845_v26  ;;  %v5863_v26 = vld [vmem:[#allocation3 + $0x210] sm:$0xff]  }
 0x448   : > { %5404 = vmatprep.subr.bf16.mxu1 %v6027_v0 }
 0x44b   : > { %5405 = vmatpush3.bf16.msra.mxu1 %v5846_v28  ;;  %v5864_v28 = vld [vmem:[#allocation3 + $0x218] sm:$0xff]  }
 0x44c   : > { %5406 = vmatprep.subr.bf16.mxu1 %v6027_v0 }
 0x44f   : > { %5407 = vmatpush3.bf16.msra.mxu1 %v5848_v30 }
 0x450   : > { %5408 = vmatprep.subr.bf16.mxu1 %v6027_v0 }
 0x453   : > { %5409 = vmatpush3.bf16.msra.mxu1 %v5850_v32 }
 0x454   : > { %5426 = vmatprep.subr.bf16.mxu1 %v6027_v0 }
 0x500   : > { %v1536_v35 = vpop.f32.mrb[20].mxu0 }
 0x501   : > { %v5376_v36 = vpop.f32.mrb[21].mxu0 }
 0x502   : > { %v1539_v37 = vpop.f32.mrb[22].mxu0 }
 0x503   : > { %v5377_v38 = vpop.f32.mrb[23].mxu0 }
 0x509   : > { %v1469_v39 = vpop.f32.mrb[20].mxu1 }
 0x50a   : > { %v1537_v40 = vadd.f32 %v1536_v35, %v1469_v39  ;;  %v5364_v41 = vpop.f32.mrb[21].mxu1  ;;  %v4827_v39 = vld [vmem:[%s6708_s2 + $0x4] ss:$0 sm:$0xff] }
 0x50b   : > { %v1472_v42 = vpop.f32.mrb[22].mxu1 }
 0x50c   : > { %v5365_v43 = vpop.f32.mrb[23].mxu1 }
 0x50d   : > { %v1350_v43 = vunpack.c.l.bf16 %v6301_v56 }
 0x519   : > { %v1617_v44 = vpop.f32.mrb[24].mxu1 }
 0x51a   : > { %v1623_v46 = vadd.f32 %v1617_v44, %v1537_v40  ;;  %v5388_v47 = vpop.f32.mrb[25].mxu1 }
 0x51b   : > { %v1620_v48 = vpop.f32.mrb[26].mxu1 }
 0x51c   : > { %v1629_v49 = vadd.f32 %v4808_v45, %v1623_v46  ;;  %v5389_v50 = vpop.f32.mrb[27].mxu1 }
 0x51e   : > { %v1630_v51 = vmax.f32 %v1629_v49, 0.0 }
 0x520   : > { %v5012_v52 = vpack.c.bf16 %v1630_v51, %v1630_v51 }
 0x522   : > { %v1642_v53 = vshrl.u32 %v5012_v52, 16  ;;  %v1645_v55 = vshll.u32 %v5012_v52, 16 }
 0x524   : > { %v1644_v54 = vrot.slane %v1642_v53, 7 }
 0x526   : > { %v1647_v57 = vor.u32 %v1645_v55, %v1644_v54  ;;  %v1648_v58 = vrot.slane %v1644_v54, 4 }
 0x528   : > { %v1652_v61 = vsel %vm6169_vm9, %v1647_v57, %v1651_v59  ;;  %v1655_v62 = vsel %vm6134_vm4, %v1648_v58, %v1654_v60  ;;  %v5896_v58 = vld [vmem:[#allocation3 + $0x2f8] sm:$0xff]  }
 0x529   : > { %1653 = vst [vmem:[#allocation2] sm:$0xf] %v1652_v61  ;;  %1656 = vst [vmem:[#allocation2 + $0x4] sm:$0x1] %v1655_v62 }
 0x530   : > { %v1657_v63 = vld [vmem:[#allocation2] sm:$0xf]  ;;  %v1918_v2 = vld [vmem:[#allocation2 + $0x4] sm:$0x1] }
 0x531   : > { %v1915_v1 = vld [vmem:[#allocation2] sm:$0x1]  ;;  %v1919_v4 = vsel %vm6147_vm5, 0, %v1918_v2  ;;  %5411 = vmatmul.mubr.msk.bf16.vlgmr.msra.gmra.mrb[28].mxu1 %vm471_vm11, %v1657_v63  ;;  %v1667_v7 = vld [vmem:[#allocation2 + $0x4] sm:$0x1] }
 0x532   : > { %v1916_v3 = vsel %vm6134_vm4, 0, %v1915_v1  ;;  %v4810_v21 = vcombine.low %v1657_v63, %v1667_v7  ;;  %1920 = vst [vmem:[#allocation2 + $0x4] sm:$0x1] %v1919_v4  ;;  %5434 = vmatprep.mubr.msk.bf16.mxu1 %vm6028_vm0, %v6027_v0  ;;  %v1823_v15 = vld [vmem:[#allocation2] sm:$0xe]  ;;  %5427 = vmatpush3.bf16.msra.mxu1 %v5859_v22 }
 0x533   : > { %1917 = vst [vmem:[#allocation2] sm:$0x1] %v1916_v3  ;;  %v4821_v17 = vcombine.low %v1823_v15, %v1667_v7  ;;  %5428 = vmatprep.subr.bf16.mxu1 %v6027_v0 }
 0x534   : > { %v1685_v8 = vshll.u32 %v4810_v21, 16  ;;  %v1683_v9 = vshrl.u32 %v4810_v21, 16  ;;  %v5865_v21 = vld [vmem:[#allocation3 + $0x220] sm:$0xff]  }
 0x535   : > { %v1836_v18 = vrot.slane %v4821_v17, 1 }
 0x536   : > { %v1687_v10 = vrot.slane %v1685_v8, 1  ;;  %5429 = vmatpush3.bf16.msra.mxu1 %v5861_v24 }
 0x537   : > { %5430 = vmatprep.subr.bf16.mxu1 %v6027_v0 }
 0x538   : > { %v1688_v12 = vor.u32 %v1687_v10, %v1683_v9  ;;  %v5866_v9 = vld [vmem:[#allocation3 + $0x228] sm:$0xff]   ;;  %v5867_v10 = vld [vmem:[#allocation3 + $0x230] sm:$0xff]  }
 0x539   : > { %v1937_v55 = vld [vmem:[#allocation2 + $0x4] sm:$0x1] }
 0x53a   : > { %5399 = vmatmul.mubr.msk.bf16.vlgmr.msra.gmra.mrb[24].mxu0 %vm471_vm11, %v1688_v12  ;;  %5431 = vmatpush3.bf16.msra.mxu1 %v5863_v26  ;;  %v1934_v54 = vld [vmem:[#allocation2] sm:$0xf] }
 0x53b   : > { %5415 = vmatpush3.bf16.msra.mxu0 %v5853_v11  ;;  %5422 = vmatprep.mubr.msk.bf16.mxu0 %vm6028_vm0, %v6027_v0  ;;  %v5868_v11 = vld [vmem:[#allocation3 + $0x238] sm:$0xff]  }
 0x53c   : > { %5416 = vmatprep.subr.bf16.mxu0 %v6027_v0  ;;  %5432 = vmatprep.subr.bf16.mxu1 %v6027_v0 }
 0x53e   : > { %5433 = vmatpush3.bf16.msra.mxu1 %v5864_v28 }
 0x53f   : > { %5417 = vmatpush3.bf16.msra.mxu0 %v5854_v13  ;;  %5450 = vmatprep.subr.bf16.mxu1 %v6027_v0 }
 0x540   : > { %5418 = vmatprep.subr.bf16.mxu0 %v6027_v0 }
 0x543   : > { %5419 = vmatpush3.bf16.msra.mxu0 %v5855_v14 }
 0x544   : > { %5420 = vmatprep.subr.bf16.mxu0 %v6027_v0 }
 0x547   : > { %5421 = vmatpush3.bf16.msra.mxu0 %v5856_v16 }
 0x548   : > { %5438 = vmatprep.subr.bf16.mxu0 %v6027_v0 }
 0x54a   : > { %5423 = vmatmul.mubr.msk.bf16.vlgmr.msra.gmra.mrb[28].mxu0 %vm471_vm11, %v1836_v18 }
 0x54b   : > { %5446 = vmatprep.mubr.msk.bf16.mxu0 %vm6028_vm0, %v6027_v0  ;;  %5439 = vmatpush3.bf16.msra.mxu0 %v5857_v19 }
 0x54c   : > { %5440 = vmatprep.subr.bf16.mxu0 %v6027_v0 }
 0x54f   : > { %5441 = vmatpush3.bf16.msra.mxu0 %v5858_v20 }
 0x550   : > { %5442 = vmatprep.subr.bf16.mxu0 %v6027_v0 }
 0x553   : > { %5443 = vmatpush3.bf16.msra.mxu0 %v5860_v23 }
 0x554   : > { %5444 = vmatprep.subr.bf16.mxu0 %v6027_v0 }
 0x557   : > { %5445 = vmatpush3.bf16.msra.mxu0 %v5862_v25  ;;  %v4846_v25 = vld [vmem:[%s6708_s2 + $0x5] ss:$0 sm:$0xff] }
 0x558   : > { %5462 = vmatprep.subr.bf16.mxu0 %v6027_v0 }
 0x604   : > { %v1817_v29 = vpop.f32.mrb[28].mxu1 }
 0x605   : > { %v5412_v30 = vpop.f32.mrb[29].mxu1 }
 0x606   : > { %v1820_v31 = vpop.f32.mrb[30].mxu1 }
 0x607   : > { %v5413_v32 = vpop.f32.mrb[31].mxu1 }
 0x60d   : > { %v1750_v33 = vpop.f32.mrb[24].mxu0 }
 0x60e   : > { %v1818_v34 = vadd.f32 %v1817_v29, %v1750_v33  ;;  %v5400_v35 = vpop.f32.mrb[25].mxu0 }
 0x60f   : > { %v1753_v36 = vpop.f32.mrb[26].mxu0  ;;  %v5870_v35 = vld [vmem:[#allocation3 + $0x240] sm:$0xff]  }
 0x610   : > { %v5401_v37 = vpop.f32.mrb[27].mxu0  ;;  %v5871_v36 = vld [vmem:[#allocation3 + $0x248] sm:$0xff]  }
 0x611   : > { %v5872_v37 = vld [vmem:[#allocation3 + $0x260] sm:$0xff]  }
 0x61d   : > { %v1898_v38 = vpop.f32.mrb[28].mxu0 }
 0x61e   : > { %v1904_v40 = vadd.f32 %v1898_v38, %v1818_v34  ;;  %v5424_v41 = vpop.f32.mrb[29].mxu0  ;;  %v4847_v34 = vld [vmem:[%s6709_s3 + $0x4] sm:$0x3]  ;;  %v5873_v38 = vld [vmem:[#allocation3 + $0x250] sm:$0xff]  }
 0x61f   : > { %v1901_v42 = vpop.f32.mrb[30].mxu0  ;;  %v5876_v41 = vld [vmem:[#allocation3 + $0x270] sm:$0xff]  }
 0x620   : > { %v1910_v44 = vadd.f32 %v4827_v39, %v1904_v40  ;;  %v5425_v45 = vpop.f32.mrb[31].mxu0  ;;  %v5874_v39 = vld [vmem:[#allocation3 + $0x268] sm:$0xff]   ;;  %v5875_v40 = vld [vmem:[#allocation3 + $0x258] sm:$0xff]  }
 0x621   : > { %v5877_v42 = vld [vmem:[#allocation3 + $0x278] sm:$0xff]  }
 0x622   : > { %v1911_v46 = vadd.f32 %v1910_v44, %v1350_v43 }
 0x624   : > { %v1912_v47 = vmax.f32 %v1911_v46, 0.0 }
 0x626   : > { %v1913_v48 = vpack.c.bf16 %v1912_v47, %v1912_v47 }
 0x628   : > { %1914 = vst.msk [vmem:[%s347_s25] sm:$0xf] %vm396_vm7, %v1913_v48  ;;  %v1925_v49 = vshrl.u32 %v1913_v48, 16  ;;  %v1928_v51 = vshll.u32 %v1913_v48, 16  ;;  %vm2267_vm7 = vcmask 518144  }
 0x62a   : > { %v1927_v50 = vrot.slane %v1925_v49, 7 }
 0x62c   : > { %v1930_v52 = vor.u32 %v1928_v51, %v1927_v50  ;;  %v1931_v53 = vrot.slane %v1927_v50, 4 }
 0x62e   : > { %v1935_v56 = vsel %vm6169_vm9, %v1930_v52, %v1934_v54  ;;  %v1938_v57 = vsel %vm6134_vm4, %v1931_v53, %v1937_v55  ;;  %vm6421_vm9 = vmand %vm2267_vm7, %vm2268_vm8  ;;  %vm4012_vm7 = vsmask.f32 1280 }
 0x62f   : > { %1936 = vst [vmem:[#allocation2] sm:$0xf] %v1935_v56  ;;  %1939 = vst [vmem:[#allocation2 + $0x4] sm:$0x1] %v1938_v57 }
 0x630   : > { %vm6610_vm8 = vmand %vm3132_vm12, %vm4012_vm7 }
 0x636   : > { %v2247_v59 = vld [vmem:[#allocation2] sm:$0x1]  ;;  %v2253_v60 = vld [vmem:[#allocation2] sm:$0x4]  ;;  %v1950_v63 = vld [vmem:[#allocation2 + $0x4] sm:$0x1] }
 0x637   : > { %v1940_v61 = vld [vmem:[#allocation2] sm:$0xf]  ;;  %v2248_v62 = vsel %vm6134_vm4, 0, %v2247_v59  ;;  %v2254_v27 = vsel %vm6379_vm1, 0, %v2253_v60 }
 0x638   : > { %5447 = vmatmul.mubr.msk.bf16.vlgmr.msra.gmra.mrb[32].mxu0 %vm471_vm11, %v1940_v61  ;;  %v2106_v1 = vld [vmem:[#allocation2] sm:$0xe]  ;;  %2249 = vst [vmem:[#allocation2] sm:$0x1] %v2248_v62  ;;  %v4829_v2 = vcombine.low %v1940_v61, %v1950_v63 }
 0x639   : > { %2255 = vst [vmem:[#allocation2] sm:$0x4] %v2254_v27  ;;  %5464 = vmatprep.mubr.msk.bf16.mxu0 %vm6028_vm0, %v6027_v0  ;;  %v4840_v12 = vcombine.low %v2106_v1, %v1950_v63 }
 0x63a   : > { %v1968_v3 = vshll.u32 %v4829_v2, 16  ;;  %v1966_v4 = vshrl.u32 %v4829_v2, 16  ;;  %v5879_v2 = vld [vmem:[#allocation3 + $0x280] sm:$0xff]  }
 0x63b   : > { %v2119_v13 = vrot.slane %v4840_v12, 1  ;;  %v5887_v12 = vld [vmem:[#allocation3 + $0x2b0] sm:$0xff]  }
 0x63c   : > { %v1970_v7 = vrot.slane %v1968_v3, 1 }
 0x63e   : > { %v1971_v8 = vor.u32 %v1970_v7, %v1966_v4  ;;  %v5880_v4 = vld [vmem:[#allocation3 + $0x288] sm:$0xff]   ;;  %v5881_v7 = vld [vmem:[#allocation3 + $0x290] sm:$0xff]  }
 0x640   : > { %5435 = vmatmul.mubr.msk.bf16.vlgmr.msra.gmra.mrb[32].mxu1 %vm471_vm11, %v1971_v8  ;;  %v2270_v53 = vld [vmem:[#allocation2] sm:$0x7] }
 0x641   : > { %5451 = vmatpush3.bf16.msra.mxu1 %v5865_v21  ;;  %5458 = vmatprep.mubr.msk.bf16.mxu1 %vm6028_vm0, %v6027_v0  ;;  %v5882_v21 = vld [vmem:[#allocation3 + $0x298] sm:$0xff]  }
 0x642   : > { %5452 = vmatprep.subr.bf16.mxu1 %v6027_v0 }
 0x645   : > { %5453 = vmatpush3.bf16.msra.mxu1 %v5866_v9  ;;  %v5884_v9 = vld [vmem:[#allocation3 + $0x2a0] sm:$0xff]  }
 0x646   : > { %5454 = vmatprep.subr.bf16.mxu1 %v6027_v0 }
 0x649   : > { %5455 = vmatpush3.bf16.msra.mxu1 %v5867_v10  ;;  %v5885_v10 = vld [vmem:[#allocation3 + $0x2a8] sm:$0xff]  }
 0x64a   : > { %5456 = vmatprep.subr.bf16.mxu1 %v6027_v0 }
 0x64d   : > { %5457 = vmatpush3.bf16.msra.mxu1 %v5868_v11  ;;  %v5886_v11 = vld [vmem:[#allocation3 + $0x2c0] sm:$0xff]  }
 0x64e   : > { %5480 = vmatprep.subr.bf16.mxu1 %v6027_v0 }
 0x650   : > { %5459 = vmatmul.mubr.msk.bf16.vlgmr.msra.gmra.mrb[36].mxu1 %vm471_vm11, %v2119_v13  ;;  %v5888_v13 = vld [vmem:[#allocation3 + $0x2c8] sm:$0xff]  }
 0x651   : > { %5488 = vmatprep.mubr.msk.bf16.mxu1 %vm6028_vm0, %v6027_v0  ;;  %5481 = vmatpush3.bf16.msra.mxu1 %v5870_v35 }
 0x652   : > { %5482 = vmatprep.subr.bf16.mxu1 %v6027_v0 }
 0x655   : > { %5483 = vmatpush3.bf16.msra.mxu1 %v5871_v36 }
 0x656   : > { %5484 = vmatprep.subr.bf16.mxu1 %v6027_v0 }
 0x659   : > { %5485 = vmatpush3.bf16.msra.mxu1 %v5873_v38 }
 0x65a   : > { %5486 = vmatprep.subr.bf16.mxu1 %v6027_v0 }
 0x65d   : > { %5487 = vmatpush3.bf16.msra.mxu1 %v5875_v40 }
 0x65e   : > { %5504 = vmatprep.subr.bf16.mxu1 %v6027_v0 }
 0x70b   : > { %v2100_v14 = vpop.f32.mrb[32].mxu0 }
 0x70c   : > { %v5448_v15 = vpop.f32.mrb[33].mxu0 }
 0x70d   : > { %v2103_v16 = vpop.f32.mrb[34].mxu0  ;;  %v5890_v15 = vld [vmem:[#allocation3 + $0x2d0] sm:$0xff]  }
 0x70e   : > { %v5449_v17 = vpop.f32.mrb[35].mxu0  ;;  %v5891_v16 = vld [vmem:[#allocation3 + $0x2d8] sm:$0xff]  }
 0x713   : > { %v2033_v18 = vpop.f32.mrb[32].mxu1 }
 0x714   : > { %v2101_v19 = vadd.f32 %v2100_v14, %v2033_v18  ;;  %v5436_v20 = vpop.f32.mrb[33].mxu1  ;;  %v5889_v14 = vld [vmem:[#allocation3 + $0x2b8] sm:$0xff]  }
 0x715   : > { %v2036_v22 = vpop.f32.mrb[34].mxu1 }
 0x716   : > { %v5437_v23 = vpop.f32.mrb[35].mxu1 }
 0x723   : > { %v2181_v24 = vpop.f32.mrb[36].mxu1 }
 0x724   : > { %v2187_v26 = vadd.f32 %v2181_v24, %v2101_v19  ;;  %v5460_v28 = vpop.f32.mrb[37].mxu1 }
 0x725   : > { %v2184_v29 = vpop.f32.mrb[38].mxu1 }
 0x726   : > { %v2193_v30 = vadd.f32 %v4846_v25, %v2187_v26  ;;  %v5461_v31 = vpop.f32.mrb[39].mxu1  ;;  %v4867_v29 = vld [vmem:[%s6708_s2 + $0x6] ss:$0 sm:$0xff] }
 0x728   : > { %v2196_v32 = vpack.c.bf16 %v2193_v30, %v2193_v30 }
 0x72a   : > { %v2203_v33 = vsel %vm2201_vm2, %v2196_v32, 0  ;;  %vm3150_vm2 = vsmask.f32 1282 }
 0x72b   : > { %5463 = vmatpush3.bf16.msra.mxu0 %v2203_v33 }
 0x72c   : > { %5468 = vmatprep.subr.bf16.mxu0 %v6027_v0 }
 0x72e   : > { %5465 = vmatmul.mubr.msk.bf16.vlgmr.msra.gmra.mrb[36].mxu0 %vm2197_vm6, %v4847_v34  ;;  %vm6537_vm6 = vmand %vm2802_vm10, %vm3150_vm2 }
 0x72f   : > { %5476 = vmatprep.mubr.msk.bf16.mxu0 %vm6028_vm0, %v6027_v0  ;;  %5469 = vmatpush3.bf16.msra.mxu0 %v5872_v37 }
 0x730   : > { %5470 = vmatprep.subr.bf16.mxu0 %v6027_v0 }
 0x733   : > { %5471 = vmatpush3.bf16.msra.mxu0 %v5874_v39 }
 0x734   : > { %5472 = vmatprep.subr.bf16.mxu0 %v6027_v0 }
 0x737   : > { %5473 = vmatpush3.bf16.msra.mxu0 %v5876_v41 }
 0x738   : > { %5474 = vmatprep.subr.bf16.mxu0 %v6027_v0 }
 0x73b   : > { %5475 = vmatpush3.bf16.msra.mxu0 %v5877_v42 }
 0x73c   : > { %5492 = vmatprep.subr.bf16.mxu0 %v6027_v0 }
 0x801   : > { %v2239_v43 = vpop.f32.mrb[36].mxu0 }
 0x802   : > { %v6417_v44 = vpack.c.bf16 %v2239_v43, %v2239_v43  ;;  %v5466_v45 = vpop.f32.mrb[37].mxu0 }
 0x803   : > { %v2242_v46 = vpop.f32.mrb[38].mxu0 }
 0x804   : > { %v2260_v47 = vshrl.u32 %v6417_v44, 16  ;;  %v5467_v48 = vpop.f32.mrb[39].mxu0  ;;  %v2263_v50 = vshll.u32 %v6417_v44, 16 }
 0x806   : > { %v2262_v49 = vrot.slane %v2260_v47, 7 }
 0x808   : > { %v2265_v52 = vor.u32 %v2263_v50, %v2262_v49 }
 0x80a   : > { %v2271_v54 = vsel %vm6421_vm9, %v2265_v52, %v2270_v53 }
 0x80b   : > { %2272 = vst [vmem:[#allocation2] sm:$0x7] %v2271_v54 }
 0x812   : > { %v2526_v55 = vld [vmem:[#allocation2] sm:$0x1]  ;;  %v2529_v56 = vld [vmem:[#allocation2] sm:$0x4] }
 0x813   : > { %v2273_v57 = vld [vmem:[#allocation2] sm:$0x3]  ;;  %v2530_v59 = vsel %vm6379_vm1, 0, %v2529_v56  ;;  %v2527_v62 = vsel %vm6134_vm4, 0, %v2526_v55  ;;  %v5893_v55 = vld [vmem:[#allocation3 + $0x2e0] sm:$0xff]  }
 0x814   : > { %5489 = vmatmul.mubr.msk.bf16.vlgmr.msra.gmra.mrb[40].mxu1 %vm471_vm11, %v2273_v57  ;;  %v5878_v60 = vld [vmem:[#allocation2] ss:$0 sps:$4 sm:$0x77]   ;;  %2531 = vst [vmem:[#allocation2] sm:$0x4] %v2530_v59  ;;  %v5894_v57 = vld [vmem:[#allocation3 + $0x2e8] sm:$0xff]  }
 0x815   : > { %v5883_v61 = vld [vmem:[#allocation2] ss:$0 sps:$4 sm:$0x66]   ;;  %5512 = vmatprep.mubr.msk.bf16.mxu1 %vm6028_vm0, %v6027_v0  ;;  %v2299_v27 = vshll.u32 %v5878_v60, 16  ;;  %2528 = vst [vmem:[#allocation2] sm:$0x1] %v2527_v62  ;;  %5505 = vmatpush3.bf16.msra.mxu1 %v5886_v11 }
 0x816   : > { %v2297_v63 = vshrl.u32 %v5878_v60, 16  ;;  %v2450_v8 = vrot.slane %v5883_v61, 1  ;;  %5506 = vmatprep.subr.bf16.mxu1 %v6027_v0  ;;  %v5895_v59 = vld [vmem:[#allocation3 + $0x2f0] sm:$0xff]   ;;  %v5898_v61 = vld [vmem:[#allocation3 + $0x300] sm:$0xff]   ;;  %v5899_v62 = vld [vmem:[#allocation3 + $0x308] sm:$0xff]  }
 0x817   : > { %v2301_v1 = vrot.slane %v2299_v27, 1  ;;  %v5900_v27 = vld [vmem:[#allocation3 + $0x320] sm:$0xff]  }
 0x819   : > { %v2302_v3 = vor.u32 %v2301_v1, %v2297_v63  ;;  %5507 = vmatpush3.bf16.msra.mxu1 %v5888_v13  ;;  %v5901_v63 = vld [vmem:[#allocation3 + $0x310] sm:$0xff]   ;;  %v5902_v1 = vld [vmem:[#allocation3 + $0x328] sm:$0xff]  }
 0x81a   : > { %5508 = vmatprep.subr.bf16.mxu1 %v6027_v0 }
 0x81b   : > { %5477 = vmatmul.mubr.msk.bf16.vlgmr.msra.gmra.mrb[40].mxu0 %vm471_vm11, %v2302_v3  ;;  %v5904_v3 = vld [vmem:[#allocation3 + $0x330] sm:$0xff]  }
 0x81c   : > { %5493 = vmatpush3.bf16.msra.mxu0 %v5879_v2  ;;  %5500 = vmatprep.mubr.msk.bf16.mxu0 %vm6028_vm0, %v6027_v0  ;;  %v2544_v41 = vld [vmem:[#allocation2] sm:$0x7]  ;;  %v5903_v2 = vld [vmem:[#allocation3 + $0x318] sm:$0xff]  }
 0x81d   : > { %5494 = vmatprep.subr.bf16.mxu0 %v6027_v0  ;;  %5509 = vmatpush3.bf16.msra.mxu1 %v5890_v15 }
 0x81e   : > { %5510 = vmatprep.subr.bf16.mxu1 %v6027_v0 }
 0x820   : > { %5495 = vmatpush3.bf16.msra.mxu0 %v5880_v4  ;;  %v5905_v4 = vld [vmem:[#allocation3 + $0x338] sm:$0xff]  }
 0x821   : > { %5496 = vmatprep.subr.bf16.mxu0 %v6027_v0  ;;  %5511 = vmatpush3.bf16.msra.mxu1 %v5891_v16  ;;  %v4886_v16 = vld [vmem:[%s6708_s2 + $0x7] ss:$0 sm:$0xff] }
 0x822   : > { %5528 = vmatprep.subr.bf16.mxu1 %v6027_v0 }
 0x824   : > { %5497 = vmatpush3.bf16.msra.mxu0 %v5881_v7 }
 0x825   : > { %5498 = vmatprep.subr.bf16.mxu0 %v6027_v0 }
 0x828   : > { %5499 = vmatpush3.bf16.msra.mxu0 %v5882_v21 }
 0x829   : > { %5516 = vmatprep.subr.bf16.mxu0 %v6027_v0 }
 0x82b   : > { %5501 = vmatmul.mubr.msk.bf16.vlgmr.msra.gmra.mrb[44].mxu0 %vm471_vm11, %v2450_v8 }
 0x82c   : > { %5524 = vmatprep.mubr.msk.bf16.mxu0 %vm6028_vm0, %v6027_v0  ;;  %5517 = vmatpush3.bf16.msra.mxu0 %v5884_v9 }
 0x82d   : > { %5518 = vmatprep.subr.bf16.mxu0 %v6027_v0 }
 0x830   : > { %5519 = vmatpush3.bf16.msra.mxu0 %v5885_v10 }
 0x831   : > { %5520 = vmatprep.subr.bf16.mxu0 %v6027_v0 }
 0x834   : > { %5521 = vmatpush3.bf16.msra.mxu0 %v5887_v12 }
 0x835   : > { %5522 = vmatprep.subr.bf16.mxu0 %v6027_v0 }
 0x838   : > { %5523 = vmatpush3.bf16.msra.mxu0 %v5889_v14 }
 0x839   : > { %5540 = vmatprep.subr.bf16.mxu0 %v6027_v0 }
 0x8e7   : > { %v2431_v17 = vpop.f32.mrb[40].mxu1 }
 0x8e8   : > { %v5490_v18 = vpop.f32.mrb[41].mxu1 }
 0x8e9   : > { %v2434_v19 = vpop.f32.mrb[42].mxu1 }
 0x8ea   : > { %v5491_v20 = vpop.f32.mrb[43].mxu1 }
 0x8eb   : > { %v2246_v20 = vunpack.c.l.bf16 %v6417_v44 }
 0x8ee   : > { %v2364_v22 = vpop.f32.mrb[40].mxu0 }
 0x8ef   : > { %v2432_v23 = vadd.f32 %v2431_v17, %v2364_v22  ;;  %v5478_v24 = vpop.f32.mrb[41].mxu0 }
 0x8f0   : > { %v2367_v25 = vpop.f32.mrb[42].mxu0 }
 0x8f1   : > { %v5479_v26 = vpop.f32.mrb[43].mxu0 }
 0x8fe   : > { %v2512_v28 = vpop.f32.mrb[44].mxu0 }
 0x8ff   : > { %v2518_v30 = vadd.f32 %v2512_v28, %v2432_v23  ;;  %v5502_v31 = vpop.f32.mrb[45].mxu0 }
 0x900   : > { %v2515_v32 = vpop.f32.mrb[46].mxu0 }
 0x901   : > { %v2524_v33 = vadd.f32 %v4867_v29, %v2518_v30  ;;  %v5503_v34 = vpop.f32.mrb[47].mxu0 }
 0x903   : > { %v2525_v35 = vmax.f32 %v2524_v33, 0.0 }
 0x905   : > { %v5015_v36 = vpack.c.bf16 %v2525_v35, %v2525_v35 }
 0x907   : > { %v2537_v37 = vshrl.u32 %v5015_v36, 16  ;;  %v2540_v39 = vshll.u32 %v5015_v36, 16  ;;  %v5937_v36 = vld [vmem:[#allocation3 + $0x410] sm:$0xff]  }
 0x909   : > { %v2539_v38 = vrot.slane %v2537_v37, 7 }
 0x90b   : > { %v2542_v40 = vor.u32 %v2540_v39, %v2539_v38 }
 0x90d   : > { %v2545_v42 = vsel %vm6421_vm9, %v2542_v40, %v2544_v41 }
 0x90e   : > { %2546 = vst [vmem:[#allocation2] sm:$0x7] %v2545_v42 }
 0x915   : > { %v2547_v43 = vld [vmem:[#allocation2] sm:$0x3]  ;;  %v2807_v48 = vld [vmem:[#allocation2] sm:$0x4] }
 0x916   : > { %5525 = vmatmul.mubr.msk.bf16.vlgmr.msra.gmra.mrb[48].mxu0 %vm471_vm11, %v2547_v43  ;;  %v5892_v45 = vld [vmem:[#allocation2] ss:$0 sps:$4 sm:$0x77]   ;;  %v2808_v52 = vsel %vm6379_vm1, 0, %v2807_v48  ;;  %v5907_v43 = vld [vmem:[#allocation3 + $0x340] sm:$0xff]   ;;  %v5910_v48 = vld [vmem:[#allocation3 + $0x358] sm:$0xff]  }
 0x917   : > { %v5897_v46 = vld [vmem:[#allocation2] ss:$0 sps:$4 sm:$0x66]   ;;  %5548 = vmatprep.mubr.msk.bf16.mxu0 %vm6028_vm0, %v6027_v0  ;;  %v2573_v49 = vshll.u32 %v5892_v45, 16  ;;  %v2571_v53 = vshrl.u32 %v5892_v45, 16  ;;  %5541 = vmatpush3.bf16.msra.mxu0 %v5900_v27  ;;  %vm3079_vm1 = vcmask 31744  }
 0x918   : > { %v2804_v47 = vld [vmem:[#allocation2] sm:$0x1]  ;;  %2809 = vst [vmem:[#allocation2] sm:$0x4] %v2808_v52  ;;  %v2724_v60 = vrot.slane %v5897_v46, 1  ;;  %5542 = vmatprep.subr.bf16.mxu0 %v6027_v0  ;;  %v5908_v46 = vld [vmem:[#allocation3 + $0x348] sm:$0xff]  }
 0x919   : > { %v2805_v50 = vsel %vm6134_vm4, 0, %v2804_v47  ;;  %v2575_v54 = vrot.slane %v2573_v49, 1  ;;  %v5909_v47 = vld [vmem:[#allocation3 + $0x350] sm:$0xff]  }
 0x91a   : > { %2806 = vst [vmem:[#allocation2] sm:$0x1] %v2805_v50 }
 0x91b   : > { %v2576_v56 = vor.u32 %v2575_v54, %v2571_v53  ;;  %5543 = vmatpush3.bf16.msra.mxu0 %v5902_v1 }
 0x91c   : > { %5544 = vmatprep.subr.bf16.mxu0 %v6027_v0 }
 0x91d   : > { %5513 = vmatmul.mubr.msk.bf16.vlgmr.msra.gmra.mrb[44].mxu1 %vm471_vm11, %v2576_v56 }
 0x91e   : > { %5529 = vmatpush3.bf16.msra.mxu1 %v5893_v55  ;;  %5536 = vmatprep.mubr.msk.bf16.mxu1 %vm6028_vm0, %v6027_v0 }
 0x91f   : > { %5530 = vmatprep.subr.bf16.mxu1 %v6027_v0  ;;  %5545 = vmatpush3.bf16.msra.mxu0 %v5904_v3 }
 0x920   : > { %5546 = vmatprep.subr.bf16.mxu0 %v6027_v0 }
 0x921   : > { %v2821_v32 = vld [vmem:[#allocation2] sm:$0x7] }
 0x922   : > { %5531 = vmatpush3.bf16.msra.mxu1 %v5894_v57 }
 0x923   : > { %5532 = vmatprep.subr.bf16.mxu1 %v6027_v0  ;;  %5547 = vmatpush3.bf16.msra.mxu0 %v5905_v4 }
 0x924   : > { %5564 = vmatprep.subr.bf16.mxu0 %v6027_v0 }
 0x926   : > { %5533 = vmatpush3.bf16.msra.mxu1 %v5895_v59 }
 0x927   : > { %5534 = vmatprep.subr.bf16.mxu1 %v6027_v0 }
 0x92a   : > { %5535 = vmatpush3.bf16.msra.mxu1 %v5896_v58 }
 0x92b   : > { %5552 = vmatprep.subr.bf16.mxu1 %v6027_v0 }
 0x92d   : > { %5537 = vmatmul.mubr.msk.bf16.vlgmr.msra.gmra.mrb[48].mxu1 %vm471_vm11, %v2724_v60 }
 0x92e   : > { %5560 = vmatprep.mubr.msk.bf16.mxu1 %vm6028_vm0, %v6027_v0  ;;  %5553 = vmatpush3.bf16.msra.mxu1 %v5898_v61  ;;  %v4905_v61 = vld [vmem:[%s6708_s2 + $0x8] ss:$0 sm:$0xff] }
 0x92f   : > { %5554 = vmatprep.subr.bf16.mxu1 %v6027_v0 }
 0x932   : > { %5555 = vmatpush3.bf16.msra.mxu1 %v5899_v62 }
 0x933   : > { %5556 = vmatprep.subr.bf16.mxu1 %v6027_v0 }
 0x936   : > { %5557 = vmatpush3.bf16.msra.mxu1 %v5901_v63 }
 0x937   : > { %5558 = vmatprep.subr.bf16.mxu1 %v6027_v0 }
 0x93a   : > { %5559 = vmatpush3.bf16.msra.mxu1 %v5903_v2 }
 0x93b   : > { %5576 = vmatprep.subr.bf16.mxu1 %v6027_v0 }
 0x9e9   : > { %v2705_v7 = vpop.f32.mrb[48].mxu0 }
 0x9ea   : > { %v5526_v21 = vpop.f32.mrb[49].mxu0 }
 0x9eb   : > { %v2708_v8 = vpop.f32.mrb[50].mxu0  ;;  %v5912_v21 = vld [vmem:[#allocation3 + $0x360] sm:$0xff]  }
 0x9ec   : > { %v5527_v9 = vpop.f32.mrb[51].mxu0  ;;  %v5913_v8 = vld [vmem:[#allocation3 + $0x368] sm:$0xff]  }
 0x9ed   : > { %v5914_v9 = vld [vmem:[#allocation3 + $0x380] sm:$0xff]  }
 0x9f0   : > { %v2638_v10 = vpop.f32.mrb[44].mxu1 }
 0x9f1   : > { %v2706_v11 = vadd.f32 %v2705_v7, %v2638_v10  ;;  %v5514_v12 = vpop.f32.mrb[45].mxu1  ;;  %v4906_v7 = vld [vmem:[%s6709_s3 + $0x8] sm:$0x1]  ;;  %v5915_v10 = vld [vmem:[#allocation3 + $0x370] sm:$0xff]  }
 0x9f2   : > { %v2641_v13 = vpop.f32.mrb[46].mxu1  ;;  %v5917_v12 = vld [vmem:[#allocation3 + $0x378] sm:$0xff]  }
 0x9f3   : > { %v5515_v14 = vpop.f32.mrb[47].mxu1  ;;  %v5918_v13 = vld [vmem:[#allocation3 + $0x390] sm:$0xff]  }
 0x9f4   : > { %v5919_v14 = vld [vmem:[#allocation3 + $0x398] sm:$0xff]  }
 0xa00   : > { %v2786_v15 = vpop.f32.mrb[48].mxu1 }
 0xa01   : > { %v2792_v17 = vadd.f32 %v2786_v15, %v2706_v11  ;;  %v5538_v18 = vpop.f32.mrb[49].mxu1  ;;  %v5916_v11 = vld [vmem:[#allocation3 + $0x388] sm:$0xff]  }
 0xa02   : > { %v2789_v19 = vpop.f32.mrb[50].mxu1 }
 0xa03   : > { %v2798_v22 = vadd.f32 %v4886_v16, %v2792_v17  ;;  %v5539_v23 = vpop.f32.mrb[51].mxu1 }
 0xa05   : > { %v2799_v24 = vadd.f32 %v2798_v22, %v2246_v20 }
 0xa07   : > { %v2800_v25 = vmax.f32 %v2799_v24, 0.0 }
 0xa09   : > { %v2801_v26 = vpack.c.bf16 %v2800_v25, %v2800_v25 }
 0xa0b   : > { %2803 = vst.msk [vmem:[%s351_s17] sm:$0x3] %vm2802_vm10, %v2801_v26  ;;  %v2814_v28 = vshrl.u32 %v2801_v26, 16  ;;  %v2817_v30 = vshll.u32 %v2801_v26, 16 }
 0xa0d   : > { %v2816_v29 = vrot.slane %v2814_v28, 7 }
 0xa0f   : > { %v2819_v31 = vor.u32 %v2817_v30, %v2816_v29 }
 0xa11   : > { %v2822_v44 = vsel %vm6421_vm9, %v2819_v31, %v2821_v32  ;;  %vm3960_vm9 = vcmask 15360  }
 0xa12   : > { %2823 = vst [vmem:[#allocation2] sm:$0x7] %v2822_v44 }
 0xa19   : > { %v2824_v33 = vld [vmem:[#allocation2] sm:$0x3] }
 0xa1a   : > { %5561 = vmatmul.mubr.msk.bf16.vlgmr.msra.gmra.mrb[52].mxu1 %vm471_vm11, %v2824_v33  ;;  %v5906_v34 = vld [vmem:[#allocation2] ss:$0 sps:$4 sm:$0x77]   ;;  %v3135_v38 = vld [vmem:[#allocation2] sm:$0x2] }
 0xa1b   : > { %v5911_v35 = vld [vmem:[#allocation2] ss:$0 sps:$4 sm:$0x66]   ;;  %5578 = vmatprep.mubr.msk.bf16.mxu1 %vm6028_vm0, %v6027_v0  ;;  %v2850_v51 = vshll.u32 %v5906_v34, 16  ;;  %v3136_v40 = vsel %vm6495_vm14, 0, %v3135_v38  ;;  %v2848_v41 = vshrl.u32 %v5906_v34, 16 }
 0xa1c   : > { %v3129_v37 = vld [vmem:[#allocation2] sm:$0x1]  ;;  %3137 = vst [vmem:[#allocation2] sm:$0x2] %v3136_v40  ;;  %v3001_v49 = vrot.slane %v5911_v35, 1  ;;  %v5921_v38 = vld [vmem:[#allocation3 + $0x3a0] sm:$0xff]  }
 0xa1d   : > { %v3130_v39 = vsel %vm6134_vm4, 0, %v3129_v37  ;;  %v2852_v42 = vrot.slane %v2850_v51, 1  ;;  %v5923_v40 = vld [vmem:[#allocation3 + $0x3b0] sm:$0xff]  }
 0xa1e   : > { %3131 = vst [vmem:[#allocation2] sm:$0x1] %v3130_v39  ;;  %v5922_v39 = vld [vmem:[#allocation3 + $0x3a8] sm:$0xff]  }
 0xa1f   : > { %v2853_v45 = vor.u32 %v2852_v42, %v2848_v41  ;;  %v5924_v41 = vld [vmem:[#allocation3 + $0x3b8] sm:$0xff]  }
 0xa21   : > { %5549 = vmatmul.mubr.msk.bf16.vlgmr.msra.gmra.mrb[52].mxu0 %vm471_vm11, %v2853_v45  ;;  %v5927_v45 = vld [vmem:[#allocation3 + $0x3c8] sm:$0xff]  }
 0xa22   : > { %5565 = vmatpush3.bf16.msra.mxu0 %v5907_v43  ;;  %5572 = vmatprep.mubr.msk.bf16.mxu0 %vm6028_vm0, %v6027_v0  ;;  %v5926_v43 = vld [vmem:[#allocation3 + $0x3c0] sm:$0xff]  }
 0xa23   : > { %5566 = vmatprep.subr.bf16.mxu0 %v6027_v0 }
 0xa25   : > { %v3152_v26 = vld [vmem:[#allocation2] sm:$0x3] }
 0xa26   : > { %5567 = vmatpush3.bf16.msra.mxu0 %v5908_v46  ;;  %v5928_v46 = vld [vmem:[#allocation3 + $0x3e0] sm:$0xff]  }
 0xa27   : > { %5568 = vmatprep.subr.bf16.mxu0 %v6027_v0 }
 0xa2a   : > { %5569 = vmatpush3.bf16.msra.mxu0 %v5909_v47  ;;  %v5929_v47 = vld [vmem:[#allocation3 + $0x3d0] sm:$0xff]  }
 0xa2b   : > { %5570 = vmatprep.subr.bf16.mxu0 %v6027_v0 }
 0xa2e   : > { %5571 = vmatpush3.bf16.msra.mxu0 %v5910_v48  ;;  %v5930_v48 = vld [vmem:[#allocation3 + $0x3e8] sm:$0xff]  }
 0xa2f   : > { %5594 = vmatprep.subr.bf16.mxu0 %v6027_v0 }
 0xa31   : > { %5573 = vmatmul.mubr.msk.bf16.vlgmr.msra.gmra.mrb[56].mxu0 %vm471_vm11, %v3001_v49  ;;  %v5931_v49 = vld [vmem:[#allocation3 + $0x3d8] sm:$0xff]  }
 0xa32   : > { %5602 = vmatprep.mubr.msk.bf16.mxu0 %vm6028_vm0, %v6027_v0  ;;  %5595 = vmatpush3.bf16.msra.mxu0 %v5912_v21 }
 0xa33   : > { %5596 = vmatprep.subr.bf16.mxu0 %v6027_v0 }
 0xa36   : > { %5597 = vmatpush3.bf16.msra.mxu0 %v5913_v8 }
 0xa37   : > { %5598 = vmatprep.subr.bf16.mxu0 %v6027_v0 }
 0xa3a   : > { %5599 = vmatpush3.bf16.msra.mxu0 %v5915_v10 }
 0xa3b   : > { %5600 = vmatprep.subr.bf16.mxu0 %v6027_v0 }
 0xa3e   : > { %5601 = vmatpush3.bf16.msra.mxu0 %v5917_v12 }
 0xa3f   : > { %5618 = vmatprep.subr.bf16.mxu0 %v6027_v0 }
 0xaed   : > { %v2982_v50 = vpop.f32.mrb[52].mxu1 }
 0xaee   : > { %v5562_v52 = vpop.f32.mrb[53].mxu1 }
 0xaef   : > { %v2985_v53 = vpop.f32.mrb[54].mxu1  ;;  %v5933_v52 = vld [vmem:[#allocation3 + $0x3f8] sm:$0xff]  }
 0xaf0   : > { %v5563_v54 = vpop.f32.mrb[55].mxu1 }
 0xaf4   : > { %v2915_v55 = vpop.f32.mrb[52].mxu0 }
 0xaf5   : > { %v2983_v56 = vadd.f32 %v2982_v50, %v2915_v55  ;;  %v5550_v57 = vpop.f32.mrb[53].mxu0  ;;  %v5932_v50 = vld [vmem:[#allocation3 + $0x3f0] sm:$0xff]  }
 0xaf6   : > { %v2918_v59 = vpop.f32.mrb[54].mxu0 }
 0xaf7   : > { %v5551_v58 = vpop.f32.mrb[55].mxu0 }
 0xb04   : > { %v3063_v60 = vpop.f32.mrb[56].mxu0 }
 0xb05   : > { %v3069_v62 = vadd.f32 %v3063_v60, %v2983_v56  ;;  %v5574_v27 = vpop.f32.mrb[57].mxu0 }
 0xb06   : > { %v3066_v63 = vpop.f32.mrb[58].mxu0  ;;  %v4926_v27 = vld [vmem:[%s6708_s2 + $0x9] ss:$0 sm:$0xff] }
 0xb07   : > { %v3075_v1 = vadd.f32 %v4905_v61, %v3069_v62  ;;  %v5575_v2 = vpop.f32.mrb[59].mxu0 }
 0xb09   : > { %v3078_v3 = vpack.c.bf16 %v3075_v1, %v3075_v1 }
 0xb0b   : > { %v3085_v4 = vsel %vm3083_vm15, %v3078_v3, 0 }
 0xb0c   : > { %5577 = vmatpush3.bf16.msra.mxu1 %v3085_v4 }
 0xb0d   : > { %5582 = vmatprep.subr.bf16.mxu1 %v6027_v0 }
 0xb0f   : > { %5579 = vmatmul.mubr.msk.bf16.vlgmr.msra.gmra.mrb[56].mxu1 %vm3079_vm1, %v4906_v7 }
 0xb10   : > { %5590 = vmatprep.mubr.msk.bf16.mxu1 %vm6028_vm0, %v6027_v0  ;;  %5583 = vmatpush3.bf16.msra.mxu1 %v5914_v9 }
 0xb11   : > { %5584 = vmatprep.subr.bf16.mxu1 %v6027_v0 }
 0xb14   : > { %5585 = vmatpush3.bf16.msra.mxu1 %v5916_v11 }
 0xb15   : > { %5586 = vmatprep.subr.bf16.mxu1 %v6027_v0 }
 0xb18   : > { %5587 = vmatpush3.bf16.msra.mxu1 %v5918_v13 }
 0xb19   : > { %5588 = vmatprep.subr.bf16.mxu1 %v6027_v0 }
 0xb1c   : > { %5589 = vmatpush3.bf16.msra.mxu1 %v5919_v14 }
 0xb1d   : > { %5606 = vmatprep.subr.bf16.mxu1 %v6027_v0 }
 0xbe2   : > { %v3121_v15 = vpop.f32.mrb[56].mxu1 }
 0xbe3   : > { %v6532_v16 = vpack.c.bf16 %v3121_v15, %v3121_v15  ;;  %v5580_v17 = vpop.f32.mrb[57].mxu1 }
 0xbe4   : > { %v3124_v18 = vpop.f32.mrb[58].mxu1 }
 0xbe5   : > { %v3142_v19 = vshrl.u32 %v6532_v16, 16  ;;  %v5581_v20 = vpop.f32.mrb[59].mxu1  ;;  %v3145_v23 = vshll.u32 %v6532_v16, 16 }
 0xbe7   : > { %v3144_v22 = vrot.slane %v3142_v19, 7 }
 0xbe9   : > { %v3147_v25 = vor.u32 %v3145_v23, %v3144_v22 }
 0xbeb   : > { %v3153_v28 = vsel %vm6537_vm6, %v3147_v25, %v3152_v26 }
 0xbec   : > { %3154 = vst [vmem:[#allocation2] sm:$0x3] %v3153_v28  ;;  %v5935_v28 = vld [vmem:[#allocation3 + $0x400] sm:$0xff]  }
 0xbf3   : > { %v3410_v29 = vld [vmem:[#allocation2] sm:$0x2]  ;;  %v3155_v30 = vld [vmem:[#allocation2] sm:$0x1] }
 0xbf4   : > { %v3411_v31 = vsel %vm6495_vm14, 0, %v3410_v29  ;;  %5603 = vmatmul.mubr.msk.bf16.vlgmr.msra.gmra.mrb[60].mxu0 %vm471_vm11, %v3155_v30  ;;  %v3408_v32 = vsel %vm6134_vm4, 0, %v3155_v30  ;;  %v5920_v44 = vld [vmem:[#allocation2] ss:$0 sps:$4 sm:$0x33]   ;;  %v5936_v30 = vld [vmem:[#allocation3 + $0x408] sm:$0xff]  }
 0xbf5   : > { %3409 = vst [vmem:[#allocation2] sm:$0x1] %v3408_v32  ;;  %v5925_v33 = vld [vmem:[#allocation2] ss:$0 sps:$4 sm:$0x22]   ;;  %5626 = vmatprep.mubr.msk.bf16.mxu0 %vm6028_vm0, %v6027_v0  ;;  %v3181_v34 = vshll.u32 %v5920_v44, 16  ;;  %5619 = vmatpush3.bf16.msra.mxu0 %v5928_v46 }
 0xbf6   : > { %3412 = vst [vmem:[#allocation2] sm:$0x2] %v3411_v31  ;;  %v3179_v35 = vshrl.u32 %v5920_v44, 16  ;;  %v3332_v42 = vrot.slane %v5925_v33, 1  ;;  %5620 = vmatprep.subr.bf16.mxu0 %v6027_v0  ;;  %v5938_v31 = vld [vmem:[#allocation3 + $0x418] sm:$0xff]   ;;  %v5940_v44 = vld [vmem:[#allocation3 + $0x420] sm:$0xff]  }
 0xbf7   : > { %v3183_v37 = vrot.slane %v3181_v34, 1  ;;  %v5941_v33 = vld [vmem:[#allocation3 + $0x428] sm:$0xff]   ;;  %v5942_v34 = vld [vmem:[#allocation3 + $0x440] sm:$0xff]  }
 0xbf9   : > { %v3184_v51 = vor.u32 %v3183_v37, %v3179_v35  ;;  %5621 = vmatpush3.bf16.msra.mxu0 %v5930_v48  ;;  %v5943_v35 = vld [vmem:[#allocation3 + $0x430] sm:$0xff]   ;;  %v5944_v37 = vld [vmem:[#allocation3 + $0x448] sm:$0xff]  }
 0xbfa   : > { %5622 = vmatprep.subr.bf16.mxu0 %v6027_v0 }
 0xbfb   : > { %5591 = vmatmul.mubr.msk.bf16.vlgmr.msra.gmra.mrb[60].mxu1 %vm471_vm11, %v3184_v51  ;;  %v5946_v51 = vld [vmem:[#allocation3 + $0x450] sm:$0xff]  }
 0xbfc   : > { %5607 = vmatpush3.bf16.msra.mxu1 %v5921_v38  ;;  %5614 = vmatprep.mubr.msk.bf16.mxu1 %vm6028_vm0, %v6027_v0  ;;  %v5945_v38 = vld [vmem:[#allocation3 + $0x438] sm:$0xff]  }
 0xbfd   : > { %5608 = vmatprep.subr.bf16.mxu1 %v6027_v0  ;;  %5623 = vmatpush3.bf16.msra.mxu0 %v5932_v50  ;;  %v3425_v12 = vld [vmem:[#allocation2] sm:$0x3] }
 0xbfe   : > { %5624 = vmatprep.subr.bf16.mxu0 %v6027_v0 }
 0xc00   : > { %5609 = vmatpush3.bf16.msra.mxu1 %v5922_v39  ;;  %v5947_v39 = vld [vmem:[#allocation3 + $0x458] sm:$0xff]  }
 0xc01   : > { %5610 = vmatprep.subr.bf16.mxu1 %v6027_v0  ;;  %5625 = vmatpush3.bf16.msra.mxu0 %v5933_v52  ;;  %v4945_v52 = vld [vmem:[%s6708_s2 + $0xa] ss:$0 sm:$0xff] }
 0xc02   : > { %5642 = vmatprep.subr.bf16.mxu0 %v6027_v0 }
 0xc04   : > { %5611 = vmatpush3.bf16.msra.mxu1 %v5923_v40 }
 0xc05   : > { %5612 = vmatprep.subr.bf16.mxu1 %v6027_v0 }
 0xc08   : > { %5613 = vmatpush3.bf16.msra.mxu1 %v5924_v41 }
 0xc09   : > { %5630 = vmatprep.subr.bf16.mxu1 %v6027_v0 }
 0xc0b   : > { %5615 = vmatmul.mubr.msk.bf16.vlgmr.msra.gmra.mrb[64].mxu1 %vm471_vm11, %v3332_v42 }
 0xc0c   : > { %5638 = vmatprep.mubr.msk.bf16.mxu1 %vm6028_vm0, %v6027_v0  ;;  %5631 = vmatpush3.bf16.msra.mxu1 %v5926_v43 }
 0xc0d   : > { %5632 = vmatprep.subr.bf16.mxu1 %v6027_v0 }
 0xc10   : > { %5633 = vmatpush3.bf16.msra.mxu1 %v5927_v45 }
 0xc11   : > { %5634 = vmatprep.subr.bf16.mxu1 %v6027_v0 }
 0xc14   : > { %5635 = vmatpush3.bf16.msra.mxu1 %v5929_v47 }
 0xc15   : > { %5636 = vmatprep.subr.bf16.mxu1 %v6027_v0 }
 0xc18   : > { %5637 = vmatpush3.bf16.msra.mxu1 %v5931_v49 }
 0xc19   : > { %5654 = vmatprep.subr.bf16.mxu1 %v6027_v0 }
 0xcc7   : > { %v3313_v53 = vpop.f32.mrb[60].mxu0 }
 0xcc8   : > { %v5604_v54 = vpop.f32.mrb[61].mxu0 }
 0xcc9   : > { %v3316_v55 = vpop.f32.mrb[62].mxu0 }
 0xcca   : > { %v5605_v56 = vpop.f32.mrb[63].mxu0 }
 0xccb   : > { %v3128_v56 = vunpack.c.l.bf16 %v6532_v16  ;;  %v5966_v16 = vld [vmem:[#allocation3 + $0x4d8] sm:$0xff]  }
 0xcce   : > { %v3246_v57 = vpop.f32.mrb[60].mxu1 }
 0xccf   : > { %v3314_v59 = vadd.f32 %v3313_v53, %v3246_v57  ;;  %v5592_v58 = vpop.f32.mrb[61].mxu1 }
 0xcd0   : > { %v3249_v60 = vpop.f32.mrb[62].mxu1 }
 0xcd1   : > { %v5593_v61 = vpop.f32.mrb[63].mxu1 }
 0xcde   : > { %v3394_v62 = vpop.f32.mrb[64].mxu1 }
 0xcdf   : > { %v3400_v63 = vadd.f32 %v3394_v62, %v3314_v59  ;;  %v5616_v1 = vpop.f32.mrb[65].mxu1 }
 0xce0   : > { %v3397_v2 = vpop.f32.mrb[66].mxu1 }
 0xce1   : > { %v3406_v3 = vadd.f32 %v4926_v27, %v3400_v63  ;;  %v5617_v4 = vpop.f32.mrb[67].mxu1 }
 0xce3   : > { %v3407_v7 = vmax.f32 %v3406_v3, 0.0 }
 0xce5   : > { %v5018_v21 = vpack.c.bf16 %v3407_v7, %v3407_v7 }
 0xce7   : > { %v3418_v8 = vshrl.u32 %v5018_v21, 16  ;;  %v3421_v10 = vshll.u32 %v5018_v21, 16 }
 0xce9   : > { %v3420_v9 = vrot.slane %v3418_v8, 7 }
 0xceb   : > { %v3423_v11 = vor.u32 %v3421_v10, %v3420_v9 }
 0xced   : > { %v3426_v13 = vsel %vm6537_vm6, %v3423_v11, %v3425_v12 }
 0xcee   : > { %3427 = vst [vmem:[#allocation2] sm:$0x3] %v3426_v13  ;;  %v5949_v13 = vld [vmem:[#allocation3 + $0x460] sm:$0xff]  }
 0xcf5   : > { %v3685_v14 = vld [vmem:[#allocation2] sm:$0x1]  ;;  %v3688_v15 = vld [vmem:[#allocation2] sm:$0x2] }
 0xcf6   : > { %v3428_v17 = vld [vmem:[#allocation2] sm:$0x1]  ;;  %v3686_v18 = vsel %vm6134_vm4, 0, %v3685_v14  ;;  %v3689_v19 = vsel %vm6495_vm14, 0, %v3688_v15  ;;  %v5950_v15 = vld [vmem:[#allocation3 + $0x468] sm:$0xff]  }
 0xcf7   : > { %5639 = vmatmul.mubr.msk.bf16.vlgmr.msra.gmra.mrb[68].mxu1 %vm471_vm11, %v3428_v17  ;;  %v5934_v20 = vld [vmem:[#allocation2] ss:$0 sps:$4 sm:$0x33]   ;;  %3690 = vst [vmem:[#allocation2] sm:$0x2] %v3689_v19 }
 0xcf8   : > { %v5939_v22 = vld [vmem:[#allocation2] ss:$0 sps:$4 sm:$0x22]   ;;  %5662 = vmatprep.mubr.msk.bf16.mxu1 %vm6028_vm0, %v6027_v0  ;;  %3687 = vst [vmem:[#allocation2] sm:$0x1] %v3686_v18  ;;  %v3454_v23 = vshll.u32 %v5934_v20, 16  ;;  %5655 = vmatpush3.bf16.msra.mxu1 %v5942_v34 }
 0xcf9   : > { %v3452_v25 = vshrl.u32 %v5934_v20, 16  ;;  %v3605_v32 = vrot.slane %v5939_v22, 1  ;;  %5656 = vmatprep.subr.bf16.mxu1 %v6027_v0  ;;  %v5951_v20 = vld [vmem:[#allocation3 + $0x470] sm:$0xff]   ;;  %v5952_v22 = vld [vmem:[#allocation3 + $0x478] sm:$0xff]  }
 0xcfa   : > { %v3456_v26 = vrot.slane %v3454_v23, 1 }
 0xcfc   : > { %v3457_v29 = vor.u32 %v3456_v26, %v3452_v25  ;;  %5657 = vmatpush3.bf16.msra.mxu1 %v5944_v37  ;;  %v5954_v25 = vld [vmem:[#allocation3 + $0x480] sm:$0xff]  }
 0xcfd   : > { %5658 = vmatprep.subr.bf16.mxu1 %v6027_v0 }
 0xcfe   : > { %5627 = vmatmul.mubr.msk.bf16.vlgmr.msra.gmra.mrb[64].mxu0 %vm471_vm11, %v3457_v29 }
 0xcff   : > { %5643 = vmatpush3.bf16.msra.mxu0 %v5935_v28  ;;  %5650 = vmatprep.mubr.msk.bf16.mxu0 %vm6028_vm0, %v6027_v0  ;;  %v3702_v2 = vld [vmem:[#allocation2] sm:$0x3] }
 0xd00   : > { %5644 = vmatprep.subr.bf16.mxu0 %v6027_v0  ;;  %5659 = vmatpush3.bf16.msra.mxu1 %v5946_v51 }
 0xd01   : > { %5660 = vmatprep.subr.bf16.mxu1 %v6027_v0 }
 0xd03   : > { %5645 = vmatpush3.bf16.msra.mxu0 %v5936_v30 }
 0xd04   : > { %5646 = vmatprep.subr.bf16.mxu0 %v6027_v0  ;;  %5661 = vmatpush3.bf16.msra.mxu1 %v5947_v39 }
 0xd05   : > { %5678 = vmatprep.subr.bf16.mxu1 %v6027_v0 }
 0xd07   : > { %5647 = vmatpush3.bf16.msra.mxu0 %v5937_v36 }
 0xd08   : > { %5648 = vmatprep.subr.bf16.mxu0 %v6027_v0 }
 0xd0b   : > { %5649 = vmatpush3.bf16.msra.mxu0 %v5938_v31 }
 0xd0c   : > { %5666 = vmatprep.subr.bf16.mxu0 %v6027_v0 }
 0xd0e   : > { %5651 = vmatmul.mubr.msk.bf16.vlgmr.msra.gmra.mrb[68].mxu0 %vm471_vm11, %v3605_v32 }
 0xd0f   : > { %5674 = vmatprep.mubr.msk.bf16.mxu0 %vm6028_vm0, %v6027_v0  ;;  %5667 = vmatpush3.bf16.msra.mxu0 %v5940_v44 }
 0xd10   : > { %5668 = vmatprep.subr.bf16.mxu0 %v6027_v0 }
 0xd13   : > { %5669 = vmatpush3.bf16.msra.mxu0 %v5941_v33 }
 0xd14   : > { %5670 = vmatprep.subr.bf16.mxu0 %v6027_v0 }
 0xd17   : > { %5671 = vmatpush3.bf16.msra.mxu0 %v5943_v35  ;;  %v4964_v35 = vld [vmem:[%s6708_s2 + $0xb] ss:$0 sm:$0xff] }
 0xd18   : > { %5672 = vmatprep.subr.bf16.mxu0 %v6027_v0 }
 0xd1b   : > { %5673 = vmatpush3.bf16.msra.mxu0 %v5945_v38 }
 0xd1c   : > { %5690 = vmatprep.subr.bf16.mxu0 %v6027_v0 }
 0xdca   : > { %v3586_v40 = vpop.f32.mrb[68].mxu1 }
 0xdcb   : > { %v5640_v41 = vpop.f32.mrb[69].mxu1 }
 0xdcc   : > { %v3589_v42 = vpop.f32.mrb[70].mxu1 }
 0xdcd   : > { %v5641_v43 = vpop.f32.mrb[71].mxu1 }
 0xdce   : > { %v4965_v43 = vld [vmem:[%s6709_s3 + $0xc] sm:$0x1] }
 0xdd1   : > { %v3519_v45 = vpop.f32.mrb[64].mxu0 }
 0xdd2   : > { %v3587_v46 = vadd.f32 %v3586_v40, %v3519_v45  ;;  %v5628_v47 = vpop.f32.mrb[65].mxu0  ;;  %v5955_v45 = vld [vmem:[#allocation3 + $0x4a0] sm:$0xff]  }
 0xdd3   : > { %v3522_v48 = vpop.f32.mrb[66].mxu0  ;;  %v5957_v47 = vld [vmem:[#allocation3 + $0x4a8] sm:$0xff]  }
 0xdd4   : > { %v5629_v49 = vpop.f32.mrb[67].mxu0  ;;  %v5958_v48 = vld [vmem:[#allocation3 + $0x490] sm:$0xff]  }
 0xdd5   : > { %v5959_v49 = vld [vmem:[#allocation3 + $0x4b0] sm:$0xff]  }
 0xde1   : > { %v3667_v50 = vpop.f32.mrb[68].mxu0 }
 0xde2   : > { %v3673_v53 = vadd.f32 %v3667_v50, %v3587_v46  ;;  %v5652_v54 = vpop.f32.mrb[69].mxu0  ;;  %v5956_v46 = vld [vmem:[#allocation3 + $0x488] sm:$0xff]   ;;  %v5960_v50 = vld [vmem:[#allocation3 + $0x498] sm:$0xff]  }
 0xde3   : > { %v3670_v55 = vpop.f32.mrb[70].mxu0 }
 0xde4   : > { %v3679_v57 = vadd.f32 %v4945_v52, %v3673_v53  ;;  %v5653_v59 = vpop.f32.mrb[71].mxu0  ;;  %v5961_v52 = vld [vmem:[#allocation3 + $0x4b8] sm:$0xff]  }
 0xde6   : > { %v3680_v58 = vadd.f32 %v3679_v57, %v3128_v56 }
 0xde8   : > { %v3681_v60 = vmax.f32 %v3680_v58, 0.0 }
 0xdea   : > { %v3682_v61 = vpack.c.bf16 %v3681_v60, %v3681_v60 }
 0xdec   : > { %3684 = vst.msk [vmem:[%s354_s30] sm:$0x1] %vm363_vm3, %v3682_v61  ;;  %v3695_v62 = vshrl.u32 %v3682_v61, 16  ;;  %v3698_v63 = vshll.u32 %v3682_v61, 16  ;;  %vm3964_vm3 = vcmask 1040384  }
 0xdee   : > { %v3697_v27 = vrot.slane %v3695_v62, 7 }
 0xdf0   : > { %v3700_v1 = vor.u32 %v3698_v63, %v3697_v27  ;;  %v5963_v63 = vld [vmem:[#allocation3 + $0x4c0] sm:$0xff]  }
 0xdf2   : > { %v3703_v3 = vsel %vm6537_vm6, %v3700_v1, %v3702_v2  ;;  %v5964_v2 = vld [vmem:[#allocation3 + $0x4c8] sm:$0xff]  }
 0xdf3   : > { %3704 = vst [vmem:[#allocation2] sm:$0x3] %v3703_v3  ;;  %v5965_v3 = vld [vmem:[#allocation3 + $0x4d0] sm:$0xff]  }
 0xdfa   : > { %v3705_v4 = vld [vmem:[#allocation2] sm:$0x1]  ;;  %v4014_v8 = vld [vmem:[#allocation2] sm:$0x2] }
 0xdfb   : > { %5675 = vmatmul.mubr.msk.bf16.vlgmr.msra.gmra.mrb[72].mxu0 %vm471_vm11, %v3705_v4  ;;  %v4010_v7 = vsel %vm6134_vm4, 0, %v3705_v4  ;;  %v5948_v21 = vld [vmem:[#allocation2] ss:$0 sps:$4 sm:$0x33]   ;;  %v4015_v24 = vsel %vm6610_vm8, 0, %v4014_v8  ;;  %v5970_v8 = vld [vmem:[#allocation3 + $0x4e8] sm:$0xff]  }
 0xdfc   : > { %4011 = vst [vmem:[#allocation2] sm:$0x1] %v4010_v7  ;;  %v5953_v9 = vld [vmem:[#allocation2] ss:$0 sps:$4 sm:$0x22]   ;;  %5692 = vmatprep.mubr.msk.bf16.mxu0 %vm6028_vm0, %v6027_v0  ;;  %v3731_v10 = vshll.u32 %v5948_v21, 16 }
 0xdfd   : > { %4016 = vst [vmem:[#allocation2] sm:$0x2] %v4015_v24  ;;  %v3729_v11 = vshrl.u32 %v5948_v21, 16  ;;  %v6624_v17 = vld [vmem:[#allocation2] ss:$0 sps:$4 sm:$0x22]  }
 0xdfe   : > { %v3733_v12 = vrot.slane %v3731_v10, 1  ;;  %v3882_v23 = vrot.slane %v5953_v9, 1  ;;  %v4199_v4 = vrot.slane %v6624_v17, 1  ;;  %v5968_v7 = vld [vmem:[#allocation3 + $0x4e0] sm:$0xff]   ;;  %v5971_v9 = vld [vmem:[#allocation3 + $0x508] sm:$0xff]   ;;  %v5972_v24 = vld [vmem:[#allocation3 + $0x4f0] sm:$0xff]  }
 0xdff   : > { %v5969_v21 = vld [vmem:[#allocation3 + $0x500] sm:$0xff]   ;;  %v5973_v10 = vld [vmem:[#allocation3 + $0x510] sm:$0xff]  }
 0xe00   : > { %v3734_v14 = vor.u32 %v3733_v12, %v3729_v11  ;;  %v5974_v11 = vld [vmem:[#allocation3 + $0x4f8] sm:$0xff]  }
 0xe01   : > { %v5975_v12 = vld [vmem:[#allocation3 + $0x518] sm:$0xff]  }
 0xe02   : > { %5663 = vmatmul.mubr.msk.bf16.vlgmr.msra.gmra.mrb[72].mxu1 %vm471_vm11, %v3734_v14 }
 0xe03   : > { %5679 = vmatpush3.bf16.msra.mxu1 %v5949_v13  ;;  %5686 = vmatprep.mubr.msk.bf16.mxu1 %vm6028_vm0, %v6027_v0  ;;  %v4024_v58 = vld [vmem:[#allocation2] sm:$0x1] }
 0xe04   : > { %5680 = vmatprep.subr.bf16.mxu1 %v6027_v0  ;;  %v4273_v18 = vld [vmem:[#allocation2] sm:$0x2] }
 0xe05   : > { %v4274_v19 = vsel %vm6610_vm8, 0, %v4273_v18 }
 0xe06   : > { %4275 = vst [vmem:[#allocation2] sm:$0x2] %v4274_v19 }
 0xe07   : > { %5681 = vmatpush3.bf16.msra.mxu1 %v5950_v15 }
 0xe08   : > { %5682 = vmatprep.subr.bf16.mxu1 %v6027_v0 }
 0xe0b   : > { %5683 = vmatpush3.bf16.msra.mxu1 %v5951_v20 }
 0xe0c   : > { %5684 = vmatprep.subr.bf16.mxu1 %v6027_v0 }
 0xe0f   : > { %5685 = vmatpush3.bf16.msra.mxu1 %v5952_v22 }
 0xe10   : > { %5708 = vmatprep.subr.bf16.mxu1 %v6027_v0 }
 0xe12   : > { %5687 = vmatmul.mubr.msk.bf16.vlgmr.msra.gmra.mrb[76].mxu1 %vm471_vm11, %v3882_v23 }
 0xe13   : > { %5716 = vmatprep.mubr.msk.bf16.mxu1 %vm6028_vm0, %v6027_v0  ;;  %5709 = vmatpush3.bf16.msra.mxu1 %v5954_v25 }
 0xe14   : > { %5710 = vmatprep.subr.bf16.mxu1 %v6027_v0 }
 0xe17   : > { %5711 = vmatpush3.bf16.msra.mxu1 %v5956_v46 }
 0xe18   : > { %5712 = vmatprep.subr.bf16.mxu1 %v6027_v0 }
 0xe1b   : > { %5713 = vmatpush3.bf16.msra.mxu1 %v5958_v48 }
 0xe1c   : > { %5714 = vmatprep.subr.bf16.mxu1 %v6027_v0 }
 0xe1f   : > { %5715 = vmatpush3.bf16.msra.mxu1 %v5960_v50 }
 0xe20   : > { %5732 = vmatprep.subr.bf16.mxu1 %v6027_v0 }
 0xece   : > { %v3863_v26 = vpop.f32.mrb[72].mxu0 }
 0xecf   : > { %v5676_v28 = vpop.f32.mrb[73].mxu0 }
 0xed0   : > { %v3866_v29 = vpop.f32.mrb[74].mxu0 }
 0xed1   : > { %v5677_v30 = vpop.f32.mrb[75].mxu0 }
 0xed5   : > { %v3796_v36 = vpop.f32.mrb[72].mxu1 }
 0xed6   : > { %v3864_v31 = vadd.f32 %v3863_v26, %v3796_v36  ;;  %v5664_v32 = vpop.f32.mrb[73].mxu1  ;;  %v4268_v26 = vld [vmem:[%s6708_s2 + $0xc] sm:$0x1] }
 0xed7   : > { %v3799_v44 = vpop.f32.mrb[74].mxu1 }
 0xed8   : > { %v5665_v33 = vpop.f32.mrb[75].mxu1 }
 0xee5   : > { %v3944_v34 = vpop.f32.mrb[76].mxu1 }
 0xee6   : > { %v3950_v37 = vadd.f32 %v3944_v34, %v3864_v31  ;;  %v5688_v38 = vpop.f32.mrb[77].mxu1 }
 0xee7   : > { %v3947_v51 = vpop.f32.mrb[78].mxu1 }
 0xee8   : > { %v3956_v39 = vadd.f32 %v4964_v35, %v3950_v37  ;;  %v5689_v40 = vpop.f32.mrb[79].mxu1  ;;  %v5977_v51 = vld [vmem:[#allocation3 + $0x520] sm:$0xff]  }
 0xee9   : > { %v5978_v40 = vld [vmem:[#allocation3 + $0x528] sm:$0xff]  }
 0xeea   : > { %v3959_v41 = vpack.c.bf16 %v3956_v39, %v3956_v39 }
 0xeec   : > { %v3966_v42 = vsel %vm3964_vm3, %v3959_v41, 0  ;;  %v5979_v41 = vld [vmem:[#allocation3 + $0x530] sm:$0xff]  }
 0xeed   : > { %5691 = vmatpush3.bf16.msra.mxu0 %v3966_v42  ;;  %v5981_v42 = vld [vmem:[#allocation2] ss:$0 sps:$4 sm:$0x22]  }
 0xeee   : > { %5696 = vmatprep.subr.bf16.mxu0 %v6027_v0 }
 0xef0   : > { %5693 = vmatmul.mubr.msk.bf16.vlgmr.msra.gmra.mrb[76].mxu0 %vm3960_vm9, %v4965_v43  ;;  %v4459_v43 = vrot.slane %v5981_v42, 1 }
 0xef1   : > { %5704 = vmatprep.mubr.msk.bf16.mxu0 %vm6028_vm0, %v6027_v0  ;;  %5697 = vmatpush3.bf16.msra.mxu0 %v5955_v45 }
 0xef2   : > { %5698 = vmatprep.subr.bf16.mxu0 %v6027_v0 }
 0xef5   : > { %5699 = vmatpush3.bf16.msra.mxu0 %v5957_v47 }
 0xef6   : > { %5700 = vmatprep.subr.bf16.mxu0 %v6027_v0 }
 0xef9   : > { %5701 = vmatpush3.bf16.msra.mxu0 %v5959_v49 }
 0xefa   : > { %5702 = vmatprep.subr.bf16.mxu0 %v6027_v0 }
 0xefd   : > { %5703 = vmatpush3.bf16.msra.mxu0 %v5961_v52 }
 0xefe   : > { %5720 = vmatprep.subr.bf16.mxu0 %v6027_v0 }
 0xfc3   : > { %v4002_v53 = vpop.f32.mrb[76].mxu0 }
 0xfc4   : > { %v6652_v54 = vpack.c.bf16 %v4002_v53, %v4002_v53  ;;  %v5694_v55 = vpop.f32.mrb[77].mxu0 }
 0xfc5   : > { %v4005_v56 = vpop.f32.mrb[78].mxu0 }
 0xfc6   : > { %v4021_v57 = vshll.u32 %v6652_v54, 16  ;;  %v5695_v59 = vpop.f32.mrb[79].mxu0 }
 0xfc8   : > { %v4025_v60 = vsel %vm6147_vm5, %v4021_v57, %v4024_v58 }
 0xfc9   : > { %4026 = vst [vmem:[#allocation2] sm:$0x1] %v4025_v60  ;;  %v4009_v60 = vunpack.c.l.bf16 %v6652_v54 }
 0xfd0   : > { %v4027_v61 = vld [vmem:[#allocation2] sm:$0x1] }
 0xfd1   : > { %v4968_v62 = vcombine.low %v4027_v61, %v4027_v61  ;;  %5717 = vmatmul.mubr.msk.bf16.vlgmr.msra.gmra.mrb[80].mxu1 %vm471_vm11, %v4027_v61  ;;  %v4271_v27 = vsel %vm6134_vm4, 0, %v4027_v61 }
 0xfd2   : > { %4272 = vst [vmem:[#allocation2] sm:$0x1] %v4271_v27  ;;  %5740 = vmatprep.mubr.msk.bf16.mxu1 %vm6028_vm0, %v6027_v0  ;;  %5733 = vmatpush3.bf16.msra.mxu1 %v5969_v21 }
 0xfd3   : > { %v4050_v1 = vshrl.u32 %v4968_v62, 16  ;;  %5734 = vmatprep.subr.bf16.mxu1 %v6027_v0 }
 0xfd5   : > { %5705 = vmatmul.mubr.msk.bf16.vlgmr.msra.gmra.mrb[80].mxu0 %vm471_vm11, %v4050_v1  ;;  %v4533_v1 = vld [vmem:[%s357_s19] sm:$0x1] }
 0xfd6   : > { %5721 = vmatpush3.bf16.msra.mxu0 %v5963_v63  ;;  %5728 = vmatprep.mubr.msk.bf16.mxu0 %vm6028_vm0, %v6027_v0 }
 0xfd7   : > { %5722 = vmatprep.subr.bf16.mxu0 %v6027_v0  ;;  %5735 = vmatpush3.bf16.msra.mxu1 %v5971_v9 }
 0xfd8   : > { %5736 = vmatprep.subr.bf16.mxu1 %v6027_v0 }
 0xfd9   : > { %v4284_v34 = vld [vmem:[#allocation2] sm:$0x1] }
 0xfda   : > { %5723 = vmatpush3.bf16.msra.mxu0 %v5964_v2 }
 0xfdb   : > { %5724 = vmatprep.subr.bf16.mxu0 %v6027_v0  ;;  %5737 = vmatpush3.bf16.msra.mxu1 %v5973_v10 }
 0xfdc   : > { %5738 = vmatprep.subr.bf16.mxu1 %v6027_v0 }
 0xfde   : > { %5725 = vmatpush3.bf16.msra.mxu0 %v5965_v3 }
 0xfdf   : > { %5726 = vmatprep.subr.bf16.mxu0 %v6027_v0  ;;  %5739 = vmatpush3.bf16.msra.mxu1 %v5975_v12 }
 0xfe0   : > { %5756 = vmatprep.subr.bf16.mxu1 %v6027_v0 }
 0xfe2   : > { %5727 = vmatpush3.bf16.msra.mxu0 %v5966_v16 }
 0xfe3   : > { %5744 = vmatprep.subr.bf16.mxu0 %v6027_v0 }
 0xfe5   : > { %5729 = vmatmul.mubr.msk.bf16.vlgmr.msra.gmra.mrb[84].mxu0 %vm471_vm11, %v4199_v4 }
 0xfe6   : > { %5752 = vmatprep.mubr.msk.bf16.mxu0 %vm6028_vm0, %v6027_v0  ;;  %5745 = vmatpush3.bf16.msra.mxu0 %v5968_v7 }
 0xfe7   : > { %5746 = vmatprep.subr.bf16.mxu0 %v6027_v0 }
 0xfea   : > { %5747 = vmatpush3.bf16.msra.mxu0 %v5970_v8 }
 0xfeb   : > { %5748 = vmatprep.subr.bf16.mxu0 %v6027_v0 }
 0xfee   : > { %5749 = vmatpush3.bf16.msra.mxu0 %v5972_v24 }
 0xfef   : > { %5750 = vmatprep.subr.bf16.mxu0 %v6027_v0 }
 0xff2   : > { %5751 = vmatpush3.bf16.msra.mxu0 %v5974_v11 }
0x10a4   : > { %v4180_v13 = vpop.f32.mrb[80].mxu1 }
0x10a5   : > { %v5718_v14 = vpop.f32.mrb[81].mxu1 }
0x10a6   : > { %v4183_v15 = vpop.f32.mrb[82].mxu1 }
0x10a7   : > { %v5719_v17 = vpop.f32.mrb[83].mxu1 }
0x10a8   : > { %v4113_v18 = vpop.f32.mrb[80].mxu0 }
0x10a9   : > { %v4181_v19 = vadd.f32 %v4180_v13, %v4113_v18  ;;  %v5706_v20 = vpop.f32.mrb[81].mxu0 }
0x10aa   : > { %v4116_v22 = vpop.f32.mrb[82].mxu0 }
0x10ab   : > { %v5707_v23 = vpop.f32.mrb[83].mxu0 }
0x10b8   : > { %v4261_v25 = vpop.f32.mrb[84].mxu0 }
0x10b9   : > { %v4267_v28 = vadd.f32 %v4261_v25, %v4181_v19  ;;  %v5730_v29 = vpop.f32.mrb[85].mxu0 }
0x10ba   : > { %v4264_v30 = vpop.f32.mrb[86].mxu0 }
0x10bb   : > { %v4269_v36 = vadd.f32 %v4268_v26, %v4267_v28  ;;  %v5731_v31 = vpop.f32.mrb[87].mxu0 }
0x10bd   : > { %v4270_v32 = vmax.f32 %v4269_v36, 0.0 }
0x10bf   : > { %v5021_v44 = vpack.c.bf16 %v4270_v32, %v4270_v32 }
0x10c1   : > { %v4281_v33 = vshll.u32 %v5021_v44, 16 }
0x10c3   : > { %v4285_v35 = vsel %vm6147_vm5, %v4281_v33, %v4284_v34 }
0x10c4   : > { %4286 = vst [vmem:[#allocation2] sm:$0x1] %v4285_v35 }
0x10cb   : > { %v4287_v37 = vld [vmem:[#allocation2] sm:$0x1] }
0x10cc   : > { %v4986_v38 = vcombine.low %v4287_v37, %v4287_v37  ;;  %5753 = vmatmul.mubr.msk.bf16.vlgmr.msra.gmra.mrb[88].mxu0 %vm471_vm11, %v4287_v37 }
0x10ce   : > { %v4310_v39 = vshrl.u32 %v4986_v38, 16 }
0x10d0   : > { %5741 = vmatmul.mubr.msk.bf16.vlgmr.msra.gmra.mrb[84].mxu1 %vm471_vm11, %v4310_v39 }
0x10d1   : > { %5757 = vmatpush3.bf16.msra.mxu1 %v5977_v51  ;;  %5764 = vmatprep.mubr.msk.bf16.mxu1 %vm6028_vm0, %v6027_v0 }
0x10d2   : > { %5758 = vmatprep.subr.bf16.mxu1 %v6027_v0 }
0x10d5   : > { %5759 = vmatpush3.bf16.msra.mxu1 %v5978_v40 }
0x10d6   : > { %5760 = vmatprep.subr.bf16.mxu1 %v6027_v0 }
0x10d9   : > { %5761 = vmatpush3.bf16.msra.mxu1 %v5979_v41 }
0x10da   : > { %5762 = vmatprep.subr.bf16.mxu1 %v6027_v0  ;;  %v4528_v0 = vld [vmem:[%s6708_s2 + $0xd] sm:$0x1] }
0x10dd   : > { %5763 = vmatpush3.bf16.msra.mxu1 %v5980_v6 }
0x10e0   : > { %5765 = vmatmul.mubr.msk.bf16.vlgmr.msra.gmra.mrb[88].mxu1 %vm471_vm11, %v4459_v43 }
0x119f   : > { %v4440_v45 = vpop.f32.mrb[88].mxu0 }
0x11a0   : > { %v5754_v46 = vpop.f32.mrb[89].mxu0 }
0x11a1   : > { %v4443_v47 = vpop.f32.mrb[90].mxu0 }
0x11a2   : > { %v5755_v48 = vpop.f32.mrb[91].mxu0 }
0x11a3   : > { %v4373_v49 = vpop.f32.mrb[84].mxu1 }
0x11a4   : > { %v4441_v50 = vadd.f32 %v4440_v45, %v4373_v49  ;;  %v5742_v52 = vpop.f32.mrb[85].mxu1 }
0x11a5   : > { %v4376_v53 = vpop.f32.mrb[86].mxu1 }
0x11a6   : > { %v5743_v55 = vpop.f32.mrb[87].mxu1 }
0x11b3   : > { %v4521_v56 = vpop.f32.mrb[88].mxu1 }
0x11b4   : > { %v4527_v57 = vadd.f32 %v4521_v56, %v4441_v50  ;;  %v5766_v59 = vpop.f32.mrb[89].mxu1 }
0x11b5   : > { %v4524_v58 = vpop.f32.mrb[90].mxu1 }
0x11b6   : > { %v4529_v61 = vadd.f32 %v4528_v0, %v4527_v57  ;;  %v5767_v62 = vpop.f32.mrb[91].mxu1 }
0x11b8   : > { %v4530_v27 = vadd.f32 %v4529_v61, %v4009_v60 }
0x11ba   : > { %v4531_v63 = vmax.f32 %v4530_v27, 0.0 }
0x11bc   : > { %v4532_v2 = vpack.c.bf16 %v4531_v63, %v4531_v63 }
0x11be   : > { %v4534_v3 = vsel %vm6134_vm4, %v4532_v2, %v4533_v1 }
0x11bf   : > { %4535 = vst [vmem:[%s357_s19] sm:$0x1] %v4534_v3 }
0x11c0 PF: > { %s20_s27 = sadd.s32 1, %s6022_s27  }
0x11c1   : > { %p17_p3 = scmp.ge.s32.totalorder %s20_s27, 4  }
0x11c3   :  { %19 = sbr.rel (!%p17_p3) target bundleno = 1 (0x1), region = 163 }
0x11ca   :  { %4609 = vsyncpa [#allocation4], 1 }
0x11cb   :  { %4611 = vsyncpa [#allocation4 + $0x1], 1 }

</bundles_post_ra>
